<compile_context>
chip_gen: v7x
topology: tpu7x:2x2x1
jax: 0.10.0
libtpu: 0.0.40
codegen_flags: <defaults>
</compile_context>

<pallas_src>
import functools

import jax
import jax.numpy as jnp
from jax import lax
from jax.experimental import pallas as pl
from jax.experimental.pallas import tpu as pltpu


def _sigmoid(z):
    return 1.0 / (1.0 + jnp.exp(-z))


def _channel_attn_kernel(x_ref, w1_ref, w2_ref, attn_ref, max_sc, sum_sc, *, inv_hw):
    """Grid (N, HW_tiles): accumulate per-channel max/sum across HW tiles in
    VMEM scratch; on the last tile run the shared MLP + sigmoid."""
    t = pl.program_id(1)

    @pl.when(t == 0)
    def _():
        max_sc[...] = jnp.full_like(max_sc, -jnp.inf)
        sum_sc[...] = jnp.zeros_like(sum_sc)

    xb = x_ref[0]                                            # (tile, C)
    max_sc[...] = jnp.maximum(max_sc[...], jnp.max(xb, axis=0, keepdims=True))
    sum_sc[...] = sum_sc[...] + jnp.sum(xb, axis=0, keepdims=True)

    @pl.when(t == pl.num_programs(1) - 1)
    def _():
        mx = max_sc[...]                                     # (1, C)
        av = sum_sc[...] * inv_hw                            # (1, C)

        def mlp(v):
            hid = jnp.maximum(
                jnp.dot(v, w1_ref[...], preferred_element_type=jnp.float32), 0.0)
            return jnp.dot(hid, w2_ref[...], preferred_element_type=jnp.float32)

        attn_ref[0] = _sigmoid(mlp(mx) + mlp(av)).astype(attn_ref.dtype)


def _spatial_attn_kernel(x_ref, attn_ref, wsp_ref, o_ref, mpad_ref, apad_ref, *, ksize):
    """Grid (N,): per image, apply channel attention, build [max_c, mean_c],
    KxK spatial conv via shifted taps on zero-padded VMEM scratch, sigmoid,
    multiply, write out."""
    pad = ksize // 2
    _, h, w, _c = x_ref.shape

    x_ca = x_ref[0] * attn_ref[0]                            # (H, W, C) * (1, C)
    mx = jnp.max(x_ca, axis=-1)                              # (H, W)
    av = jnp.mean(x_ca, axis=-1)                             # (H, W)

    mpad_ref[...] = jnp.zeros_like(mpad_ref)
    apad_ref[...] = jnp.zeros_like(apad_ref)
    mpad_ref[pl.ds(pad, h), pl.ds(pad, w)] = mx
    apad_ref[pl.ds(pad, h), pl.ds(pad, w)] = av

    acc = jnp.zeros((h, w), jnp.float32)
    for kh in range(ksize):
        for kw in range(ksize):
            wm = wsp_ref[kh * ksize + kw]                    # tap for max channel
            wa = wsp_ref[ksize * ksize + kh * ksize + kw]    # tap for avg channel
            acc = acc + wm * mpad_ref[pl.ds(kh, h), pl.ds(kw, w)] \
                      + wa * apad_ref[pl.ds(kh, h), pl.ds(kw, w)]

    spatial = _sigmoid(acc)                                  # (H, W)
    o_ref[0] = (x_ca * spatial[:, :, None]).astype(o_ref.dtype)


@functools.partial(jax.jit, static_argnames=("hw_tile",))
def cbam_forward(x, mlp_w1, mlp_w2, spatial_w, *, hw_tile=512):
    """x: (N, C, H, W) f32; mlp_w1: (C//r, C, 1, 1); mlp_w2: (C, C//r, 1, 1);
    spatial_w: (1, 2, K, K).  Returns NCHW, matching CBAMLayer.forward."""
    n, c, h, w = x.shape
    ch = mlp_w1.shape[0]
    k = spatial_w.shape[-1]
    hw = h * w

    # Channels-last internally: C lands on the 128-lane axis.
    x_nhwc = jnp.transpose(x, (0, 2, 3, 1))                  # (N, H, W, C)
    x_rows = x_nhwc.reshape(n, hw, c)                        # (N, H*W, C)

    w1m = mlp_w1.reshape(ch, c).T                            # (C, Ch)
    w2m = mlp_w2.reshape(c, ch).T                            # (Ch, C)
    wsp = spatial_w.reshape(2 * k * k)                       # [c, kh, kw] flattened

    tile = min(hw_tile, hw)
    if hw % tile != 0:
        tile = hw                                            # fallback: single tile
    num_t = hw // tile

    # ---- Pass 1: channel attention (N, 1, C) ------------------------------
    attn = pl.pallas_call(
        functools.partial(_channel_attn_kernel, inv_hw=1.0 / hw),
        grid=(n, num_t),
        in_specs=[
            pl.BlockSpec((1, tile, c), lambda i, t: (i, t, 0)),
            pl.BlockSpec((c, ch), lambda i, t: (0, 0)),      # resident MLP weights
            pl.BlockSpec((ch, c), lambda i, t: (0, 0)),
        ],
        out_specs=pl.BlockSpec((1, 1, c), lambda i, t: (i, 0, 0)),
        out_shape=jax.ShapeDtypeStruct((n, 1, c), jnp.float32),
        scratch_shapes=[pltpu.VMEM((1, c), jnp.float32),     # running max
                        pltpu.VMEM((1, c), jnp.float32)],    # running sum
        compiler_params=pltpu.CompilerParams(
            dimension_semantics=("parallel", "arbitrary")),
    )(x_rows, w1m, w2m)

    # ---- Pass 2: apply channel attention + spatial attention, fused -------
    out_nhwc = pl.pallas_call(
        functools.partial(_spatial_attn_kernel, ksize=k),
        grid=(n,),
        in_specs=[
            pl.BlockSpec((1, h, w, c), lambda i: (i, 0, 0, 0)),
            pl.BlockSpec((1, 1, c), lambda i: (i, 0, 0)),
            pl.BlockSpec(memory_space=pltpu.MemorySpace.SMEM),   # conv taps
        ],
        out_specs=pl.BlockSpec((1, h, w, c), lambda i: (i, 0, 0, 0)),
        out_shape=jax.ShapeDtypeStruct((n, h, w, c), jnp.float32),
        scratch_shapes=[pltpu.VMEM((h + k - 1, w + k - 1), jnp.float32),
                        pltpu.VMEM((h + k - 1, w + k - 1), jnp.float32)],
        compiler_params=pltpu.CompilerParams(
            dimension_semantics=("parallel",)),
    )(x_nhwc, attn, wsp)

    return jnp.transpose(out_nhwc, (0, 3, 1, 2))             # back to NCHW


def _reference(x, mlp_w1, mlp_w2, spatial_w):
    """Pure-JAX reference matching PyTorch CBAMLayer.forward."""
    n, c, h, w = x.shape
    ch = mlp_w1.shape[0]
    w1 = mlp_w1.reshape(ch, c)
    w2 = mlp_w2.reshape(c, ch)

    maxp = jnp.max(x, axis=(2, 3))                           # (N, C)
    avgp = jnp.mean(x, axis=(2, 3))

    def mlp(v):
        return jnp.maximum(v @ w1.T, 0.0) @ w2.T

    chan = jax.nn.sigmoid(mlp(maxp) + mlp(avgp))             # (N, C)
    x_ca = x * chan[:, :, None, None]

    mx = jnp.max(x_ca, axis=1, keepdims=True)                # (N, 1, H, W)
    av = jnp.mean(x_ca, axis=1, keepdims=True)
    cat = jnp.concatenate([mx, av], axis=1)                  # (N, 2, H, W)
    conv = lax.conv_general_dilated(
        cat, spatial_w, window_strides=(1, 1), padding="SAME",
        dimension_numbers=("NCHW", "OIHW", "NCHW"))
    spatial = jax.nn.sigmoid(conv)                           # (N, 1, H, W)
    return spatial * x_ca


if __name__ == "__main__":
    # Small deterministic config: batch=2, channels=32, reduction=4 (hidden=8),
    # spatial=16x16, 7x7 spatial kernel.
    N, C, H, W = 2, 32, 16, 16
    RED, K = 4, 7
    CH = C // RED

    key = jax.random.PRNGKey(0)
    kx, k1, k2, k3 = jax.random.split(key, 4)
    x = jax.random.normal(kx, (N, C, H, W), jnp.float32)
    mlp_w1 = jax.random.normal(k1, (CH, C, 1, 1), jnp.float32) / jnp.sqrt(C)
    mlp_w2 = jax.random.normal(k2, (C, CH, 1, 1), jnp.float32) / jnp.sqrt(CH)
    spatial_w = jax.random.normal(k3, (1, 2, K, K), jnp.float32) / jnp.sqrt(2.0 * K * K)

    # hw_tile=128 -> 2 HW tiles, exercising the tiled/accumulating path.
    out = cbam_forward(x, mlp_w1, mlp_w2, spatial_w, hw_tile=128)
    out = jax.block_until_ready(out)

    ref = _reference(x, mlp_w1, mlp_w2, spatial_w)
    assert out.shape == (N, C, H, W)
    assert jnp.allclose(out, ref, atol=1e-4, rtol=1e-4), "mismatch vs reference"

    print("KERNEL_OK")
</pallas_src>

<mosaic_0001>
module attributes {stable_mosaic.version = 11 : i64} {
  func.func @_channel_attn_kernel(%arg0: i32, %arg1: i32, %arg2: memref<1x128x32xf32, #tpu.memory_space<vmem>>, %arg3: memref<32x8xf32, #tpu.memory_space<vmem>>, %arg4: memref<8x32xf32, #tpu.memory_space<vmem>>, %arg5: memref<1x1x32xf32, #tpu.memory_space<vmem>>, %arg6: memref<1x32xf32, #tpu.memory_space<vmem>>, %arg7: memref<1x32xf32, #tpu.memory_space<vmem>>) attributes {dimension_semantics = [#tpu.dimension_semantics<parallel>, #tpu.dimension_semantics<arbitrary>], iteration_bounds = array<i64: 2, 2>, scalar_prefetch = 0 : i64, scratch_operands = 2 : i64, tpu.core_type = #tpu.core_type<tc>, window_params = [{transform_indices = @transform_0, window_bounds = array<i64: 1, 128, 32>}, {pipeline_mode = #tpu.pipeline_mode<synchronous>, transform_indices = @transform_1, window_bounds = array<i64: 32, 8>}, {pipeline_mode = #tpu.pipeline_mode<synchronous>, transform_indices = @transform_2, window_bounds = array<i64: 8, 32>}, {transform_indices = @transform_3, window_bounds = array<i64: 1, 1, 32>}]} {
    %c0_i32 = arith.constant 0 : i32
    %0 = arith.cmpi eq, %arg1, %c0_i32 : i32
    %1 = arith.extui %0 : i1 to i32
    %c0_i32_0 = arith.constant 0 : i32
    %2 = arith.cmpi ne, %1, %c0_i32_0 : i32
    scf.if %2 {
      %cst_13 = arith.constant 0xFF800000 : f32
      %18 = vector.broadcast %cst_13 : f32 to vector<1x32xf32>
      %c0_14 = arith.constant 0 : index
      %c0_15 = arith.constant 0 : index
      %19 = vector.load %arg6[%c0_14, %c0_15] : memref<1x32xf32, #tpu.memory_space<vmem>>, vector<1x32xf32>
      tpu.vector_store %arg6[%c0_14, %c0_15], %18 {strides = array<i32>} : memref<1x32xf32, #tpu.memory_space<vmem>>, vector<1x32xf32>,
      %cst_16 = arith.constant 0.000000e+00 : f32
      %20 = vector.broadcast %cst_16 : f32 to vector<1x32xf32>
      %c0_17 = arith.constant 0 : index
      %c0_18 = arith.constant 0 : index
      %21 = vector.load %arg7[%c0_17, %c0_18] : memref<1x32xf32, #tpu.memory_space<vmem>>, vector<1x32xf32>
      tpu.vector_store %arg7[%c0_17, %c0_18], %20 {strides = array<i32>} : memref<1x32xf32, #tpu.memory_space<vmem>>, vector<1x32xf32>,
    } else {
    }
    %c0 = arith.constant 0 : index
    %c0_1 = arith.constant 0 : index
    %c0_2 = arith.constant 0 : index
    %3 = vector.load %arg2[%c0, %c0_1, %c0_2] : memref<1x128x32xf32, #tpu.memory_space<vmem>>, vector<1x128x32xf32>
    %4 = vector.shape_cast %3 : vector<1x128x32xf32> to vector<128x32xf32>
    %c0_3 = arith.constant 0 : index
    %c0_4 = arith.constant 0 : index
    %5 = vector.load %arg6[%c0_3, %c0_4] : memref<1x32xf32, #tpu.memory_space<vmem>>, vector<1x32xf32>
    %cst = arith.constant dense<0xFF800000> : vector<32xf32>
    %6 = vector.multi_reduction <maximumf>, %4, %cst [0] : vector<128x32xf32> to vector<32xf32>
    %7 = vector.shape_cast %6 : vector<32xf32> to vector<1x32xf32>
    %8 = arith.maximumf %5, %7 : vector<1x32xf32>
    %c0_5 = arith.constant 0 : index
    %c0_6 = arith.constant 0 : index
    %9 = vector.load %arg6[%c0_5, %c0_6] : memref<1x32xf32, #tpu.memory_space<vmem>>, vector<1x32xf32>
    tpu.vector_store %arg6[%c0_5, %c0_6], %8 {strides = array<i32>} : memref<1x32xf32, #tpu.memory_space<vmem>>, vector<1x32xf32>,
    %c0_7 = arith.constant 0 : index
    %c0_8 = arith.constant 0 : index
    %10 = vector.load %arg7[%c0_7, %c0_8] : memref<1x32xf32, #tpu.memory_space<vmem>>, vector<1x32xf32>
    %cst_9 = arith.constant dense<0.000000e+00> : vector<32xf32>
    %11 = vector.multi_reduction <add>, %4, %cst_9 [0] : vector<128x32xf32> to vector<32xf32>
    %12 = vector.shape_cast %11 : vector<32xf32> to vector<1x32xf32>
    %13 = arith.addf %10, %12 : vector<1x32xf32>
    %c0_10 = arith.constant 0 : index
    %c0_11 = arith.constant 0 : index
    %14 = vector.load %arg7[%c0_10, %c0_11] : memref<1x32xf32, #tpu.memory_space<vmem>>, vector<1x32xf32>
    tpu.vector_store %arg7[%c0_10, %c0_11], %13 {strides = array<i32>} : memref<1x32xf32, #tpu.memory_space<vmem>>, vector<1x32xf32>,
    %c1_i32 = arith.constant 1 : i32
    %15 = arith.cmpi eq, %arg1, %c1_i32 : i32
    %16 = arith.extui %15 : i1 to i32
    %c0_i32_12 = arith.constant 0 : i32
    %17 = arith.cmpi ne, %16, %c0_i32_12 : i32
    scf.if %17 {
      %c0_13 = arith.constant 0 : index
      %c0_14 = arith.constant 0 : index
      %18 = vector.load %arg6[%c0_13, %c0_14] : memref<1x32xf32, #tpu.memory_space<vmem>>, vector<1x32xf32>
      %c0_15 = arith.constant 0 : index
      %c0_16 = arith.constant 0 : index
      %19 = vector.load %arg7[%c0_15, %c0_16] : memref<1x32xf32, #tpu.memory_space<vmem>>, vector<1x32xf32>
      %cst_17 = arith.constant 3.906250e-03 : f32
      %20 = vector.broadcast %cst_17 : f32 to vector<1x32xf32>
      %21 = arith.mulf %19, %20 : vector<1x32xf32>
      %c0_18 = arith.constant 0 : index
      %c0_19 = arith.constant 0 : index
      %22 = vector.load %arg3[%c0_18, %c0_19] : memref<32x8xf32, #tpu.memory_space<vmem>>, vector<32x8xf32>
      %cst_20 = arith.constant dense<0.000000e+00> : vector<1x8xf32>
      %23 = tpu.matmul %18, %22, %cst_20 {dimension_numbers = #tpu.dot_dimension_numbers<[1], [0], [0], [1], [0, 0, 1, 1], [], []>} : vector<1x32xf32>, vector<32x8xf32>, vector<1x8xf32> -> vector<1x8xf32>
      %cst_21 = arith.constant 0.000000e+00 : f32
      %24 = vector.broadcast %cst_21 : f32 to vector<1x8xf32>
      %25 = arith.maximumf %23, %24 : vector<1x8xf32>
      %c0_22 = arith.constant 0 : index
      %c0_23 = arith.constant 0 : index
      %26 = vector.load %arg4[%c0_22, %c0_23] : memref<8x32xf32, #tpu.memory_space<vmem>>, vector<8x32xf32>
      %cst_24 = arith.constant dense<0.000000e+00> : vector<1x32xf32>
      %27 = tpu.matmul %25, %26, %cst_24 {dimension_numbers = #tpu.dot_dimension_numbers<[1], [0], [0], [1], [0, 0, 1, 1], [], []>} : vector<1x8xf32>, vector<8x32xf32>, vector<1x32xf32> -> vector<1x32xf32>
      %c0_25 = arith.constant 0 : index
      %c0_26 = arith.constant 0 : index
      %28 = vector.load %arg3[%c0_25, %c0_26] : memref<32x8xf32, #tpu.memory_space<vmem>>, vector<32x8xf32>
      %cst_27 = arith.constant dense<0.000000e+00> : vector<1x8xf32>
      %29 = tpu.matmul %21, %28, %cst_27 {dimension_numbers = #tpu.dot_dimension_numbers<[1], [0], [0], [1], [0, 0, 1, 1], [], []>} : vector<1x32xf32>, vector<32x8xf32>, vector<1x8xf32> -> vector<1x8xf32>
      %cst_28 = arith.constant 0.000000e+00 : f32
      %30 = vector.broadcast %cst_28 : f32 to vector<1x8xf32>
      %31 = arith.maximumf %29, %30 : vector<1x8xf32>
      %c0_29 = arith.constant 0 : index
      %c0_30 = arith.constant 0 : index
      %32 = vector.load %arg4[%c0_29, %c0_30] : memref<8x32xf32, #tpu.memory_space<vmem>>, vector<8x32xf32>
      %cst_31 = arith.constant dense<0.000000e+00> : vector<1x32xf32>
      %33 = tpu.matmul %31, %32, %cst_31 {dimension_numbers = #tpu.dot_dimension_numbers<[1], [0], [0], [1], [0, 0, 1, 1], [], []>} : vector<1x8xf32>, vector<8x32xf32>, vector<1x32xf32> -> vector<1x32xf32>
      %34 = arith.addf %27, %33 : vector<1x32xf32>
      %cst_32 = arith.constant 0.000000e+00 : f32
      %35 = vector.broadcast %cst_32 : f32 to vector<1x32xf32>
      %36 = arith.subf %35, %34 : vector<1x32xf32>
      %37 = math.exp %36 : vector<1x32xf32>
      %cst_33 = arith.constant 1.000000e+00 : f32
      %38 = vector.broadcast %cst_33 : f32 to vector<1x32xf32>
      %39 = arith.addf %38, %37 : vector<1x32xf32>
      %cst_34 = arith.constant 1.000000e+00 : f32
      %40 = vector.broadcast %cst_34 : f32 to vector<1x32xf32>
      %41 = arith.divf %40, %39 : vector<1x32xf32>
      %c0_35 = arith.constant 0 : index
      %c0_36 = arith.constant 0 : index
      %c0_37 = arith.constant 0 : index
      %42 = vector.load %arg5[%c0_35, %c0_36, %c0_37] : memref<1x1x32xf32, #tpu.memory_space<vmem>>, vector<1x1x32xf32>
      %43 = vector.shape_cast %42 : vector<1x1x32xf32> to vector<1x32xf32>
      %44 = vector.shape_cast %41 : vector<1x32xf32> to vector<1x1x32xf32>
      tpu.vector_store %arg5[%c0_35, %c0_36, %c0_37], %44 {strides = array<i32>} : memref<1x1x32xf32, #tpu.memory_space<vmem>>, vector<1x1x32xf32>,
    } else {
    }
    return
  }
  func.func @transform_0(%arg0: i32, %arg1: i32) -> (i32, i32, i32) {
    %c0_i32 = arith.constant 0 : i32
    %c0_i32_0 = arith.constant 0 : i32
    return %arg0, %arg1, %c0_i32 : i32, i32, i32
  }
  func.func @transform_1(%arg0: i32, %arg1: i32) -> (i32, i32) {
    %c0_i32 = arith.constant 0 : i32
    %c0_i32_0 = arith.constant 0 : i32
    %c0_i32_1 = arith.constant 0 : i32
    return %c0_i32, %c0_i32_0 : i32, i32
  }
  func.func @transform_2(%arg0: i32, %arg1: i32) -> (i32, i32) {
    %c0_i32 = arith.constant 0 : i32
    %c0_i32_0 = arith.constant 0 : i32
    %c0_i32_1 = arith.constant 0 : i32
    return %c0_i32, %c0_i32_0 : i32, i32
  }
  func.func @transform_3(%arg0: i32, %arg1: i32) -> (i32, i32, i32) {
    %c0_i32 = arith.constant 0 : i32
    %c0_i32_0 = arith.constant 0 : i32
    %c0_i32_1 = arith.constant 0 : i32
    return %arg0, %c0_i32, %c0_i32_0 : i32, i32, i32
  }
}

module attributes {stable_mosaic.version = 11 : i64} {
  func.func @_spatial_attn_kernel(%arg0: i32, %arg1: memref<1x16x16x32xf32, #tpu.memory_space<vmem>>, %arg2: memref<1x1x32xf32, #tpu.memory_space<vmem>>, %arg3: memref<98xf32, #tpu.memory_space<smem>>, %arg4: memref<1x16x16x32xf32, #tpu.memory_space<vmem>>, %arg5: memref<22x22xf32, #tpu.memory_space<vmem>>, %arg6: memref<22x22xf32, #tpu.memory_space<vmem>>) attributes {dimension_semantics = [#tpu.dimension_semantics<parallel>], iteration_bounds = array<i64: 2>, scalar_prefetch = 0 : i64, scratch_operands = 2 : i64, tpu.core_type = #tpu.core_type<tc>, window_params = [{transform_indices = @transform_0, window_bounds = array<i64: 1, 16, 16, 32>}, {transform_indices = @transform_1, window_bounds = array<i64: 1, 1, 32>}, {transform_indices = @transform_2, window_bounds = array<i64: 98>}, {transform_indices = @transform_3, window_bounds = array<i64: 1, 16, 16, 32>}]} {
    %c0 = arith.constant 0 : index
    %c0_0 = arith.constant 0 : index
    %c0_1 = arith.constant 0 : index
    %c0_2 = arith.constant 0 : index
    %0 = vector.load %arg1[%c0, %c0_0, %c0_1, %c0_2] : memref<1x16x16x32xf32, #tpu.memory_space<vmem>>, vector<1x16x16x32xf32>
    %1 = vector.shape_cast %0 : vector<1x16x16x32xf32> to vector<16x16x32xf32>
    %c0_3 = arith.constant 0 : index
    %c0_4 = arith.constant 0 : index
    %c0_5 = arith.constant 0 : index
    %2 = vector.load %arg2[%c0_3, %c0_4, %c0_5] : memref<1x1x32xf32, #tpu.memory_space<vmem>>, vector<1x1x32xf32>
    %3 = vector.shape_cast %2 : vector<1x1x32xf32> to vector<1x32xf32>
    %4 = vector.shape_cast %3 : vector<1x32xf32> to vector<1x1x32xf32>
    %5 = vector.broadcast %4 : vector<1x1x32xf32> to vector<16x16x32xf32>
    %6 = arith.mulf %1, %5 : vector<16x16x32xf32>
    %cst = arith.constant dense<0xFF800000> : vector<16x16xf32>
    %7 = vector.multi_reduction <maximumf>, %6, %cst [2] : vector<16x16x32xf32> to vector<16x16xf32>
    %cst_6 = arith.constant dense<0.000000e+00> : vector<16x16xf32>
    %8 = vector.multi_reduction <add>, %6, %cst_6 [2] : vector<16x16x32xf32> to vector<16x16xf32>
    %cst_7 = arith.constant 3.200000e+01 : f32
    %9 = vector.broadcast %cst_7 : f32 to vector<16x16xf32>
    %10 = arith.divf %8, %9 : vector<16x16xf32>
    %cst_8 = arith.constant 0.000000e+00 : f32
    %11 = vector.broadcast %cst_8 : f32 to vector<22x22xf32>
    %c0_9 = arith.constant 0 : index
    %c0_10 = arith.constant 0 : index
    %12 = vector.load %arg5[%c0_9, %c0_10] : memref<22x22xf32, #tpu.memory_space<vmem>>, vector<22x22xf32>
    tpu.vector_store %arg5[%c0_9, %c0_10], %11 {strides = array<i32>} : memref<22x22xf32, #tpu.memory_space<vmem>>, vector<22x22xf32>,
    %cst_11 = arith.constant 0.000000e+00 : f32
    %13 = vector.broadcast %cst_11 : f32 to vector<22x22xf32>
    %c0_12 = arith.constant 0 : index
    %c0_13 = arith.constant 0 : index
    %14 = vector.load %arg6[%c0_12, %c0_13] : memref<22x22xf32, #tpu.memory_space<vmem>>, vector<22x22xf32>
    tpu.vector_store %arg6[%c0_12, %c0_13], %13 {strides = array<i32>} : memref<22x22xf32, #tpu.memory_space<vmem>>, vector<22x22xf32>,
    %c3 = arith.constant 3 : index
    %c3_14 = arith.constant 3 : index
    %15 = vector.load %arg5[%c3, %c3_14] : memref<22x22xf32, #tpu.memory_space<vmem>>, vector<16x16xf32>
    tpu.vector_store %arg5[%c3, %c3_14], %7 {strides = array<i32>} : memref<22x22xf32, #tpu.memory_space<vmem>>, vector<16x16xf32>,
    %c3_15 = arith.constant 3 : index
    %c3_16 = arith.constant 3 : index
    %16 = vector.load %arg6[%c3_15, %c3_16] : memref<22x22xf32, #tpu.memory_space<vmem>>, vector<16x16xf32>
    tpu.vector_store %arg6[%c3_15, %c3_16], %10 {strides = array<i32>} : memref<22x22xf32, #tpu.memory_space<vmem>>, vector<16x16xf32>,
    %cst_17 = arith.constant 0.000000e+00 : f32
    %17 = vector.broadcast %cst_17 : f32 to vector<16x16xf32>
    %c0_18 = arith.constant 0 : index
    %18 = memref.load %arg3[%c0_18] : memref<98xf32, #tpu.memory_space<smem>>
    %c49 = arith.constant 49 : index
    %19 = memref.load %arg3[%c49] : memref<98xf32, #tpu.memory_space<smem>>
    %c0_19 = arith.constant 0 : index
    %c0_20 = arith.constant 0 : index
    %20 = vector.load %arg5[%c0_19, %c0_20] : memref<22x22xf32, #tpu.memory_space<vmem>>, vector<16x16xf32>
    %21 = vector.broadcast %18 : f32 to vector<16x16xf32>
    %22 = arith.mulf %21, %20 : vector<16x16xf32>
    %23 = arith.addf %17, %22 : vector<16x16xf32>
    %c0_21 = arith.constant 0 : index
    %c0_22 = arith.constant 0 : index
    %24 = vector.load %arg6[%c0_21, %c0_22] : memref<22x22xf32, #tpu.memory_space<vmem>>, vector<16x16xf32>
    %25 = vector.broadcast %19 : f32 to vector<16x16xf32>
    %26 = arith.mulf %25, %24 : vector<16x16xf32>
    %27 = arith.addf %23, %26 : vector<16x16xf32>
    %c1 = arith.constant 1 : index
    %28 = memref.load %arg3[%c1] : memref<98xf32, #tpu.memory_space<smem>>
    %c50 = arith.constant 50 : index
    %29 = memref.load %arg3[%c50] : memref<98xf32, #tpu.memory_space<smem>>
    %c0_23 = arith.constant 0 : index
    %c1_24 = arith.constant 1 : index
    %30 = vector.load %arg5[%c0_23, %c1_24] : memref<22x22xf32, #tpu.memory_space<vmem>>, vector<16x16xf32>
    %31 = vector.broadcast %28 : f32 to vector<16x16xf32>
    %32 = arith.mulf %31, %30 : vector<16x16xf32>
    %33 = arith.addf %27, %32 : vector<16x16xf32>
    %c0_25 = arith.constant 0 : index
    %c1_26 = arith.constant 1 : index
    %34 = vector.load %arg6[%c0_25, %c1_26] : memref<22x22xf32, #tpu.memory_space<vmem>>, vector<16x16xf32>
    %35 = vector.broadcast %29 : f32 to vector<16x16xf32>
    %36 = arith.mulf %35, %34 : vector<16x16xf32>
    %37 = arith.addf %33, %36 : vector<16x16xf32>
    %c2 = arith.constant 2 : index
    %38 = memref.load %arg3[%c2] : memref<98xf32, #tpu.memory_space<smem>>
    %c51 = arith.constant 51 : index
    %39 = memref.load %arg3[%c51] : memref<98xf32, #tpu.memory_space<smem>>
    %c0_27 = arith.constant 0 : index
    %c2_28 = arith.constant 2 : index
    %40 = vector.load %arg5[%c0_27, %c2_28] : memref<22x22xf32, #tpu.memory_space<vmem>>, vector<16x16xf32>
    %41 = vector.broadcast %38 : f32 to vector<16x16xf32>
    %42 = arith.mulf %41, %40 : vector<16x16xf32>
    %43 = arith.addf %37, %42 : vector<16x16xf32>
    %c0_29 = arith.constant 0 : index
    %c2_30 = arith.constant 2 : index
    %44 = vector.load %arg6[%c0_29, %c2_30] : memref<22x22xf32, #tpu.memory_space<vmem>>, vector<16x16xf32>
    %45 = vector.broadcast %39 : f32 to vector<16x16xf32>
    %46 = arith.mulf %45, %44 : vector<16x16xf32>
    %47 = arith.addf %43, %46 : vector<16x16xf32>
    %c3_31 = arith.constant 3 : index
    %48 = memref.load %arg3[%c3_31] : memref<98xf32, #tpu.memory_space<smem>>
    %c52 = arith.constant 52 : index
    %49 = memref.load %arg3[%c52] : memref<98xf32, #tpu.memory_space<smem>>
    %c0_32 = arith.constant 0 : index
    %c3_33 = arith.constant 3 : index
    %50 = vector.load %arg5[%c0_32, %c3_33] : memref<22x22xf32, #tpu.memory_space<vmem>>, vector<16x16xf32>
    %51 = vector.broadcast %48 : f32 to vector<16x16xf32>
    %52 = arith.mulf %51, %50 : vector<16x16xf32>
    %53 = arith.addf %47, %52 : vector<16x16xf32>
    %c0_34 = arith.constant 0 : index
    %c3_35 = arith.constant 3 : index
    %54 = vector.load %arg6[%c0_34, %c3_35] : memref<22x22xf32, #tpu.memory_space<vmem>>, vector<16x16xf32>
    %55 = vector.broadcast %49 : f32 to vector<16x16xf32>
    %56 = arith.mulf %55, %54 : vector<16x16xf32>
    %57 = arith.addf %53, %56 : vector<16x16xf32>
    %c4 = arith.constant 4 : index
    %58 = memref.load %arg3[%c4] : memref<98xf32, #tpu.memory_space<smem>>
    %c53 = arith.constant 53 : index
    %59 = memref.load %arg3[%c53] : memref<98xf32, #tpu.memory_space<smem>>
    %c0_36 = arith.constant 0 : index
    %c4_37 = arith.constant 4 : index
    %60 = vector.load %arg5[%c0_36, %c4_37] : memref<22x22xf32, #tpu.memory_space<vmem>>, vector<16x16xf32>
    %61 = vector.broadcast %58 : f32 to vector<16x16xf32>
    %62 = arith.mulf %61, %60 : vector<16x16xf32>
    %63 = arith.addf %57, %62 : vector<16x16xf32>
    %c0_38 = arith.constant 0 : index
    %c4_39 = arith.constant 4 : index
    %64 = vector.load %arg6[%c0_38, %c4_39] : memref<22x22xf32, #tpu.memory_space<vmem>>, vector<16x16xf32>
    %65 = vector.broadcast %59 : f32 to vector<16x16xf32>
    %66 = arith.mulf %65, %64 : vector<16x16xf32>
    %67 = arith.addf %63, %66 : vector<16x16xf32>
    %c5 = arith.constant 5 : index
    %68 = memref.load %arg3[%c5] : memref<98xf32, #tpu.memory_space<smem>>
    %c54 = arith.constant 54 : index
    %69 = memref.load %arg3[%c54] : memref<98xf32, #tpu.memory_space<smem>>
    %c0_40 = arith.constant 0 : index
    %c5_41 = arith.constant 5 : index
    %70 = vector.load %arg5[%c0_40, %c5_41] : memref<22x22xf32, #tpu.memory_space<vmem>>, vector<16x16xf32>
    %71 = vector.broadcast %68 : f32 to vector<16x16xf32>
    %72 = arith.mulf %71, %70 : vector<16x16xf32>
    %73 = arith.addf %67, %72 : vector<16x16xf32>
    %c0_42 = arith.constant 0 : index
    %c5_43 = arith.constant 5 : index
    %74 = vector.load %arg6[%c0_42, %c5_43] : memref<22x22xf32, #tpu.memory_space<vmem>>, vector<16x16xf32>
    %75 = vector.broadcast %69 : f32 to vector<16x16xf32>
    %76 = arith.mulf %75, %74 : vector<16x16xf32>
    %77 = arith.addf %73, %76 : vector<16x16xf32>
    %c6 = arith.constant 6 : index
    %78 = memref.load %arg3[%c6] : memref<98xf32, #tpu.memory_space<smem>>
    %c55 = arith.constant 55 : index
    %79 = memref.load %arg3[%c55] : memref<98xf32, #tpu.memory_space<smem>>
    %c0_44 = arith.constant 0 : index
    %c6_45 = arith.constant 6 : index
    %80 = vector.load %arg5[%c0_44, %c6_45] : memref<22x22xf32, #tpu.memory_space<vmem>>, vector<16x16xf32>
    %81 = vector.broadcast %78 : f32 to vector<16x16xf32>
    %82 = arith.mulf %81, %80 : vector<16x16xf32>
    %83 = arith.addf %77, %82 : vector<16x16xf32>
    %c0_46 = arith.constant 0 : index
    %c6_47 = arith.constant 6 : index
    %84 = vector.load %arg6[%c0_46, %c6_47] : memref<22x22xf32, #tpu.memory_space<vmem>>, vector<16x16xf32>
    %85 = vector.broadcast %79 : f32 to vector<16x16xf32>
    %86 = arith.mulf %85, %84 : vector<16x16xf32>
    %87 = arith.addf %83, %86 : vector<16x16xf32>
    %c7 = arith.constant 7 : index
    %88 = memref.load %arg3[%c7] : memref<98xf32, #tpu.memory_space<smem>>
    %c56 = arith.constant 56 : index
    %89 = memref.load %arg3[%c56] : memref<98xf32, #tpu.memory_space<smem>>
    %c1_48 = arith.constant 1 : index
    %c0_49 = arith.constant 0 : index
    %90 = vector.load %arg5[%c1_48, %c0_49] : memref<22x22xf32, #tpu.memory_space<vmem>>, vector<16x16xf32>
    %91 = vector.broadcast %88 : f32 to vector<16x16xf32>
    %92 = arith.mulf %91, %90 : vector<16x16xf32>
    %93 = arith.addf %87, %92 : vector<16x16xf32>
    %c1_50 = arith.constant 1 : index
    %c0_51 = arith.constant 0 : index
    %94 = vector.load %arg6[%c1_50, %c0_51] : memref<22x22xf32, #tpu.memory_space<vmem>>, vector<16x16xf32>
    %95 = vector.broadcast %89 : f32 to vector<16x16xf32>
    %96 = arith.mulf %95, %94 : vector<16x16xf32>
    %97 = arith.addf %93, %96 : vector<16x16xf32>
    %c8 = arith.constant 8 : index
    %98 = memref.load %arg3[%c8] : memref<98xf32, #tpu.memory_space<smem>>
    %c57 = arith.constant 57 : index
    %99 = memref.load %arg3[%c57] : memref<98xf32, #tpu.memory_space<smem>>
    %c1_52 = arith.constant 1 : index
    %c1_53 = arith.constant 1 : index
    %100 = vector.load %arg5[%c1_52, %c1_53] : memref<22x22xf32, #tpu.memory_space<vmem>>, vector<16x16xf32>
    %101 = vector.broadcast %98 : f32 to vector<16x16xf32>
    %102 = arith.mulf %101, %100 : vector<16x16xf32>
    %103 = arith.addf %97, %102 : vector<16x16xf32>
    %c1_54 = arith.constant 1 : index
    %c1_55 = arith.constant 1 : index
    %104 = vector.load %arg6[%c1_54, %c1_55] : memref<22x22xf32, #tpu.memory_space<vmem>>, vector<16x16xf32>
    %105 = vector.broadcast %99 : f32 to vector<16x16xf32>
    %106 = arith.mulf %105, %104 : vector<16x16xf32>
    %107 = arith.addf %103, %106 : vector<16x16xf32>
    %c9 = arith.constant 9 : index
    %108 = memref.load %arg3[%c9] : memref<98xf32, #tpu.memory_space<smem>>
    %c58 = arith.constant 58 : index
    %109 = memref.load %arg3[%c58] : memref<98xf32, #tpu.memory_space<smem>>
    %c1_56 = arith.constant 1 : index
    %c2_57 = arith.constant 2 : index
    %110 = vector.load %arg5[%c1_56, %c2_57] : memref<22x22xf32, #tpu.memory_space<vmem>>, vector<16x16xf32>
    %111 = vector.broadcast %108 : f32 to vector<16x16xf32>
    %112 = arith.mulf %111, %110 : vector<16x16xf32>
    %113 = arith.addf %107, %112 : vector<16x16xf32>
    %c1_58 = arith.constant 1 : index
    %c2_59 = arith.constant 2 : index
    %114 = vector.load %arg6[%c1_58, %c2_59] : memref<22x22xf32, #tpu.memory_space<vmem>>, vector<16x16xf32>
    %115 = vector.broadcast %109 : f32 to vector<16x16xf32>
    %116 = arith.mulf %115, %114 : vector<16x16xf32>
    %117 = arith.addf %113, %116 : vector<16x16xf32>
    %c10 = arith.constant 10 : index
    %118 = memref.load %arg3[%c10] : memref<98xf32, #tpu.memory_space<smem>>
    %c59 = arith.constant 59 : index
    %119 = memref.load %arg3[%c59] : memref<98xf32, #tpu.memory_space<smem>>
    %c1_60 = arith.constant 1 : index
    %c3_61 = arith.constant 3 : index
    %120 = vector.load %arg5[%c1_60, %c3_61] : memref<22x22xf32, #tpu.memory_space<vmem>>, vector<16x16xf32>
    %121 = vector.broadcast %118 : f32 to vector<16x16xf32>
    %122 = arith.mulf %121, %120 : vector<16x16xf32>
    %123 = arith.addf %117, %122 : vector<16x16xf32>
    %c1_62 = arith.constant 1 : index
    %c3_63 = arith.constant 3 : index
    %124 = vector.load %arg6[%c1_62, %c3_63] : memref<22x22xf32, #tpu.memory_space<vmem>>, vector<16x16xf32>
    %125 = vector.broadcast %119 : f32 to vector<16x16xf32>
    %126 = arith.mulf %125, %124 : vector<16x16xf32>
    %127 = arith.addf %123, %126 : vector<16x16xf32>
    %c11 = arith.constant 11 : index
    %128 = memref.load %arg3[%c11] : memref<98xf32, #tpu.memory_space<smem>>
    %c60 = arith.constant 60 : index
    %129 = memref.load %arg3[%c60] : memref<98xf32, #tpu.memory_space<smem>>
    %c1_64 = arith.constant 1 : index
    %c4_65 = arith.constant 4 : index
    %130 = vector.load %arg5[%c1_64, %c4_65] : memref<22x22xf32, #tpu.memory_space<vmem>>, vector<16x16xf32>
    %131 = vector.broadcast %128 : f32 to vector<16x16xf32>
    %132 = arith.mulf %131, %130 : vector<16x16xf32>
    %133 = arith.addf %127, %132 : vector<16x16xf32>
    %c1_66 = arith.constant 1 : index
    %c4_67 = arith.constant 4 : index
    %134 = vector.load %arg6[%c1_66, %c4_67] : memref<22x22xf32, #tpu.memory_space<vmem>>, vector<16x16xf32>
    %135 = vector.broadcast %129 : f32 to vector<16x16xf32>
    %136 = arith.mulf %135, %134 : vector<16x16xf32>
    %137 = arith.addf %133, %136 : vector<16x16xf32>
    %c12 = arith.constant 12 : index
    %138 = memref.load %arg3[%c12] : memref<98xf32, #tpu.memory_space<smem>>
    %c61 = arith.constant 61 : index
    %139 = memref.load %arg3[%c61] : memref<98xf32, #tpu.memory_space<smem>>
    %c1_68 = arith.constant 1 : index
    %c5_69 = arith.constant 5 : index
    %140 = vector.load %arg5[%c1_68, %c5_69] : memref<22x22xf32, #tpu.memory_space<vmem>>, vector<16x16xf32>
    %141 = vector.broadcast %138 : f32 to vector<16x16xf32>
    %142 = arith.mulf %141, %140 : vector<16x16xf32>
    %143 = arith.addf %137, %142 : vector<16x16xf32>
    %c1_70 = arith.constant 1 : index
    %c5_71 = arith.constant 5 : index
    %144 = vector.load %arg6[%c1_70, %c5_71] : memref<22x22xf32, #tpu.memory_space<vmem>>, vector<16x16xf32>
    %145 = vector.broadcast %139 : f32 to vector<16x16xf32>
    %146 = arith.mulf %145, %144 : vector<16x16xf32>
    %147 = arith.addf %143, %146 : vector<16x16xf32>
    %c13 = arith.constant 13 : index
    %148 = memref.load %arg3[%c13] : memref<98xf32, #tpu.memory_space<smem>>
    %c62 = arith.constant 62 : index
    %149 = memref.load %arg3[%c62] : memref<98xf32, #tpu.memory_space<smem>>
    %c1_72 = arith.constant 1 : index
    %c6_73 = arith.constant 6 : index
    %150 = vector.load %arg5[%c1_72, %c6_73] : memref<22x22xf32, #tpu.memory_space<vmem>>, vector<16x16xf32>
    %151 = vector.broadcast %148 : f32 to vector<16x16xf32>
    %152 = arith.mulf %151, %150 : vector<16x16xf32>
    %153 = arith.addf %147, %152 : vector<16x16xf32>
    %c1_74 = arith.constant 1 : index
    %c6_75 = arith.constant 6 : index
    %154 = vector.load %arg6[%c1_74, %c6_75] : memref<22x22xf32, #tpu.memory_space<vmem>>, vector<16x16xf32>
    %155 = vector.broadcast %149 : f32 to vector<16x16xf32>
    %156 = arith.mulf %155, %154 : vector<16x16xf32>
    %157 = arith.addf %153, %156 : vector<16x16xf32>
    %c14 = arith.constant 14 : index
    %158 = memref.load %arg3[%c14] : memref<98xf32, #tpu.memory_space<smem>>
    %c63 = arith.constant 63 : index
    %159 = memref.load %arg3[%c63] : memref<98xf32, #tpu.memory_space<smem>>
    %c2_76 = arith.constant 2 : index
    %c0_77 = arith.constant 0 : index
    %160 = vector.load %arg5[%c2_76, %c0_77] : memref<22x22xf32, #tpu.memory_space<vmem>>, vector<16x16xf32>
    %161 = vector.broadcast %158 : f32 to vector<16x16xf32>
    %162 = arith.mulf %161, %160 : vector<16x16xf32>
    %163 = arith.addf %157, %162 : vector<16x16xf32>
    %c2_78 = arith.constant 2 : index
    %c0_79 = arith.constant 0 : index
    %164 = vector.load %arg6[%c2_78, %c0_79] : memref<22x22xf32, #tpu.memory_space<vmem>>, vector<16x16xf32>
    %165 = vector.broadcast %159 : f32 to vector<16x16xf32>
    %166 = arith.mulf %165, %164 : vector<16x16xf32>
    %167 = arith.addf %163, %166 : vector<16x16xf32>
    %c15 = arith.constant 15 : index
    %168 = memref.load %arg3[%c15] : memref<98xf32, #tpu.memory_space<smem>>
    %c64 = arith.constant 64 : index
    %169 = memref.load %arg3[%c64] : memref<98xf32, #tpu.memory_space<smem>>
    %c2_80 = arith.constant 2 : index
    %c1_81 = arith.constant 1 : index
    %170 = vector.load %arg5[%c2_80, %c1_81] : memref<22x22xf32, #tpu.memory_space<vmem>>, vector<16x16xf32>
    %171 = vector.broadcast %168 : f32 to vector<16x16xf32>
    %172 = arith.mulf %171, %170 : vector<16x16xf32>
    %173 = arith.addf %167, %172 : vector<16x16xf32>
    %c2_82 = arith.constant 2 : index
    %c1_83 = arith.constant 1 : index
    %174 = vector.load %arg6[%c2_82, %c1_83] : memref<22x22xf32, #tpu.memory_space<vmem>>, vector<16x16xf32>
    %175 = vector.broadcast %169 : f32 to vector<16x16xf32>
    %176 = arith.mulf %175, %174 : vector<16x16xf32>
    %177 = arith.addf %173, %176 : vector<16x16xf32>
    %c16 = arith.constant 16 : index
    %178 = memref.load %arg3[%c16] : memref<98xf32, #tpu.memory_space<smem>>
    %c65 = arith.constant 65 : index
    %179 = memref.load %arg3[%c65] : memref<98xf32, #tpu.memory_space<smem>>
    %c2_84 = arith.constant 2 : index
    %c2_85 = arith.constant 2 : index
    %180 = vector.load %arg5[%c2_84, %c2_85] : memref<22x22xf32, #tpu.memory_space<vmem>>, vector<16x16xf32>
    %181 = vector.broadcast %178 : f32 to vector<16x16xf32>
    %182 = arith.mulf %181, %180 : vector<16x16xf32>
    %183 = arith.addf %177, %182 : vector<16x16xf32>
    %c2_86 = arith.constant 2 : index
    %c2_87 = arith.constant 2 : index
    %184 = vector.load %arg6[%c2_86, %c2_87] : memref<22x22xf32, #tpu.memory_space<vmem>>, vector<16x16xf32>
    %185 = vector.broadcast %179 : f32 to vector<16x16xf32>
    %186 = arith.mulf %185, %184 : vector<16x16xf32>
    %187 = arith.addf %183, %186 : vector<16x16xf32>
    %c17 = arith.constant 17 : index
    %188 = memref.load %arg3[%c17] : memref<98xf32, #tpu.memory_space<smem>>
    %c66 = arith.constant 66 : index
    %189 = memref.load %arg3[%c66] : memref<98xf32, #tpu.memory_space<smem>>
    %c2_88 = arith.constant 2 : index
    %c3_89 = arith.constant 3 : index
    %190 = vector.load %arg5[%c2_88, %c3_89] : memref<22x22xf32, #tpu.memory_space<vmem>>, vector<16x16xf32>
    %191 = vector.broadcast %188 : f32 to vector<16x16xf32>
    %192 = arith.mulf %191, %190 : vector<16x16xf32>
    %193 = arith.addf %187, %192 : vector<16x16xf32>
    %c2_90 = arith.constant 2 : index
    %c3_91 = arith.constant 3 : index
    %194 = vector.load %arg6[%c2_90, %c3_91] : memref<22x22xf32, #tpu.memory_space<vmem>>, vector<16x16xf32>
    %195 = vector.broadcast %189 : f32 to vector<16x16xf32>
    %196 = arith.mulf %195, %194 : vector<16x16xf32>
    %197 = arith.addf %193, %196 : vector<16x16xf32>
    %c18 = arith.constant 18 : index
    %198 = memref.load %arg3[%c18] : memref<98xf32, #tpu.memory_space<smem>>
    %c67 = arith.constant 67 : index
    %199 = memref.load %arg3[%c67] : memref<98xf32, #tpu.memory_space<smem>>
    %c2_92 = arith.constant 2 : index
    %c4_93 = arith.constant 4 : index
    %200 = vector.load %arg5[%c2_92, %c4_93] : memref<22x22xf32, #tpu.memory_space<vmem>>, vector<16x16xf32>
    %201 = vector.broadcast %198 : f32 to vector<16x16xf32>
    %202 = arith.mulf %201, %200 : vector<16x16xf32>
    %203 = arith.addf %197, %202 : vector<16x16xf32>
    %c2_94 = arith.constant 2 : index
    %c4_95 = arith.constant 4 : index
    %204 = vector.load %arg6[%c2_94, %c4_95] : memref<22x22xf32, #tpu.memory_space<vmem>>, vector<16x16xf32>
    %205 = vector.broadcast %199 : f32 to vector<16x16xf32>
    %206 = arith.mulf %205, %204 : vector<16x16xf32>
    %207 = arith.addf %203, %206 : vector<16x16xf32>
    %c19 = arith.constant 19 : index
    %208 = memref.load %arg3[%c19] : memref<98xf32, #tpu.memory_space<smem>>
    %c68 = arith.constant 68 : index
    %209 = memref.load %arg3[%c68] : memref<98xf32, #tpu.memory_space<smem>>
    %c2_96 = arith.constant 2 : index
    %c5_97 = arith.constant 5 : index
    %210 = vector.load %arg5[%c2_96, %c5_97] : memref<22x22xf32, #tpu.memory_space<vmem>>, vector<16x16xf32>
    %211 = vector.broadcast %208 : f32 to vector<16x16xf32>
    %212 = arith.mulf %211, %210 : vector<16x16xf32>
    %213 = arith.addf %207, %212 : vector<16x16xf32>
    %c2_98 = arith.constant 2 : index
    %c5_99 = arith.constant 5 : index
    %214 = vector.load %arg6[%c2_98, %c5_99] : memref<22x22xf32, #tpu.memory_space<vmem>>, vector<16x16xf32>
    %215 = vector.broadcast %209 : f32 to vector<16x16xf32>
    %216 = arith.mulf %215, %214 : vector<16x16xf32>
    %217 = arith.addf %213, %216 : vector<16x16xf32>
    %c20 = arith.constant 20 : index
    %218 = memref.load %arg3[%c20] : memref<98xf32, #tpu.memory_space<smem>>
    %c69 = arith.constant 69 : index
    %219 = memref.load %arg3[%c69] : memref<98xf32, #tpu.memory_space<smem>>
    %c2_100 = arith.constant 2 : index
    %c6_101 = arith.constant 6 : index
    %220 = vector.load %arg5[%c2_100, %c6_101] : memref<22x22xf32, #tpu.memory_space<vmem>>, vector<16x16xf32>
    %221 = vector.broadcast %218 : f32 to vector<16x16xf32>
    %222 = arith.mulf %221, %220 : vector<16x16xf32>
    %223 = arith.addf %217, %222 : vector<16x16xf32>
    %c2_102 = arith.constant 2 : index
    %c6_103 = arith.constant 6 : index
    %224 = vector.load %arg6[%c2_102, %c6_103] : memref<22x22xf32, #tpu.memory_space<vmem>>, vector<16x16xf32>
    %225 = vector.broadcast %219 : f32 to vector<16x16xf32>
    %226 = arith.mulf %225, %224 : vector<16x16xf32>
    %227 = arith.addf %223, %226 : vector<16x16xf32>
    %c21 = arith.constant 21 : index
    %228 = memref.load %arg3[%c21] : memref<98xf32, #tpu.memory_space<smem>>
    %c70 = arith.constant 70 : index
    %229 = memref.load %arg3[%c70] : memref<98xf32, #tpu.memory_space<smem>>
    %c3_104 = arith.constant 3 : index
    %c0_105 = arith.constant 0 : index
    %230 = vector.load %arg5[%c3_104, %c0_105] : memref<22x22xf32, #tpu.memory_space<vmem>>, vector<16x16xf32>
    %231 = vector.broadcast %228 : f32 to vector<16x16xf32>
    %232 = arith.mulf %231, %230 : vector<16x16xf32>
    %233 = arith.addf %227, %232 : vector<16x16xf32>
    %c3_106 = arith.constant 3 : index
    %c0_107 = arith.constant 0 : index
    %234 = vector.load %arg6[%c3_106, %c0_107] : memref<22x22xf32, #tpu.memory_space<vmem>>, vector<16x16xf32>
    %235 = vector.broadcast %229 : f32 to vector<16x16xf32>
    %236 = arith.mulf %235, %234 : vector<16x16xf32>
    %237 = arith.addf %233, %236 : vector<16x16xf32>
    %c22 = arith.constant 22 : index
    %238 = memref.load %arg3[%c22] : memref<98xf32, #tpu.memory_space<smem>>
    %c71 = arith.constant 71 : index
    %239 = memref.load %arg3[%c71] : memref<98xf32, #tpu.memory_space<smem>>
    %c3_108 = arith.constant 3 : index
    %c1_109 = arith.constant 1 : index
    %240 = vector.load %arg5[%c3_108, %c1_109] : memref<22x22xf32, #tpu.memory_space<vmem>>, vector<16x16xf32>
    %241 = vector.broadcast %238 : f32 to vector<16x16xf32>
    %242 = arith.mulf %241, %240 : vector<16x16xf32>
    %243 = arith.addf %237, %242 : vector<16x16xf32>
    %c3_110 = arith.constant 3 : index
    %c1_111 = arith.constant 1 : index
    %244 = vector.load %arg6[%c3_110, %c1_111] : memref<22x22xf32, #tpu.memory_space<vmem>>, vector<16x16xf32>
    %245 = vector.broadcast %239 : f32 to vector<16x16xf32>
    %246 = arith.mulf %245, %244 : vector<16x16xf32>
    %247 = arith.addf %243, %246 : vector<16x16xf32>
    %c23 = arith.constant 23 : index
    %248 = memref.load %arg3[%c23] : memref<98xf32, #tpu.memory_space<smem>>
    %c72 = arith.constant 72 : index
    %249 = memref.load %arg3[%c72] : memref<98xf32, #tpu.memory_space<smem>>
    %c3_112 = arith.constant 3 : index
    %c2_113 = arith.constant 2 : index
    %250 = vector.load %arg5[%c3_112, %c2_113] : memref<22x22xf32, #tpu.memory_space<vmem>>, vector<16x16xf32>
    %251 = vector.broadcast %248 : f32 to vector<16x16xf32>
    %252 = arith.mulf %251, %250 : vector<16x16xf32>
    %253 = arith.addf %247, %252 : vector<16x16xf32>
    %c3_114 = arith.constant 3 : index
    %c2_115 = arith.constant 2 : index
    %254 = vector.load %arg6[%c3_114, %c2_115] : memref<22x22xf32, #tpu.memory_space<vmem>>, vector<16x16xf32>
    %255 = vector.broadcast %249 : f32 to vector<16x16xf32>
    %256 = arith.mulf %255, %254 : vector<16x16xf32>
    %257 = arith.addf %253, %256 : vector<16x16xf32>
    %c24 = arith.constant 24 : index
    %258 = memref.load %arg3[%c24] : memref<98xf32, #tpu.memory_space<smem>>
    %c73 = arith.constant 73 : index
    %259 = memref.load %arg3[%c73] : memref<98xf32, #tpu.memory_space<smem>>
    %c3_116 = arith.constant 3 : index
    %c3_117 = arith.constant 3 : index
    %260 = vector.load %arg5[%c3_116, %c3_117] : memref<22x22xf32, #tpu.memory_space<vmem>>, vector<16x16xf32>
    %261 = vector.broadcast %258 : f32 to vector<16x16xf32>
    %262 = arith.mulf %261, %260 : vector<16x16xf32>
    %263 = arith.addf %257, %262 : vector<16x16xf32>
    %c3_118 = arith.constant 3 : index
    %c3_119 = arith.constant 3 : index
    %264 = vector.load %arg6[%c3_118, %c3_119] : memref<22x22xf32, #tpu.memory_space<vmem>>, vector<16x16xf32>
    %265 = vector.broadcast %259 : f32 to vector<16x16xf32>
    %266 = arith.mulf %265, %264 : vector<16x16xf32>
    %267 = arith.addf %263, %266 : vector<16x16xf32>
    %c25 = arith.constant 25 : index
    %268 = memref.load %arg3[%c25] : memref<98xf32, #tpu.memory_space<smem>>
    %c74 = arith.constant 74 : index
    %269 = memref.load %arg3[%c74] : memref<98xf32, #tpu.memory_space<smem>>
    %c3_120 = arith.constant 3 : index
    %c4_121 = arith.constant 4 : index
    %270 = vector.load %arg5[%c3_120, %c4_121] : memref<22x22xf32, #tpu.memory_space<vmem>>, vector<16x16xf32>
    %271 = vector.broadcast %268 : f32 to vector<16x16xf32>
    %272 = arith.mulf %271, %270 : vector<16x16xf32>
    %273 = arith.addf %267, %272 : vector<16x16xf32>
    %c3_122 = arith.constant 3 : index
    %c4_123 = arith.constant 4 : index
    %274 = vector.load %arg6[%c3_122, %c4_123] : memref<22x22xf32, #tpu.memory_space<vmem>>, vector<16x16xf32>
    %275 = vector.broadcast %269 : f32 to vector<16x16xf32>
    %276 = arith.mulf %275, %274 : vector<16x16xf32>
    %277 = arith.addf %273, %276 : vector<16x16xf32>
    %c26 = arith.constant 26 : index
    %278 = memref.load %arg3[%c26] : memref<98xf32, #tpu.memory_space<smem>>
    %c75 = arith.constant 75 : index
    %279 = memref.load %arg3[%c75] : memref<98xf32, #tpu.memory_space<smem>>
    %c3_124 = arith.constant 3 : index
    %c5_125 = arith.constant 5 : index
    %280 = vector.load %arg5[%c3_124, %c5_125] : memref<22x22xf32, #tpu.memory_space<vmem>>, vector<16x16xf32>
    %281 = vector.broadcast %278 : f32 to vector<16x16xf32>
    %282 = arith.mulf %281, %280 : vector<16x16xf32>
    %283 = arith.addf %277, %282 : vector<16x16xf32>
    %c3_126 = arith.constant 3 : index
    %c5_127 = arith.constant 5 : index
    %284 = vector.load %arg6[%c3_126, %c5_127] : memref<22x22xf32, #tpu.memory_space<vmem>>, vector<16x16xf32>
    %285 = vector.broadcast %279 : f32 to vector<16x16xf32>
    %286 = arith.mulf %285, %284 : vector<16x16xf32>
    %287 = arith.addf %283, %286 : vector<16x16xf32>
    %c27 = arith.constant 27 : index
    %288 = memref.load %arg3[%c27] : memref<98xf32, #tpu.memory_space<smem>>
    %c76 = arith.constant 76 : index
    %289 = memref.load %arg3[%c76] : memref<98xf32, #tpu.memory_space<smem>>
    %c3_128 = arith.constant 3 : index
    %c6_129 = arith.constant 6 : index
    %290 = vector.load %arg5[%c3_128, %c6_129] : memref<22x22xf32, #tpu.memory_space<vmem>>, vector<16x16xf32>
    %291 = vector.broadcast %288 : f32 to vector<16x16xf32>
    %292 = arith.mulf %291, %290 : vector<16x16xf32>
    %293 = arith.addf %287, %292 : vector<16x16xf32>
    %c3_130 = arith.constant 3 : index
    %c6_131 = arith.constant 6 : index
    %294 = vector.load %arg6[%c3_130, %c6_131] : memref<22x22xf32, #tpu.memory_space<vmem>>, vector<16x16xf32>
    %295 = vector.broadcast %289 : f32 to vector<16x16xf32>
    %296 = arith.mulf %295, %294 : vector<16x16xf32>
    %297 = arith.addf %293, %296 : vector<16x16xf32>
    %c28 = arith.constant 28 : index
    %298 = memref.load %arg3[%c28] : memref<98xf32, #tpu.memory_space<smem>>
    %c77 = arith.constant 77 : index
    %299 = memref.load %arg3[%c77] : memref<98xf32, #tpu.memory_space<smem>>
    %c4_132 = arith.constant 4 : index
    %c0_133 = arith.constant 0 : index
    %300 = vector.load %arg5[%c4_132, %c0_133] : memref<22x22xf32, #tpu.memory_space<vmem>>, vector<16x16xf32>
    %301 = vector.broadcast %298 : f32 to vector<16x16xf32>
    %302 = arith.mulf %301, %300 : vector<16x16xf32>
    %303 = arith.addf %297, %302 : vector<16x16xf32>
    %c4_134 = arith.constant 4 : index
    %c0_135 = arith.constant 0 : index
    %304 = vector.load %arg6[%c4_134, %c0_135] : memref<22x22xf32, #tpu.memory_space<vmem>>, vector<16x16xf32>
    %305 = vector.broadcast %299 : f32 to vector<16x16xf32>
    %306 = arith.mulf %305, %304 : vector<16x16xf32>
    %307 = arith.addf %303, %306 : vector<16x16xf32>
    %c29 = arith.constant 29 : index
    %308 = memref.load %arg3[%c29] : memref<98xf32, #tpu.memory_space<smem>>
    %c78 = arith.constant 78 : index
    %309 = memref.load %arg3[%c78] : memref<98xf32, #tpu.memory_space<smem>>
    %c4_136 = arith.constant 4 : index
    %c1_137 = arith.constant 1 : index
    %310 = vector.load %arg5[%c4_136, %c1_137] : memref<22x22xf32, #tpu.memory_space<vmem>>, vector<16x16xf32>
    %311 = vector.broadcast %308 : f32 to vector<16x16xf32>
    %312 = arith.mulf %311, %310 : vector<16x16xf32>
    %313 = arith.addf %307, %312 : vector<16x16xf32>
    %c4_138 = arith.constant 4 : index
    %c1_139 = arith.constant 1 : index
    %314 = vector.load %arg6[%c4_138, %c1_139] : memref<22x22xf32, #tpu.memory_space<vmem>>, vector<16x16xf32>
    %315 = vector.broadcast %309 : f32 to vector<16x16xf32>
    %316 = arith.mulf %315, %314 : vector<16x16xf32>
    %317 = arith.addf %313, %316 : vector<16x16xf32>
    %c30 = arith.constant 30 : index
    %318 = memref.load %arg3[%c30] : memref<98xf32, #tpu.memory_space<smem>>
    %c79 = arith.constant 79 : index
    %319 = memref.load %arg3[%c79] : memref<98xf32, #tpu.memory_space<smem>>
    %c4_140 = arith.constant 4 : index
    %c2_141 = arith.constant 2 : index
    %320 = vector.load %arg5[%c4_140, %c2_141] : memref<22x22xf32, #tpu.memory_space<vmem>>, vector<16x16xf32>
    %321 = vector.broadcast %318 : f32 to vector<16x16xf32>
    %322 = arith.mulf %321, %320 : vector<16x16xf32>
    %323 = arith.addf %317, %322 : vector<16x16xf32>
    %c4_142 = arith.constant 4 : index
    %c2_143 = arith.constant 2 : index
    %324 = vector.load %arg6[%c4_142, %c2_143] : memref<22x22xf32, #tpu.memory_space<vmem>>, vector<16x16xf32>
    %325 = vector.broadcast %319 : f32 to vector<16x16xf32>
    %326 = arith.mulf %325, %324 : vector<16x16xf32>
    %327 = arith.addf %323, %326 : vector<16x16xf32>
    %c31 = arith.constant 31 : index
    %328 = memref.load %arg3[%c31] : memref<98xf32, #tpu.memory_space<smem>>
    %c80 = arith.constant 80 : index
    %329 = memref.load %arg3[%c80] : memref<98xf32, #tpu.memory_space<smem>>
    %c4_144 = arith.constant 4 : index
    %c3_145 = arith.constant 3 : index
    %330 = vector.load %arg5[%c4_144, %c3_145] : memref<22x22xf32, #tpu.memory_space<vmem>>, vector<16x16xf32>
    %331 = vector.broadcast %328 : f32 to vector<16x16xf32>
    %332 = arith.mulf %331, %330 : vector<16x16xf32>
    %333 = arith.addf %327, %332 : vector<16x16xf32>
    %c4_146 = arith.constant 4 : index
    %c3_147 = arith.constant 3 : index
    %334 = vector.load %arg6[%c4_146, %c3_147] : memref<22x22xf32, #tpu.memory_space<vmem>>, vector<16x16xf32>
    %335 = vector.broadcast %329 : f32 to vector<16x16xf32>
    %336 = arith.mulf %335, %334 : vector<16x16xf32>
    %337 = arith.addf %333, %336 : vector<16x16xf32>
    %c32 = arith.constant 32 : index
    %338 = memref.load %arg3[%c32] : memref<98xf32, #tpu.memory_space<smem>>
    %c81 = arith.constant 81 : index
    %339 = memref.load %arg3[%c81] : memref<98xf32, #tpu.memory_space<smem>>
    %c4_148 = arith.constant 4 : index
    %c4_149 = arith.constant 4 : index
    %340 = vector.load %arg5[%c4_148, %c4_149] : memref<22x22xf32, #tpu.memory_space<vmem>>, vector<16x16xf32>
    %341 = vector.broadcast %338 : f32 to vector<16x16xf32>
    %342 = arith.mulf %341, %340 : vector<16x16xf32>
    %343 = arith.addf %337, %342 : vector<16x16xf32>
    %c4_150 = arith.constant 4 : index
    %c4_151 = arith.constant 4 : index
    %344 = vector.load %arg6[%c4_150, %c4_151] : memref<22x22xf32, #tpu.memory_space<vmem>>, vector<16x16xf32>
    %345 = vector.broadcast %339 : f32 to vector<16x16xf32>
    %346 = arith.mulf %345, %344 : vector<16x16xf32>
    %347 = arith.addf %343, %346 : vector<16x16xf32>
    %c33 = arith.constant 33 : index
    %348 = memref.load %arg3[%c33] : memref<98xf32, #tpu.memory_space<smem>>
    %c82 = arith.constant 82 : index
    %349 = memref.load %arg3[%c82] : memref<98xf32, #tpu.memory_space<smem>>
    %c4_152 = arith.constant 4 : index
    %c5_153 = arith.constant 5 : index
    %350 = vector.load %arg5[%c4_152, %c5_153] : memref<22x22xf32, #tpu.memory_space<vmem>>, vector<16x16xf32>
    %351 = vector.broadcast %348 : f32 to vector<16x16xf32>
    %352 = arith.mulf %351, %350 : vector<16x16xf32>
    %353 = arith.addf %347, %352 : vector<16x16xf32>
    %c4_154 = arith.constant 4 : index
    %c5_155 = arith.constant 5 : index
    %354 = vector.load %arg6[%c4_154, %c5_155] : memref<22x22xf32, #tpu.memory_space<vmem>>, vector<16x16xf32>
    %355 = vector.broadcast %349 : f32 to vector<16x16xf32>
    %356 = arith.mulf %355, %354 : vector<16x16xf32>
    %357 = arith.addf %353, %356 : vector<16x16xf32>
    %c34 = arith.constant 34 : index
    %358 = memref.load %arg3[%c34] : memref<98xf32, #tpu.memory_space<smem>>
    %c83 = arith.constant 83 : index
    %359 = memref.load %arg3[%c83] : memref<98xf32, #tpu.memory_space<smem>>
    %c4_156 = arith.constant 4 : index
    %c6_157 = arith.constant 6 : index
    %360 = vector.load %arg5[%c4_156, %c6_157] : memref<22x22xf32, #tpu.memory_space<vmem>>, vector<16x16xf32>
    %361 = vector.broadcast %358 : f32 to vector<16x16xf32>
    %362 = arith.mulf %361, %360 : vector<16x16xf32>
    %363 = arith.addf %357, %362 : vector<16x16xf32>
    %c4_158 = arith.constant 4 : index
    %c6_159 = arith.constant 6 : index
    %364 = vector.load %arg6[%c4_158, %c6_159] : memref<22x22xf32, #tpu.memory_space<vmem>>, vector<16x16xf32>
    %365 = vector.broadcast %359 : f32 to vector<16x16xf32>
    %366 = arith.mulf %365, %364 : vector<16x16xf32>
    %367 = arith.addf %363, %366 : vector<16x16xf32>
    %c35 = arith.constant 35 : index
    %368 = memref.load %arg3[%c35] : memref<98xf32, #tpu.memory_space<smem>>
    %c84 = arith.constant 84 : index
    %369 = memref.load %arg3[%c84] : memref<98xf32, #tpu.memory_space<smem>>
    %c5_160 = arith.constant 5 : index
    %c0_161 = arith.constant 0 : index
    %370 = vector.load %arg5[%c5_160, %c0_161] : memref<22x22xf32, #tpu.memory_space<vmem>>, vector<16x16xf32>
    %371 = vector.broadcast %368 : f32 to vector<16x16xf32>
    %372 = arith.mulf %371, %370 : vector<16x16xf32>
    %373 = arith.addf %367, %372 : vector<16x16xf32>
    %c5_162 = arith.constant 5 : index
    %c0_163 = arith.constant 0 : index
    %374 = vector.load %arg6[%c5_162, %c0_163] : memref<22x22xf32, #tpu.memory_space<vmem>>, vector<16x16xf32>
    %375 = vector.broadcast %369 : f32 to vector<16x16xf32>
    %376 = arith.mulf %375, %374 : vector<16x16xf32>
    %377 = arith.addf %373, %376 : vector<16x16xf32>
    %c36 = arith.constant 36 : index
    %378 = memref.load %arg3[%c36] : memref<98xf32, #tpu.memory_space<smem>>
    %c85 = arith.constant 85 : index
    %379 = memref.load %arg3[%c85] : memref<98xf32, #tpu.memory_space<smem>>
    %c5_164 = arith.constant 5 : index
    %c1_165 = arith.constant 1 : index
    %380 = vector.load %arg5[%c5_164, %c1_165] : memref<22x22xf32, #tpu.memory_space<vmem>>, vector<16x16xf32>
    %381 = vector.broadcast %378 : f32 to vector<16x16xf32>
    %382 = arith.mulf %381, %380 : vector<16x16xf32>
    %383 = arith.addf %377, %382 : vector<16x16xf32>
    %c5_166 = arith.constant 5 : index
    %c1_167 = arith.constant 1 : index
    %384 = vector.load %arg6[%c5_166, %c1_167] : memref<22x22xf32, #tpu.memory_space<vmem>>, vector<16x16xf32>
    %385 = vector.broadcast %379 : f32 to vector<16x16xf32>
    %386 = arith.mulf %385, %384 : vector<16x16xf32>
    %387 = arith.addf %383, %386 : vector<16x16xf32>
    %c37 = arith.constant 37 : index
    %388 = memref.load %arg3[%c37] : memref<98xf32, #tpu.memory_space<smem>>
    %c86 = arith.constant 86 : index
    %389 = memref.load %arg3[%c86] : memref<98xf32, #tpu.memory_space<smem>>
    %c5_168 = arith.constant 5 : index
    %c2_169 = arith.constant 2 : index
    %390 = vector.load %arg5[%c5_168, %c2_169] : memref<22x22xf32, #tpu.memory_space<vmem>>, vector<16x16xf32>
    %391 = vector.broadcast %388 : f32 to vector<16x16xf32>
    %392 = arith.mulf %391, %390 : vector<16x16xf32>
    %393 = arith.addf %387, %392 : vector<16x16xf32>
    %c5_170 = arith.constant 5 : index
    %c2_171 = arith.constant 2 : index
    %394 = vector.load %arg6[%c5_170, %c2_171] : memref<22x22xf32, #tpu.memory_space<vmem>>, vector<16x16xf32>
    %395 = vector.broadcast %389 : f32 to vector<16x16xf32>
    %396 = arith.mulf %395, %394 : vector<16x16xf32>
    %397 = arith.addf %393, %396 : vector<16x16xf32>
    %c38 = arith.constant 38 : index
    %398 = memref.load %arg3[%c38] : memref<98xf32, #tpu.memory_space<smem>>
    %c87 = arith.constant 87 : index
    %399 = memref.load %arg3[%c87] : memref<98xf32, #tpu.memory_space<smem>>
    %c5_172 = arith.constant 5 : index
    %c3_173 = arith.constant 3 : index
    %400 = vector.load %arg5[%c5_172, %c3_173] : memref<22x22xf32, #tpu.memory_space<vmem>>, vector<16x16xf32>
    %401 = vector.broadcast %398 : f32 to vector<16x16xf32>
    %402 = arith.mulf %401, %400 : vector<16x16xf32>
    %403 = arith.addf %397, %402 : vector<16x16xf32>
    %c5_174 = arith.constant 5 : index
    %c3_175 = arith.constant 3 : index
    %404 = vector.load %arg6[%c5_174, %c3_175] : memref<22x22xf32, #tpu.memory_space<vmem>>, vector<16x16xf32>
    %405 = vector.broadcast %399 : f32 to vector<16x16xf32>
    %406 = arith.mulf %405, %404 : vector<16x16xf32>
    %407 = arith.addf %403, %406 : vector<16x16xf32>
    %c39 = arith.constant 39 : index
    %408 = memref.load %arg3[%c39] : memref<98xf32, #tpu.memory_space<smem>>
    %c88 = arith.constant 88 : index
    %409 = memref.load %arg3[%c88] : memref<98xf32, #tpu.memory_space<smem>>
    %c5_176 = arith.constant 5 : index
    %c4_177 = arith.constant 4 : index
    %410 = vector.load %arg5[%c5_176, %c4_177] : memref<22x22xf32, #tpu.memory_space<vmem>>, vector<16x16xf32>
    %411 = vector.broadcast %408 : f32 to vector<16x16xf32>
    %412 = arith.mulf %411, %410 : vector<16x16xf32>
    %413 = arith.addf %407, %412 : vector<16x16xf32>
    %c5_178 = arith.constant 5 : index
    %c4_179 = arith.constant 4 : index
    %414 = vector.load %arg6[%c5_178, %c4_179] : memref<22x22xf32, #tpu.memory_space<vmem>>, vector<16x16xf32>
    %415 = vector.broadcast %409 : f32 to vector<16x16xf32>
    %416 = arith.mulf %415, %414 : vector<16x16xf32>
    %417 = arith.addf %413, %416 : vector<16x16xf32>
    %c40 = arith.constant 40 : index
    %418 = memref.load %arg3[%c40] : memref<98xf32, #tpu.memory_space<smem>>
    %c89 = arith.constant 89 : index
    %419 = memref.load %arg3[%c89] : memref<98xf32, #tpu.memory_space<smem>>
    %c5_180 = arith.constant 5 : index
    %c5_181 = arith.constant 5 : index
    %420 = vector.load %arg5[%c5_180, %c5_181] : memref<22x22xf32, #tpu.memory_space<vmem>>, vector<16x16xf32>
    %421 = vector.broadcast %418 : f32 to vector<16x16xf32>
    %422 = arith.mulf %421, %420 : vector<16x16xf32>
    %423 = arith.addf %417, %422 : vector<16x16xf32>
    %c5_182 = arith.constant 5 : index
    %c5_183 = arith.constant 5 : index
    %424 = vector.load %arg6[%c5_182, %c5_183] : memref<22x22xf32, #tpu.memory_space<vmem>>, vector<16x16xf32>
    %425 = vector.broadcast %419 : f32 to vector<16x16xf32>
    %426 = arith.mulf %425, %424 : vector<16x16xf32>
    %427 = arith.addf %423, %426 : vector<16x16xf32>
    %c41 = arith.constant 41 : index
    %428 = memref.load %arg3[%c41] : memref<98xf32, #tpu.memory_space<smem>>
    %c90 = arith.constant 90 : index
    %429 = memref.load %arg3[%c90] : memref<98xf32, #tpu.memory_space<smem>>
    %c5_184 = arith.constant 5 : index
    %c6_185 = arith.constant 6 : index
    %430 = vector.load %arg5[%c5_184, %c6_185] : memref<22x22xf32, #tpu.memory_space<vmem>>, vector<16x16xf32>
    %431 = vector.broadcast %428 : f32 to vector<16x16xf32>
    %432 = arith.mulf %431, %430 : vector<16x16xf32>
    %433 = arith.addf %427, %432 : vector<16x16xf32>
    %c5_186 = arith.constant 5 : index
    %c6_187 = arith.constant 6 : index
    %434 = vector.load %arg6[%c5_186, %c6_187] : memref<22x22xf32, #tpu.memory_space<vmem>>, vector<16x16xf32>
    %435 = vector.broadcast %429 : f32 to vector<16x16xf32>
    %436 = arith.mulf %435, %434 : vector<16x16xf32>
    %437 = arith.addf %433, %436 : vector<16x16xf32>
    %c42 = arith.constant 42 : index
    %438 = memref.load %arg3[%c42] : memref<98xf32, #tpu.memory_space<smem>>
    %c91 = arith.constant 91 : index
    %439 = memref.load %arg3[%c91] : memref<98xf32, #tpu.memory_space<smem>>
    %c6_188 = arith.constant 6 : index
    %c0_189 = arith.constant 0 : index
    %440 = vector.load %arg5[%c6_188, %c0_189] : memref<22x22xf32, #tpu.memory_space<vmem>>, vector<16x16xf32>
    %441 = vector.broadcast %438 : f32 to vector<16x16xf32>
    %442 = arith.mulf %441, %440 : vector<16x16xf32>
    %443 = arith.addf %437, %442 : vector<16x16xf32>
    %c6_190 = arith.constant 6 : index
    %c0_191 = arith.constant 0 : index
    %444 = vector.load %arg6[%c6_190, %c0_191] : memref<22x22xf32, #tpu.memory_space<vmem>>, vector<16x16xf32>
    %445 = vector.broadcast %439 : f32 to vector<16x16xf32>
    %446 = arith.mulf %445, %444 : vector<16x16xf32>
    %447 = arith.addf %443, %446 : vector<16x16xf32>
    %c43 = arith.constant 43 : index
    %448 = memref.load %arg3[%c43] : memref<98xf32, #tpu.memory_space<smem>>
    %c92 = arith.constant 92 : index
    %449 = memref.load %arg3[%c92] : memref<98xf32, #tpu.memory_space<smem>>
    %c6_192 = arith.constant 6 : index
    %c1_193 = arith.constant 1 : index
    %450 = vector.load %arg5[%c6_192, %c1_193] : memref<22x22xf32, #tpu.memory_space<vmem>>, vector<16x16xf32>
    %451 = vector.broadcast %448 : f32 to vector<16x16xf32>
    %452 = arith.mulf %451, %450 : vector<16x16xf32>
    %453 = arith.addf %447, %452 : vector<16x16xf32>
    %c6_194 = arith.constant 6 : index
    %c1_195 = arith.constant 1 : index
    %454 = vector.load %arg6[%c6_194, %c1_195] : memref<22x22xf32, #tpu.memory_space<vmem>>, vector<16x16xf32>
    %455 = vector.broadcast %449 : f32 to vector<16x16xf32>
    %456 = arith.mulf %455, %454 : vector<16x16xf32>
    %457 = arith.addf %453, %456 : vector<16x16xf32>
    %c44 = arith.constant 44 : index
    %458 = memref.load %arg3[%c44] : memref<98xf32, #tpu.memory_space<smem>>
    %c93 = arith.constant 93 : index
    %459 = memref.load %arg3[%c93] : memref<98xf32, #tpu.memory_space<smem>>
    %c6_196 = arith.constant 6 : index
    %c2_197 = arith.constant 2 : index
    %460 = vector.load %arg5[%c6_196, %c2_197] : memref<22x22xf32, #tpu.memory_space<vmem>>, vector<16x16xf32>
    %461 = vector.broadcast %458 : f32 to vector<16x16xf32>
    %462 = arith.mulf %461, %460 : vector<16x16xf32>
    %463 = arith.addf %457, %462 : vector<16x16xf32>
    %c6_198 = arith.constant 6 : index
    %c2_199 = arith.constant 2 : index
    %464 = vector.load %arg6[%c6_198, %c2_199] : memref<22x22xf32, #tpu.memory_space<vmem>>, vector<16x16xf32>
    %465 = vector.broadcast %459 : f32 to vector<16x16xf32>
    %466 = arith.mulf %465, %464 : vector<16x16xf32>
    %467 = arith.addf %463, %466 : vector<16x16xf32>
    %c45 = arith.constant 45 : index
    %468 = memref.load %arg3[%c45] : memref<98xf32, #tpu.memory_space<smem>>
    %c94 = arith.constant 94 : index
    %469 = memref.load %arg3[%c94] : memref<98xf32, #tpu.memory_space<smem>>
    %c6_200 = arith.constant 6 : index
    %c3_201 = arith.constant 3 : index
    %470 = vector.load %arg5[%c6_200, %c3_201] : memref<22x22xf32, #tpu.memory_space<vmem>>, vector<16x16xf32>
    %471 = vector.broadcast %468 : f32 to vector<16x16xf32>
    %472 = arith.mulf %471, %470 : vector<16x16xf32>
    %473 = arith.addf %467, %472 : vector<16x16xf32>
    %c6_202 = arith.constant 6 : index
    %c3_203 = arith.constant 3 : index
    %474 = vector.load %arg6[%c6_202, %c3_203] : memref<22x22xf32, #tpu.memory_space<vmem>>, vector<16x16xf32>
    %475 = vector.broadcast %469 : f32 to vector<16x16xf32>
    %476 = arith.mulf %475, %474 : vector<16x16xf32>
    %477 = arith.addf %473, %476 : vector<16x16xf32>
    %c46 = arith.constant 46 : index
    %478 = memref.load %arg3[%c46] : memref<98xf32, #tpu.memory_space<smem>>
    %c95 = arith.constant 95 : index
    %479 = memref.load %arg3[%c95] : memref<98xf32, #tpu.memory_space<smem>>
    %c6_204 = arith.constant 6 : index
    %c4_205 = arith.constant 4 : index
    %480 = vector.load %arg5[%c6_204, %c4_205] : memref<22x22xf32, #tpu.memory_space<vmem>>, vector<16x16xf32>
    %481 = vector.broadcast %478 : f32 to vector<16x16xf32>
    %482 = arith.mulf %481, %480 : vector<16x16xf32>
    %483 = arith.addf %477, %482 : vector<16x16xf32>
    %c6_206 = arith.constant 6 : index
    %c4_207 = arith.constant 4 : index
    %484 = vector.load %arg6[%c6_206, %c4_207] : memref<22x22xf32, #tpu.memory_space<vmem>>, vector<16x16xf32>
    %485 = vector.broadcast %479 : f32 to vector<16x16xf32>
    %486 = arith.mulf %485, %484 : vector<16x16xf32>
    %487 = arith.addf %483, %486 : vector<16x16xf32>
    %c47 = arith.constant 47 : index
    %488 = memref.load %arg3[%c47] : memref<98xf32, #tpu.memory_space<smem>>
    %c96 = arith.constant 96 : index
    %489 = memref.load %arg3[%c96] : memref<98xf32, #tpu.memory_space<smem>>
    %c6_208 = arith.constant 6 : index
    %c5_209 = arith.constant 5 : index
    %490 = vector.load %arg5[%c6_208, %c5_209] : memref<22x22xf32, #tpu.memory_space<vmem>>, vector<16x16xf32>
    %491 = vector.broadcast %488 : f32 to vector<16x16xf32>
    %492 = arith.mulf %491, %490 : vector<16x16xf32>
    %493 = arith.addf %487, %492 : vector<16x16xf32>
    %c6_210 = arith.constant 6 : index
    %c5_211 = arith.constant 5 : index
    %494 = vector.load %arg6[%c6_210, %c5_211] : memref<22x22xf32, #tpu.memory_space<vmem>>, vector<16x16xf32>
    %495 = vector.broadcast %489 : f32 to vector<16x16xf32>
    %496 = arith.mulf %495, %494 : vector<16x16xf32>
    %497 = arith.addf %493, %496 : vector<16x16xf32>
    %c48 = arith.constant 48 : index
    %498 = memref.load %arg3[%c48] : memref<98xf32, #tpu.memory_space<smem>>
    %c97 = arith.constant 97 : index
    %499 = memref.load %arg3[%c97] : memref<98xf32, #tpu.memory_space<smem>>
    %c6_212 = arith.constant 6 : index
    %c6_213 = arith.constant 6 : index
    %500 = vector.load %arg5[%c6_212, %c6_213] : memref<22x22xf32, #tpu.memory_space<vmem>>, vector<16x16xf32>
    %501 = vector.broadcast %498 : f32 to vector<16x16xf32>
    %502 = arith.mulf %501, %500 : vector<16x16xf32>
    %503 = arith.addf %497, %502 : vector<16x16xf32>
    %c6_214 = arith.constant 6 : index
    %c6_215 = arith.constant 6 : index
    %504 = vector.load %arg6[%c6_214, %c6_215] : memref<22x22xf32, #tpu.memory_space<vmem>>, vector<16x16xf32>
    %505 = vector.broadcast %499 : f32 to vector<16x16xf32>
    %506 = arith.mulf %505, %504 : vector<16x16xf32>
    %507 = arith.addf %503, %506 : vector<16x16xf32>
    %cst_216 = arith.constant 0.000000e+00 : f32
    %508 = vector.broadcast %cst_216 : f32 to vector<16x16xf32>
    %509 = arith.subf %508, %507 : vector<16x16xf32>
    %510 = math.exp %509 : vector<16x16xf32>
    %cst_217 = arith.constant 1.000000e+00 : f32
    %511 = vector.broadcast %cst_217 : f32 to vector<16x16xf32>
    %512 = arith.addf %511, %510 : vector<16x16xf32>
    %cst_218 = arith.constant 1.000000e+00 : f32
    %513 = vector.broadcast %cst_218 : f32 to vector<16x16xf32>
    %514 = arith.divf %513, %512 : vector<16x16xf32>
    %515 = vector.shape_cast %514 : vector<16x16xf32> to vector<16x16x1xf32>
    %516 = vector.broadcast %515 : vector<16x16x1xf32> to vector<16x16x32xf32>
    %517 = arith.mulf %6, %516 : vector<16x16x32xf32>
    %c0_219 = arith.constant 0 : index
    %c0_220 = arith.constant 0 : index
    %c0_221 = arith.constant 0 : index
    %c0_222 = arith.constant 0 : index
    %518 = vector.load %arg4[%c0_219, %c0_220, %c0_221, %c0_222] : memref<1x16x16x32xf32, #tpu.memory_space<vmem>>, vector<1x16x16x32xf32>
    %519 = vector.shape_cast %518 : vector<1x16x16x32xf32> to vector<16x16x32xf32>
    %520 = vector.shape_cast %517 : vector<16x16x32xf32> to vector<1x16x16x32xf32>
    tpu.vector_store %arg4[%c0_219, %c0_220, %c0_221, %c0_222], %520 {strides = array<i32>} : memref<1x16x16x32xf32, #tpu.memory_space<vmem>>, vector<1x16x16x32xf32>,
    return
  }
  func.func @transform_0(%arg0: i32) -> (i32, i32, i32, i32) {
    %c0_i32 = arith.constant 0 : i32
    %c0_i32_0 = arith.constant 0 : i32
    %c0_i32_1 = arith.constant 0 : i32
    %c0_i32_2 = arith.constant 0 : i32
    return %arg0, %c0_i32, %c0_i32_0, %c0_i32_1 : i32, i32, i32, i32
  }
  func.func @transform_1(%arg0: i32) -> (i32, i32, i32) {
    %c0_i32 = arith.constant 0 : i32
    %c0_i32_0 = arith.constant 0 : i32
    %c0_i32_1 = arith.constant 0 : i32
    return %arg0, %c0_i32, %c0_i32_0 : i32, i32, i32
  }
  func.func @transform_2(%arg0: i32) -> i32 {
    %c0_i32 = arith.constant 0 : i32
    %c0_i32_0 = arith.constant 0 : i32
    return %c0_i32 : i32
  }
  func.func @transform_3(%arg0: i32) -> (i32, i32, i32, i32) {
    %c0_i32 = arith.constant 0 : i32
    %c0_i32_0 = arith.constant 0 : i32
    %c0_i32_1 = arith.constant 0 : i32
    %c0_i32_2 = arith.constant 0 : i32
    return %arg0, %c0_i32, %c0_i32_0, %c0_i32_1 : i32, i32, i32, i32
  }
}

</mosaic_0001>

<bundles_post_ra>
// kernel: cbam_forward.2
= control target key start
LH: loop header
LB: loop body
LE: loop exit
PB: predicated region body
PF: predicated region fallthrough
CT: control target
= control target key end

     0   :  { %s1314_s0 = inlined_call_operand.hbm [shape: f32[2,256,32], index: 0, kind: input, shape index: {}]   ;;  %s1315_s1 = inlined_call_operand.vmem [shape: f32[32,8], index: 1, kind: input, shape index: {}]   ;;  %s1316_s2 = inlined_call_operand.hbm [shape: f32[8,32], index: 2, kind: input, shape index: {}]   ;;  %s1317_s3 = inlined_call_operand.vmem [shape: f32[2,1,32], index: 3, kind: output, shape index: {}]  }
   0x1   :  { %1323 = sst [smem:[#allocation10_spill]] %s1316_s2 }
   0x2   :  { %8 = vsyncpa [#allocation5], 0 }
   0x3   :  { %10 = vsyncpa [#allocation5 + $0x1], 0 }
   0x4   :  { %11 = vsyncpa [#allocation7], 0  ;;  %s1050_s12 = smov 0   ;;  %s1052_s13 = smov 0  }
   0x5   :  { %s1054_s14 = smov 0   ;;  %s1056_s15 = smov 0  }
   0x6   :  { %s1058_s16 = smov 0   ;;  %s1060_s17 = smov 0  }
   0x7   :  { %s1062_s18 = smov 0   ;;  %s1064_s19 = smov 0  }
   0x8 LB: > { %s719_s20 = sadd.s32 4294967295, %s1019_s19   ;;  %p45_p0 = scmp.ne.s32.totalorder %s999_s14, %s995_s13  ;;  %s1019_s19 = sphi %s1064_s19, %s17_s19   ;;  %s1015_s18 = sphi %s1062_s18, %s1342_s18   ;;  %s1011_s17 = sphi %s1060_s17, %s1341_s17   ;;  %s1007_s16 = sphi %s1058_s16, %s1340_s16   ;;  %s1003_s15 = sphi %s1056_s15, %s1339_s15   ;;  %s999_s14 = sphi %s1054_s14, %s1338_s14   ;;  %s995_s13 = sphi %s1052_s13, %s1337_s13   ;;  %s991_s12 = sphi %s1050_s12, %s1336_s12  }
   0x9   : > { %p46_p1 = scmp.eq.s32.totalorder %s1019_s19, 0  ;;  %p51_p2 = scmp.ne.s32.totalorder %s995_s13, %s991_s12 }
   0xa   : > { %p1094_p3 = scmp.eq.s32.totalorder %s719_s20, 0  ;;  %p721_p5 = scmp.ge.s32.totalorder %s1019_s19, 1 }
   0xb   : > { %p47_p4 = por %p46_p1, %p45_p0  ;;  %p130_p7 = scmp.lt.s32.totalorder %s1019_s19, 5 }
   0xc   : > { %s1324_s22 = scalar_select %p1094_p3, 1, 0 }
   0xd   : > { %p1101_p6 = por %p1094_p3, %p51_p2  ;;  %p1106_p8 = pnand %p721_p5, %p130_p7 }
   0xe   : > { %s1021_s25 = smov [#allocation6]   ;;  %p813_p10 = scmp.lt.s32.totalorder %s1019_s19, 4 }
   0xf   : > { %s1325_s23 = scalar_select %p1101_p6, 1, 0 }
  0x10   : > { %s1326_s24 = scalar_select %p1106_p8, 1, 0 }
  0x11   : > { %s146_s26 = sshll.u32 %s1021_s25, 4  ;;  %p804_p9 = pneg %p1106_p8  ;;  %s147_s26 = int_to_ptr.vmem [resolvable:$true] %s146_s26 }
  0x12   : > { %p1119_p12 = pnand %p813_p10, %p47_p4  ;;  %s1329_s2 = sld [smem:[#allocation10_spill]] }
  0x13   : > { %p1115_p11 = pnand %p804_p9, %p1094_p3 }
  0x14   : > { %s1328_s28 = scalar_select %p1119_p12, 1, 0 }
  0x15   : > { %p893_p0 = pneg %p1115_p11 }
  0x18   : > { %s891_s4 = scalar_lea.hbm %s1329_s2, 128 }
  0x19   : > { %p892_p13 = scmp.ne.s32.totalorder %s1329_s2, %s891_s4  ;;  %p898_p5 = scmp.lt.u32.totalorder %s891_s4, %s1329_s2 }
  0x1b   : > { %p894_p1 = pnand %p893_p0, %p892_p13 }
  0x1d   : > { %p895_p2 = pneg %p894_p1 }
  0x1f   : > { %p900_p4 = pnand %p898_p5, %p895_p2 }
  0x21   : > { %903 = shalt.err (!%p900_p4)
}
  0x22   : > { %s904_s9 = scalar_lea.vmem %s147_s26, 128  ;;  %p912_p3 = scmp.lt.s32.totalorder %s147_s26, %s147_s26 }
  0x23   : > { %p905_p7 = scmp.ne.s32.totalorder %s147_s26, %s904_s9  ;;  %p913_p6 = scmp.lt.s32.totalorder %s904_s9, %s904_s9 }
  0x25   : > { %p907_p9 = pnand %p905_p7, %p893_p0  ;;  %p914_p8 = por %p913_p6, %p912_p3 }
  0x27   : > { %p908_p10 = pneg %p907_p9 }
  0x29   : > { %p915_p12 = pnand %p914_p8, %p908_p10 }
  0x2b   : > { %918 = shalt.err (!%p915_p12)
}
  0x2c   : > { %807 = dma.hbm_to_vmem [thread:$0]  (!%p1115_p11), %s1329_s2, 128, %s147_s26, [#allocation7]  }
  0x2d   : > { %s26_s12 = sadd.s32 1, %s1011_s17  ;;  %s29_s20 = sadd.s32 1, %s1015_s18 }
  0x2e   : > { %p27_p13 = scmp.ge.s32.totalorder %s26_s12, 2  ;;  %s157_s25 = sand.u32 1, %s999_s14  }
  0x2f   : > { %s724_s29 = sshll.u32 %s157_s25, 7  ;;  %s725_s30 = sshll.u32 %s1011_s17, 4 }
  0x30   : > { %s1344_s12 = smov (%p27_p13, %s26_s12), 0  ;;  %s1346_s20 = smov (!%p27_p13, %s29_s20), %s1015_s18 }
  0x31   : > { %s34_s27 = ssub.s32 %s1011_s17, %s1344_s12  ;;  %p31_p3 = scmp.ge.s32.totalorder %s1346_s20, 2 }
  0x32   : > { %s726_s4 = sshll.u32 %s1015_s18, 5  ;;  %s161_s5 = scalar_lea.vmem [#allocation4], %s724_s29 }
  0x33   : > { %s170_s26 = sshll.u32 %s161_s5, 4  ;;  %s1348_s20 = smov (%p31_p3, %s1346_s20), 0  ;;  %s1151_s26 = int_to_ptr.vmem [resolvable:$true] %s170_s26 }
  0x34   : > { %s167_s6 = sadd.s32 %s726_s4, %s725_s30  ;;  %s33_s7 = ssub.s32 %s1015_s18, %s1348_s20 }
  0x35   : > { %s727_s8 = sshll.u32 %s167_s6, 7  ;;  %s35_s9 = sor.u32 %s34_s27, %s33_s7 }
  0x36   : > { %s1158_s21 = scalar_lea.hbm %s1314_s0, %s727_s8  ;;  %p36_p6 = scmp.eq.s32.totalorder %s35_s9, 0 }
  0x37   : > { %s1330_s29 = sadd.s32 1, %s999_s14  ;;  %s1165_s2 = scalar_lea.sflag [#allocation5], %s157_s25 }
  0x38   : > { %s1163_s5 = scalar_select %p36_p6, %s999_s14, %s1330_s29  }
  0x39   : > { %s919_s30 = scalar_lea.hbm %s1158_s21, 2048  ;;  %p1331_p11 = scmp.ne.s32.totalorder %s1328_s28, 0 }
  0x3a   : > { %p920_p8 = scmp.ne.s32.totalorder %s1158_s21, %s919_s30  ;;  %s924_s6 = scalar_lea.hbm %s1314_s0, 8192 }
  0x3b   : > { %p921_p12 = pneg %p1331_p11  ;;  %p925_p2 = scmp.lt.u32.totalorder %s1158_s21, %s1314_s0 }
  0x3c   : > { %p926_p5 = scmp.lt.u32.totalorder %s924_s6, %s919_s30  ;;  %p928_p7 = scmp.lt.u32.totalorder %s919_s30, %s1158_s21 }
  0x3d   : > { %p922_p0 = pnand %p921_p12, %p920_p8 }
  0x3e   : > { %p927_p4 = por %p926_p5, %p925_p2 }
  0x3f   : > { %p923_p1 = pneg %p922_p0 }
  0x40   : > { %p929_p9 = por %p928_p7, %p927_p4 }
  0x42   : > { %p930_p10 = pnand %p929_p9, %p923_p1 }
  0x44   : > { %933 = shalt.err (!%p930_p10)
}
  0x45   : > { %s934_s25 = scalar_lea.vmem %s1151_s26, 2048  ;;  %s1022_s9 = smov [#allocation4]  }
  0x46   : > { %p935_p13 = scmp.ne.s32.totalorder %s1151_s26, %s934_s25  ;;  %s939_s10 = sshll.u32 %s1022_s9, 4  ;;  %s940_s10 = int_to_ptr.vmem [resolvable:$false] %s939_s10 }
  0x47   : > { %s941_s11 = scalar_lea.vmem %s940_s10, 4096  ;;  %p942_p8 = scmp.lt.s32.totalorder %s1151_s26, %s940_s10 }
  0x48   : > { %p937_p3 = pnand %p935_p13, %p921_p12  ;;  %p943_p0 = scmp.lt.s32.totalorder %s941_s11, %s934_s25 }
  0x4a   : > { %p938_p6 = pneg %p937_p3  ;;  %p944_p2 = por %p943_p0, %p942_p8 }
  0x4c   : > { %p945_p5 = pnand %p944_p2, %p938_p6 }
  0x4e   : > { %948 = shalt.err (!%p945_p5)
}
  0x4f   : > { %s1023_s29 = smov 128   ;;  %s1024_s30 = smov 8  }
  0x50   : > { %811 = dma.hbm_to_vmem [thread:$0]  (!%p1331_p11), %s1158_s21, 2048, %s1151_s26, %s1165_s2, %s1023_s29, %s1023_s29, %s1024_s30  }
  0x51   : > { %p1332_p12 = scmp.ne.s32.totalorder %s1326_s24, 0 }
  0x52   : > { %s184_s27 = sand.u32 (!%p1332_p12), 1, %s995_s13   ;;  %p1333_p1 = scmp.ne.s32.totalorder (!%p1332_p12), %s1325_s23, 0 }
  0x53   : > { %182 = sbr.rel (%p1332_p12) target bundleno = 623 (0x26f), region = 32  ;;  %s729_s4 = sshll.u32 (!%p1332_p12), %s184_s27, 7 }
  0x54   : > { %s185_s6 = scalar_lea.sflag (!%p1332_p12), [#allocation5], %s184_s27  ;;  %s1196_s7 = scalar_lea.vmem (!%p1332_p12), [#allocation4], %s729_s4 }
  0x5a   : > { %982 = dma.done.wait (%p1333_p1), %s185_s6, 2048  }
  0x5b   : > { %984 = vsyncadd (%p1333_p1), %s185_s6, 4294965248  ;;  %p1334_p4 = scmp.ne.s32.totalorder %s1324_s22, 0 }
  0x5d   : > { %986 = dma.done.wait (%p1334_p4), [#allocation7], 128  }
  0x5e   : > { %988 = vsyncadd (%p1334_p4), [#allocation7], 4294967168  ;;  %p214_p11 = scmp.lt.s32.totalorder %s1007_s16, 1  ;;  %p731_p7 = scmp.ne.s32.totalorder %s1003_s15, 0 }
  0x5f   : > { %vm221_vm0 = vcmask (!%p731_p7), 253952   ;;  %v1025_v0 = vmov (!%p731_p7), -inf   ;;  %v1026_v1 = vmov (!%p731_p7), 0.0  }
  0x60   : > { %s1350_s16 = smov (!%p214_p11, %s1007_s16), 1  ;;  %220 = sbr.rel (%p731_p7) target bundleno = 103 (0x67), region = 44 }
  0x61   : > { %s216_s24 = scalar_lea.vmem %s1317_s3, %s1350_s16  ;;  %222 = vst.msk [vmem:[#allocation2] sm:$0x1] (!%p731_p7), %vm221_vm0, %v1025_v0  ;;  %223 = vst.msk [vmem:[#allocation3] sm:$0x1] (!%p731_p7), %vm221_vm0, %v1026_v1 }
  0x67 PF: > { %v224_v2 = vld [vmem:[%s1196_s7] sm:$0xff]  ;;  %v225_v3 = vld [vmem:[%s1196_s7 + $0x8] sm:$0xff]  ;;  %v226_v4 = vld [vmem:[%s1196_s7 + $0x10] sm:$0xff]  ;;  %vm241_vm1 = vcmask 261120   ;;  %vm280_vm2 = vcmask 253952   ;;  %p732_p9 = scmp.ne.s32.totalorder %s1003_s15, 1 }
  0x68   : > { %v227_v5 = vld [vmem:[%s1196_s7 + $0x18] sm:$0xff]  ;;  %v228_v6 = vld [vmem:[%s1196_s7 + $0x20] sm:$0xff]  ;;  %v229_v7 = vld [vmem:[%s1196_s7 + $0x28] sm:$0xff]  ;;  %v242_v8 = vsel %vm241_vm1, %v224_v2, -inf  ;;  %v243_v9 = vsel %vm241_vm1, %v225_v3, -inf  ;;  %v244_v10 = vsel %vm241_vm1, %v226_v4, -inf }
  0x69   : > { %v230_v11 = vld [vmem:[%s1196_s7 + $0x30] sm:$0xff]  ;;  %v231_v12 = vld [vmem:[%s1196_s7 + $0x38] sm:$0xff]  ;;  %v245_v13 = vsel %vm241_vm1, %v227_v5, -inf  ;;  %v246_v14 = vsel %vm241_vm1, %v228_v6, -inf  ;;  %v248_v15 = vsel %vm241_vm1, %v229_v7, -inf  ;;  %v232_v16 = vld [vmem:[%s1196_s7 + $0x40] sm:$0xff] }
  0x6a   : > { %v233_v17 = vld [vmem:[%s1196_s7 + $0x48] sm:$0xff]  ;;  %v234_v18 = vld [vmem:[%s1196_s7 + $0x50] sm:$0xff]  ;;  %v247_v19 = vmax.f32 %v242_v8, %v246_v14  ;;  %v249_v20 = vmax.f32 %v243_v9, %v248_v15  ;;  %v250_v21 = vsel %vm241_vm1, %v230_v11, -inf  ;;  %v252_v22 = vsel %vm241_vm1, %v231_v12, -inf  ;;  %v235_v23 = vld [vmem:[%s1196_s7 + $0x58] sm:$0xff] }
  0x6b   : > { %v237_v24 = vld [vmem:[%s1196_s7 + $0x68] sm:$0xff]  ;;  %v238_v25 = vld [vmem:[%s1196_s7 + $0x70] sm:$0xff]  ;;  %v251_v26 = vmax.f32 %v244_v10, %v250_v21  ;;  %v253_v27 = vmax.f32 %v245_v13, %v252_v22  ;;  %v254_v28 = vsel %vm241_vm1, %v232_v16, -inf  ;;  %v256_v29 = vsel %vm241_vm1, %v233_v17, -inf  ;;  %v236_v30 = vld [vmem:[%s1196_s7 + $0x60] sm:$0xff] }
  0x6c   : > { %v239_v31 = vld [vmem:[%s1196_s7 + $0x78] sm:$0xff]  ;;  %v255_v32 = vmax.f32 %v247_v19, %v254_v28  ;;  %v257_v33 = vmax.f32 %v249_v20, %v256_v29  ;;  %v258_v34 = vsel %vm241_vm1, %v234_v18, -inf  ;;  %v260_v35 = vsel %vm241_vm1, %v235_v23, -inf }
  0x6d   : > { %v259_v36 = vmax.f32 %v251_v26, %v258_v34  ;;  %v261_v37 = vmax.f32 %v253_v27, %v260_v35  ;;  %v262_v38 = vsel %vm241_vm1, %v236_v30, -inf  ;;  %v264_v39 = vsel %vm241_vm1, %v237_v24, -inf  ;;  %v240_v8 = vld [vmem:[#allocation2] sm:$0x1] }
  0x6e   : > { %v263_v40 = vmax.f32 %v255_v32, %v262_v38  ;;  %v265_v41 = vmax.f32 %v257_v33, %v264_v39  ;;  %v266_v42 = vsel %vm241_vm1, %v238_v25, -inf  ;;  %v268_v43 = vsel %vm241_vm1, %v239_v31, -inf  ;;  %v282_v33 = vld [vmem:[#allocation3] sm:$0x1] }
  0x6f   : > { %v267_v44 = vmax.f32 %v259_v36, %v266_v42  ;;  %v269_v45 = vmax.f32 %v261_v37, %v268_v43  ;;  %v283_v46 = vsel %vm241_vm1, %v224_v2, 0.0  ;;  %v284_v47 = vsel %vm241_vm1, %v225_v3, 0.0  ;;  %v332_v37 = vld [vmem:[%s1315_s1 + $0x18] sm:$0xff] (!%p732_p9)  ;;  %v407_v43 = vld [vmem:[#allocation6] sm:$0xff] (!%p732_p9) }
  0x70   : > { %v270_v48 = vmax.f32 %v263_v40, %v265_v41  ;;  %v285_v49 = vadd.f32 %v284_v47, %v283_v46  ;;  %v286_v50 = vsel %vm241_vm1, %v226_v4, 0.0  ;;  %v288_v52 = vsel %vm241_vm1, %v227_v5, 0.0 }
  0x71   : > { %v271_v51 = vmax.f32 %v267_v44, %v269_v45  ;;  %v290_v55 = vsel %vm241_vm1, %v228_v6, 0.0  ;;  %v292_v58 = vsel %vm241_vm1, %v229_v7, 0.0  ;;  %v294_v61 = vsel %vm241_vm1, %v230_v11, 0.0 }
  0x72   : > { %v287_v53 = vadd.f32 %v286_v50, %v285_v49  ;;  %v296_v0 = vsel %vm241_vm1, %v231_v12, 0.0  ;;  %v298_v3 = vsel %vm241_vm1, %v232_v16, 0.0  ;;  %v300_v6 = vsel %vm241_vm1, %v233_v17, 0.0 }
  0x73   : > { %v272_v54 = vmax.f32 %v270_v48, %v271_v51  ;;  %v302_v7 = vsel %vm241_vm1, %v234_v18, 0.0  ;;  %v304_v14 = vsel %vm241_vm1, %v235_v23, 0.0  ;;  %v306_v12 = vsel %vm241_vm1, %v236_v30, 0.0  ;;  %v331_v30 = vld [vmem:[%s1315_s1 + $0x10] sm:$0xff] (!%p732_p9) }
  0x74   : > { %v289_v56 = vadd.f32 %v288_v52, %v287_v53  ;;  %v308_v19 = vsel %vm241_vm1, %v237_v24, 0.0  ;;  %v310_v17 = vsel %vm241_vm1, %v238_v25, 0.0  ;;  %v312_v22 = vsel %vm241_vm1, %v239_v31, 0.0  ;;  %v329_v24 = vld [vmem:[%s1315_s1] sm:$0xff] (!%p732_p9)  ;;  %v330_v25 = vld [vmem:[%s1315_s1 + $0x8] sm:$0xff] (!%p732_p9) }
  0x75   : > { %v273_v57 = vrot.slane %v272_v54, 4  ;;  %v1027_v31 = vmov (!%p732_p9), 0.0|0.0   ;;  %v786_v36 = vpack.c.bf16 (!%p732_p9), %v330_v25, %v329_v24  ;;  %vm1028_vm3 = vmmov (!%p732_p9), 0  }
  0x76   : > { %v291_v59 = vadd.f32 %v290_v55, %v289_v56  ;;  %785 = vmatprep.subr.bf16.mxu0 (!%p732_p9), %v1027_v31  ;;  %791 = vmatprep.subr.bf16.mxu1 (!%p732_p9), %v1027_v31  ;;  %v1029_v38 = vmov (!%p732_p9), 0.0   ;;  %v789_v39 = vpack.c.bf16 (!%p732_p9), %v332_v37, %v331_v30  ;;  %vm482_vm4 = vcmask (!%p732_p9), 64512  }
  0x77   : > { %v274_v60 = vmax.f32 %v272_v54, %v273_v57  ;;  %761 = vmatprep.mubr.msk.f32.mxu0 (!%p732_p9), %vm1028_vm3, %v1029_v38  ;;  %772 = vmatprep.mubr.msk.f32.mxu1 (!%p732_p9), %vm1028_vm3, %v1029_v38 }
  0x78   : > { %v293_v62 = vadd.f32 %v292_v58, %v291_v59  ;;  %787 = vmatpush3.bf16.msra.mxu0 (!%p732_p9), %v786_v36  ;;  %793 = vmatpush3.bf16.msra.mxu1 (!%p732_p9), %v786_v36 }
  0x79   : > { %v275_v63 = vrot.slane %v274_v60, 2  ;;  %788 = vmatprep.subr.bf16.mxu0 (!%p732_p9), %v1027_v31  ;;  %794 = vmatprep.subr.bf16.mxu1 (!%p732_p9), %v1027_v31 }
  0x7a   : > { %v295_v1 = vadd.f32 %v294_v61, %v293_v62 }
  0x7b   : > { %v276_v2 = vmax.f32 %v274_v60, %v275_v63 }
  0x7c   : > { %v297_v4 = vadd.f32 %v296_v0, %v295_v1  ;;  %790 = vmatpush3.bf16.msra.mxu0 (!%p732_p9), %v789_v39  ;;  %796 = vmatpush3.bf16.msra.mxu1 (!%p732_p9), %v789_v39 }
  0x7d   : > { %v277_v5 = vrot.slane %v276_v2, 1  ;;  %775 = vmatprep.subr.mxu1 (!%p732_p9), %v1029_v38  ;;  %780 = vmatprep.subr.mxu0 (!%p732_p9), %v1029_v38 }
  0x7e   : > { %v299_v9 = vadd.f32 %v298_v3, %v297_v4 }
  0x7f   : > { %v278_v10 = vmax.f32 %v276_v2, %v277_v5 }
  0x80   : > { %v301_v13 = vadd.f32 %v300_v6, %v299_v9 }
  0x81   : > { %v279_v11 = vmax.f32 %v240_v8, %v278_v10 }
  0x82   : > { %v303_v15 = vadd.f32 %v302_v7, %v301_v13 }
  0x83   : > { %281 = vst.msk [vmem:[#allocation2] sm:$0x1] %vm280_vm2, %v279_v11 }
  0x84   : > { %v305_v16 = vadd.f32 %v304_v14, %v303_v15 }
  0x86   : > { %v307_v20 = vadd.f32 %v306_v12, %v305_v16 }
  0x88   : > { %v309_v21 = vadd.f32 %v308_v19, %v307_v20 }
  0x8a   : > { %v311_v18 = vadd.f32 %v310_v17, %v309_v21  ;;  %v326_v42 = vld [vmem:[#allocation2] sm:$0x1] (!%p732_p9) }
  0x8b   : > { %762 = vmatmul.mubr.msk.f32.vlgmr.msra.gmra.mrb[0].mxu0 (!%p732_p9), %vm241_vm1, %v326_v42 }
  0x8c   : > { %v313_v26 = vadd.f32 %v312_v22, %v311_v18  ;;  %781 = vmatpush3.msra.mxu0 (!%p732_p9), %v407_v43  ;;  %782 = vmatprep.mubr.msk.f32.mxu0 (!%p732_p9), %vm1028_vm3, %v1029_v38 }
  0x8e   : > { %v314_v27 = vrot.slane %v313_v26, 4 }
  0x90   : > { %v315_v28 = vadd.f32 %v314_v27, %v313_v26 }
  0x92   : > { %v316_v29 = vrot.slane %v315_v28, 2 }
  0x94   : > { %v317_v23 = vadd.f32 %v316_v29, %v315_v28 }
  0x96   : > { %v318_v32 = vrot.slane %v317_v23, 1  ;;  %325 = sbr.rel (%p732_p9) target bundleno = 623 (0x26f), region = 48 }
  0x98   : > { %v319_v34 = vadd.f32 %v318_v32, %v317_v23 }
  0x9a   : > { %v320_v35 = vadd.f32 %v319_v34, %v282_v33 }
  0x9c   : > { %321 = vst.msk [vmem:[#allocation3] sm:$0x1] %vm280_vm2, %v320_v35 }
  0xa3   : > { %v327_v40 = vld [vmem:[#allocation3] sm:$0x1] }
  0xa4   : > { %v328_v41 = vmul.f32 0.00390625, %v327_v40 }
  0xa6   : > { %773 = vmatmul.mubr.msk.f32.vlgmr.msra.gmra.mrb[0].mxu1 %vm241_vm1, %v328_v41 }
  0xa7   : > { %776 = vmatpush3.msra.mxu1 %v407_v43  ;;  %777 = vmatprep.mubr.msk.f32.mxu1 %vm1028_vm3, %v1029_v38 }
 0x15e   : > { %v402_v44 = vpop.f32.mrb[0].mxu0 }
 0x15f   : > { %v406_v46 = vmax.f32 %v402_v44, 0.0  ;;  %v763_v48 = vpop.f32.mrb[1].mxu0 }
 0x161   : > { %783 = vmatmul.mubr.msk.f32.vlgmr.msra.gmra.mrb[2].mxu0 %vm482_vm4, %v406_v46 }
 0x179   : > { %v477_v45 = vpop.f32.mrb[0].mxu1 }
 0x17a   : > { %v481_v47 = vmax.f32 %v477_v45, 0.0  ;;  %v774_v49 = vpop.f32.mrb[1].mxu1 }
 0x17c   : > { %778 = vmatmul.mubr.msk.f32.vlgmr.msra.gmra.mrb[2].mxu1 %vm482_vm4, %v481_v47 }
 0x234   : > { %v625_v51 = vpop.f32.mrb[2].mxu0 }
 0x235   : > { %v784_v54 = vpop.f32.mrb[3].mxu0 }
 0x24f   : > { %v552_v50 = vpop.f32.mrb[2].mxu1 }
 0x250   : > { %v626_v52 = vadd.f32 %v625_v51, %v552_v50  ;;  %v779_v53 = vpop.f32.mrb[3].mxu1 }
 0x252   : > { %v629_v55 = vsub.f32 0.0, %v626_v52 }
 0x254   : > { %v630_v56 = vmul.f32 1.442695, %v629_v55 }
 0x256   : > { %887 = vpow2.f32 %v630_v56 }
 0x260   : > { %v888_v57 = vpop.eup %887 }
 0x261   : > { %v632_v58 = vadd.f32 1.0, %v888_v57 }
 0x263   : > { %889 = vrcp.f32 %v632_v58 }
 0x26d   : > { %v890_v59 = vpop.eup %889 }
 0x26e   : > { %635 = vst.msk [vmem:[%s216_s24] sm:$0x1] %vm280_vm2, %v890_v59 }
 0x26f PF: > { %s17_s19 = sadd.s32 1, %s1019_s19   ;;  %s1335_s29 = smov %s1344_s12 }
 0x270   : > { %p14_p10 = scmp.ge.s32.totalorder %s17_s19, 6   ;;  %s1336_s12 = smov %s995_s13 }
 0x271   : > { %s1337_s13 = smov %s999_s14  ;;  %s1338_s14 = smov %s1163_s5 }
 0x272   : > { %s1339_s15 = smov %s1011_s17  ;;  %s1340_s16 = smov %s1015_s18 }
 0x273   : > { %s1341_s17 = smov %s1335_s29  ;;  %s1342_s18 = smov %s1348_s20 }
 0x274   :  { %16 = sbr.rel (!%p14_p10) target bundleno = 8 (0x8), region = 84 }
 0x27b   :  { %653 = vsyncpa [#allocation5], 1 }
 0x27c   :  { %655 = vsyncpa [#allocation5 + $0x1], 1 }
 0x27d   :  { %656 = vsyncpa [#allocation7], 1 }

// kernel: cbam_forward.3
= control target key start
LH: loop header
LB: loop body
LE: loop exit
PB: predicated region body
PF: predicated region fallthrough
CT: control target
= control target key end

     0   :  { %s4564_s0 = inlined_call_operand.vmem [shape: f32[2,16,16,32], index: 0, kind: input, shape index: {}]   ;;  %s4565_s1 = inlined_call_operand.vmem [shape: f32[2,1,32], index: 1, kind: input, shape index: {}]   ;;  %s4566_s2 = inlined_call_operand.vmem [shape: f32[98], index: 2, kind: input, shape index: {}]   ;;  %s4567_s3 = inlined_call_operand.hbm [shape: f32[2,16,16,32], index: 3, kind: output, shape index: {}]  }
   0x1   :  { %4655 = sst [smem:[#allocation21_spill]] %s4564_s0 }
   0x2   :  { %4656 = sst [smem:[#allocation22_spill]] %s4565_s1 }
   0x3   :  { %4657 = sst [smem:[#allocation23_spill]] %s4566_s2 }
   0x4   :  { %8 = vsyncpa [#allocation6], 0 }
   0x5   :  { %9 = vsyncpa [#allocation5], 0 }
   0x6   :  { %11 = vsyncpa [#allocation5 + $0x1], 0  ;;  %s2835_s12 = smov 0   ;;  %s2837_s13 = smov 0  }
   0x7   :  { %s2839_s14 = smov 0   ;;  %s2841_s15 = smov 0  }
   0x8 LB: > { %4658 = sst [smem:[#allocation10_spill]] %s2798_s14  ;;  %s2856_s16 = sadd.s32 4294967295, %s2802_s15   ;;  %s2802_s15 = sphi %s2841_s15, %s4759_s15   ;;  %s2798_s14 = sphi %s2839_s14, %s4756_s14   ;;  %s2794_s13 = sphi %s2837_s13, %s4758_s13   ;;  %s2790_s12 = sphi %s2835_s12, %s4757_s12  }
   0x9   : > { %s2540_s17 = sadd.s32 4294967294, %s2802_s15   ;;  %s2860_s18 = sadd.s32 1, %s2802_s15  }
   0xa   : > { %s97_s19 = sadd.s32 1, %s2798_s14  ;;  %s94_s20 = ssub.s32 %s2802_s15, %s2860_s18 }
   0xb   : > { %p107_p0 = scmp.ne.s32.totalorder %s2798_s14, %s2794_s13  ;;  %p95_p1 = scmp.eq.s32.totalorder %s94_s20, 0 }
   0xc   : > { %p108_p2 = scmp.eq.s32.totalorder %s2856_s16, 1  ;;  %p113_p3 = scmp.ne.s32.totalorder %s2794_s13, %s2790_s12 }
   0xd   : > { %p114_p4 = scmp.eq.s32.totalorder %s2540_s17, 1  ;;  %p2541_p7 = scmp.ge.s32.totalorder %s2802_s15, 1 }
   0xe   : > { %s2871_s21 = scalar_select %p95_p1, %s2798_s14, %s97_s19  }
   0xf   : > { %p2873_p5 = por %p108_p2, %p107_p0  ;;  %p2877_p6 = por %p114_p4, %p113_p3 }
  0x10   : > { %4659 = sst [smem:[#allocation11_spill]] %s2871_s21  ;;  %p121_p8 = scmp.lt.s32.totalorder %s2802_s15, 3 }
  0x11   : > { %p2668_p9 = scmp.eq.s32.totalorder %s2856_s16, 0  ;;  %s4663_s2 = sld [smem:[#allocation23_spill]] }
  0x12   : > { %p2884_p10 = pnand %p2541_p7, %p121_p8 }
  0x14   : > { %p2660_p11 = pneg %p2884_p10 }
  0x16   : > { %p2661_p12 = pnand %p2668_p9, %p2660_p11 }
  0x17   : > { %s134_s27 = sshll.u32 %s4663_s2, 4  ;;  %s135_s27 = int_to_ptr.vmem [resolvable:$true] %s134_s27 }
  0x18   : > { %s2721_s28 = scalar_lea.vmem %s135_s27, 16  ;;  %p2723_p0 = pneg %p2661_p12 }
  0x19   : > { %p2722_p13 = scmp.ne.s32.totalorder %s135_s27, %s2721_s28  ;;  %p2729_p3 = scmp.lt.s32.totalorder %s135_s27, %s135_s27 }
  0x1a   : > { %p2730_p4 = scmp.lt.s32.totalorder %s2721_s28, %s2721_s28 }
  0x1b   : > { %p2724_p1 = pnand %p2723_p0, %p2722_p13 }
  0x1c   : > { %p2731_p7 = por %p2730_p4, %p2729_p3 }
  0x1d   : > { %p2725_p2 = pneg %p2724_p1 }
  0x1f   : > { %p2732_p8 = pnand %p2731_p7, %p2725_p2 }
  0x21   : > { %2735 = shalt.err (!%p2732_p8)
}
  0x22   : > { %s2804_s29 = smov [#allocation4]   ;;  %161 = sbr.rel (%p2884_p10) target bundleno = 961 (0x3c1), region = 32 }
  0x23   : > { %2663 = dma.vmem_to_smem (!%p2661_p12), %s135_s27, 16, %s2804_s29, [#allocation6]  }
  0x29   : > { %2781 = dma.done.wait (%p2668_p9), [#allocation6], 16  }
  0x2a   : > { %2783 = vsyncadd (%p2668_p9), [#allocation6], 4294967280 }
  0x2b   : > { %167 = sfence }
  0x2c   : > { %p189_p11 = scmp.lt.s32.totalorder %s2856_s16, 1  ;;  %s4664_s1 = sld [smem:[#allocation22_spill]]  ;;  %vm268_vm0 = vcmask 261120   ;;  %vm494_vm1 = vcmask 179200   ;;  %vm497_vm2 = vcmask 177152   ;;  %vm546_vm3 = vcmask 154712  }
  0x2d   : > { %s4665_s0 = sld [smem:[#allocation21_spill]]  ;;  %vm683_vm4 = vcmask 1041409   ;;  %vm685_vm5 = vcmask 1042434   ;;  %vm687_vm6 = vcmask 1043459   ;;  %vm689_vm7 = vcmask 1044484   ;;  %s3207_s11 = sld [smem:[#allocation4 + $0x1]] }
  0x2e   : > { %s190_s30 = scalar_select %p189_p11, %s2856_s16, 1  ;;  %vm691_vm8 = vcmask 1045509   ;;  %vm693_vm9 = vcmask 1046534   ;;  %vm695_vm10 = vcmask 1047559   ;;  %vm706_vm11 = vcmask 154648  }
  0x2f   : > { %s3211_s17 = sld [smem:[#allocation4 + $0x2]]  ;;  %s3214_s19 = sld [smem:[#allocation4 + $0x3]] }
  0x30   : > { %s2652_s4 = sshll.u32 %s190_s30, 8  ;;  %s3222_s20 = sld [smem:[#allocation4 + $0x4]] }
  0x31   : > { %s4585_s24 = smov 127   ;;  %s3229_s25 = sld [smem:[#allocation4 + $0x5]] }
  0x32   : > { %s196_s7 = scalar_lea.vmem %s4664_s1, %s190_s30  ;;  %s4583_s26 = smov 126  }
  0x33   : > { %s2909_s10 = scalar_lea.vmem %s4665_s0, %s2652_s4  ;;  %v2911_v0 = vld [vmem:[%s196_s7] ss:$0 sm:$0xff]  ;;  %s4581_s27 = smov 125  }
  0x34   : > { %v199_v1 = vld [vmem:[%s2909_s10 + $0x10] sm:$0xff]  ;;  %v197_v2 = vld [vmem:[%s2909_s10] sm:$0xff]  ;;  %v200_v3 = vld [vmem:[%s2909_s10 + $0x18] sm:$0xff]  ;;  %s4579_s28 = smov 124   ;;  %s4575_s29 = smov 123  }
  0x35   : > { %v2917_v4 = vmul.f32 %v2911_v0, %v199_v1  ;;  %v2920_v5 = vmul.f32 %v2911_v0, %v197_v2  ;;  %v2923_v6 = vmul.f32 %v2911_v0, %v200_v3  ;;  %v198_v7 = vld [vmem:[%s2909_s10 + $0x8] sm:$0xff]  ;;  %v201_v10 = vld [vmem:[%s2909_s10 + $0x20] sm:$0xff]  ;;  %v204_v17 = vld [vmem:[%s2909_s10 + $0x38] sm:$0xff]  ;;  %s3324_s30 = sld [smem:[#allocation4]]  ;;  %s3327_s4 = sld [smem:[#allocation4 + $0x31]] }
  0x36   : > { %v2927_v8 = vmul.f32 %v2911_v0, %v198_v7  ;;  %v202_v9 = vld [vmem:[%s2909_s10 + $0x28] sm:$0xff]  ;;  %v2943_v16 = vmul.f32 %v2911_v0, %v201_v10  ;;  %v203_v18 = vld [vmem:[%s2909_s10 + $0x30] sm:$0xff]  ;;  %v2952_v21 = vmul.f32 %v2911_v0, %v204_v17  ;;  %v205_v24 = vld [vmem:[%s2909_s10 + $0x40] sm:$0xff]  ;;  %s3331_s5 = sld [smem:[#allocation4 + $0x33]]  ;;  %s3333_s6 = sld [smem:[#allocation4 + $0x32]] }
  0x37   : > { %v275_v11 = vsel %vm268_vm0, %v2917_v4, -inf  ;;  %v269_v12 = vsel %vm268_vm0, %v2920_v5, -inf  ;;  %v278_v13 = vsel %vm268_vm0, %v2923_v6, -inf  ;;  %v2940_v15 = vmul.f32 %v2911_v0, %v202_v9  ;;  %v206_v23 = vld [vmem:[%s2909_s10 + $0x48] sm:$0xff]  ;;  %v208_v29 = vld [vmem:[%s2909_s10 + $0x58] sm:$0xff]  ;;  %v207_v30 = vld [vmem:[%s2909_s10 + $0x50] sm:$0xff] }
  0x38   : > { %276 = vmax.xlane.f32.xlu1 %v275_v11  ;;  %270 = vmax.xlane.f32.xlu0 %v269_v12  ;;  %v272_v14 = vsel %vm268_vm0, %v2927_v8, -inf  ;;  %v281_v20 = vsel %vm268_vm0, %v2943_v16, -inf  ;;  %v2955_v22 = vmul.f32 %v2911_v0, %v203_v18  ;;  %v290_v25 = vsel %vm268_vm0, %v2952_v21, -inf  ;;  %v210_v35 = vld [vmem:[%s2909_s10 + $0x68] sm:$0xff]  ;;  %v209_v36 = vld [vmem:[%s2909_s10 + $0x60] sm:$0xff]  ;;  %v212_v41 = vld [vmem:[%s2909_s10 + $0x78] sm:$0xff] }
  0x39   : > { %v284_v19 = vsel %vm268_vm0, %v2940_v15, -inf  ;;  %v2964_v27 = vmul.f32 %v2911_v0, %v206_v23  ;;  %v2967_v28 = vmul.f32 %v2911_v0, %v205_v24  ;;  %v2976_v33 = vmul.f32 %v2911_v0, %v208_v29  ;;  %v211_v42 = vld [vmem:[%s2909_s10 + $0x70] sm:$0xff]  ;;  %v214_v47 = vld [vmem:[%s2909_s10 + $0x88] sm:$0xff]  ;;  %v213_v48 = vld [vmem:[%s2909_s10 + $0x80] sm:$0xff]  ;;  %s3337_s7 = sld [smem:[#allocation4 + $0x34]]  ;;  %s3343_s8 = sld [smem:[#allocation4 + $0x35]] }
  0x3a   : > { %v287_v26 = vsel %vm268_vm0, %v2955_v22, -inf  ;;  %v2979_v34 = vmul.f32 %v2911_v0, %v207_v30  ;;  %v2988_v39 = vmul.f32 %v2911_v0, %v210_v35  ;;  %v2991_v40 = vmul.f32 %v2911_v0, %v209_v36  ;;  %v216_v53 = vld [vmem:[%s2909_s10 + $0x98] sm:$0xff]  ;;  %v215_v54 = vld [vmem:[%s2909_s10 + $0x90] sm:$0xff]  ;;  %v218_v59 = vld [vmem:[%s2909_s10 + $0xa8] sm:$0xff]  ;;  %s3362_s9 = sld [smem:[#allocation4 + $0x36]]  ;;  %s4685_s0 = smov 127  }
  0x3b   : > { %v296_v31 = vsel %vm268_vm0, %v2964_v27, -inf  ;;  %v293_v32 = vsel %vm268_vm0, %v2967_v28, -inf  ;;  %v302_v37 = vsel %vm268_vm0, %v2976_v33, -inf  ;;  %v3000_v45 = vmul.f32 %v2911_v0, %v212_v41  ;;  %v217_v60 = vld [vmem:[%s2909_s10 + $0xa0] sm:$0xff]  ;;  %v220_v2 = vld [vmem:[%s2909_s10 + $0xb8] sm:$0xff]  ;;  %v219_v3 = vld [vmem:[%s2909_s10 + $0xb0] sm:$0xff] }
  0x3c   : > { %279 = vmax.xlane.f32.xlu1 %v278_v13  ;;  %273 = vmax.xlane.f32.xlu0 %v272_v14  ;;  %v299_v38 = vsel %vm268_vm0, %v2979_v34, -inf  ;;  %v308_v43 = vsel %vm268_vm0, %v2988_v39, -inf  ;;  %v305_v44 = vsel %vm268_vm0, %v2991_v40, -inf  ;;  %v3003_v46 = vmul.f32 %v2911_v0, %v211_v42  ;;  %v222_v12 = vld [vmem:[%s2909_s10 + $0xc8] sm:$0xff]  ;;  %v221_v13 = vld [vmem:[%s2909_s10 + $0xc0] sm:$0xff]  ;;  %v223_v23 = vld [vmem:[%s2909_s10 + $0xd0] sm:$0xff] }
  0x3d   : > { %v314_v49 = vsel %vm268_vm0, %v3000_v45, -inf  ;;  %v3012_v51 = vmul.f32 %v2911_v0, %v214_v47  ;;  %v3015_v52 = vmul.f32 %v2911_v0, %v213_v48  ;;  %v3024_v57 = vmul.f32 %v2911_v0, %v216_v53  ;;  %v228_v41 = vld [vmem:[%s2909_s10 + $0xf8] sm:$0xff]  ;;  %v227_v42 = vld [vmem:[%s2909_s10 + $0xf0] sm:$0xff]  ;;  %s3598_s1 = sld [smem:[#allocation4 + $0x42]]  ;;  %s3738_s2 = sld [smem:[#allocation4 + $0x7]] }
  0x3e   : > { %v311_v50 = vsel %vm268_vm0, %v3003_v46, -inf  ;;  %v3027_v58 = vmul.f32 %v2911_v0, %v215_v54  ;;  %v3036_v63 = vmul.f32 %v2911_v0, %v218_v59  ;;  %v3039_v1 = vmul.f32 %v2911_v0, %v217_v60  ;;  %s3751_s21 = sld [smem:[#allocation4 + $0x49]]  ;;  %s3895_s14 = sld [smem:[#allocation4 + $0xe]] }
  0x3f   : > { %v320_v55 = vsel %vm268_vm0, %v3012_v51, -inf  ;;  %v317_v56 = vsel %vm268_vm0, %v3015_v52, -inf  ;;  %v326_v61 = vsel %vm268_vm0, %v3024_v57, -inf  ;;  %v3048_v10 = vmul.f32 %v2911_v0, %v220_v2 }
  0x40   : > { %285 = vmax.xlane.f32.xlu1 %v284_v19  ;;  %282 = vmax.xlane.f32.xlu0 %v281_v20  ;;  %v323_v62 = vsel %vm268_vm0, %v3027_v58, -inf  ;;  %v332_v7 = vsel %vm268_vm0, %v3036_v63, -inf  ;;  %v329_v9 = vsel %vm268_vm0, %v3039_v1, -inf  ;;  %v3051_v11 = vmul.f32 %v2911_v0, %v219_v3  ;;  %v224_v20 = vld [vmem:[%s2909_s10 + $0xd8] sm:$0xff] }
  0x41   : > { %v338_v14 = vsel %vm268_vm0, %v3048_v10, -inf  ;;  %v3060_v18 = vmul.f32 %v2911_v0, %v222_v12  ;;  %v3063_v19 = vmul.f32 %v2911_v0, %v221_v13  ;;  %v2805_v24 = vmov 0.0  }
  0x42   : > { %4666 = vst [vmem:[#allocation12_spill] sm:$0xff] %v3051_v11  ;;  %v335_v17 = vsel %vm268_vm0, %v3051_v11, -inf  ;;  %495 = vst.msk [vmem:[#allocation2] sm:$0xff] %vm494_vm1, %v2805_v24  ;;  %v3072_v29 = vmul.f32 %v2911_v0, %v224_v20  ;;  %v3075_v30 = vmul.f32 %v2911_v0, %v223_v23  ;;  %v3096_v47 = vmul.f32 %v2911_v0, %v228_v41 }
  0x43   : > { %4667 = vst [vmem:[#allocation13_spill] sm:$0xff] %v3060_v18  ;;  %4668 = vst [vmem:[#allocation14_spill] sm:$0xff] %v3063_v19  ;;  %v3099_v48 = vmul.f32 %v2911_v0, %v227_v42  ;;  %v368_v53 = vsel %vm268_vm0, %v2927_v8, 0.0  ;;  %v365_v54 = vsel %vm268_vm0, %v2920_v5, 0.0  ;;  %v377_v59 = vsel %vm268_vm0, %v2943_v16, 0.0 }
  0x44   : > { %291 = vmax.xlane.f32.xlu1 %v290_v25  ;;  %288 = vmax.xlane.f32.xlu0 %v287_v26  ;;  %496 = vst.msk [vmem:[#allocation2 + $0x8] sm:$0xff] %vm494_vm1, %v2805_v24  ;;  %499 = vst.msk [vmem:[#allocation3] sm:$0xff] %vm494_vm1, %v2805_v24  ;;  %v344_v25 = vsel %vm268_vm0, %v3060_v18, -inf  ;;  %v341_v26 = vsel %vm268_vm0, %v3063_v19, -inf  ;;  %v350_v35 = vsel %vm268_vm0, %v3072_v29, -inf  ;;  %v347_v36 = vsel %vm268_vm0, %v3075_v30, -inf }
  0x45   : > { %500 = vst.msk [vmem:[#allocation3 + $0x8] sm:$0xff] %vm494_vm1, %v2805_v24  ;;  %4669 = vst [vmem:[#allocation15_spill] sm:$0xff] %v3072_v29  ;;  %v386_v60 = vsel %vm268_vm0, %v2952_v21, 0.0  ;;  %v389_v2 = vsel %vm268_vm0, %v2967_v28, 0.0  ;;  %v398_v3 = vsel %vm268_vm0, %v2976_v33, 0.0  ;;  %v401_v12 = vsel %vm268_vm0, %v2991_v40, 0.0 }
  0x46   : > { %4670 = vst [vmem:[#allocation16_spill] sm:$0xff] %v3075_v30  ;;  %4673 = vst [vmem:[#allocation19_spill] sm:$0xff] %v3096_v47  ;;  %v410_v13 = vsel %vm268_vm0, %v3000_v45, 0.0  ;;  %v413_v20 = vsel %vm268_vm0, %v3015_v52, 0.0  ;;  %v422_v23 = vsel %vm268_vm0, %v3024_v57, 0.0  ;;  %v446_v41 = vsel %vm268_vm0, %v3072_v29, 0.0 }
  0x47   : > { %4674 = vst [vmem:[#allocation20_spill] sm:$0xff] %v3099_v48  ;;  %498 = vst.msk [vmem:[#allocation2 + $0x10] sm:$0x3f] %vm497_vm2, %v2805_v24  ;;  %v443_v42 = vsel %vm268_vm0, %v3075_v30, 0.0 }
  0x48   : > { %297 = vmax.xlane.f32.xlu1 %v296_v31  ;;  %294 = vmax.xlane.f32.xlu0 %v293_v32  ;;  %v226_v31 = vld [vmem:[%s2909_s10 + $0xe8] sm:$0xff]  ;;  %v225_v32 = vld [vmem:[%s2909_s10 + $0xe0] sm:$0xff]  ;;  %501 = vst.msk [vmem:[#allocation3 + $0x10] sm:$0x3f] %vm497_vm2, %v2805_v24  ;;  %v419_v24 = vsel %vm268_vm0, %v3027_v58, 0.0  ;;  %s3366_s10 = sld [smem:[#allocation4 + $0x6]] }
  0x4c   : > { %303 = vmax.xlane.f32.xlu1 %v302_v37  ;;  %300 = vmax.xlane.f32.xlu0 %v299_v38  ;;  %v3084_v37 = vmul.f32 %v2911_v0, %v226_v31  ;;  %v3087_v38 = vmul.f32 %v2911_v0, %v225_v32  ;;  %v374_v0 = vsel %vm268_vm0, %v2923_v6, 0.0  ;;  %v434_v31 = vsel %vm268_vm0, %v3048_v10, 0.0 }
  0x4d   : > { %v431_v32 = vsel %vm268_vm0, %v3051_v11, 0.0 }
  0x4e   : > { %4671 = vst [vmem:[#allocation17_spill] sm:$0xff] %v3084_v37  ;;  %4672 = vst [vmem:[#allocation18_spill] sm:$0xff] %v3087_v38 }
  0x50   : > { %309 = vmax.xlane.f32.xlu1 %v308_v43  ;;  %306 = vmax.xlane.f32.xlu0 %v305_v44  ;;  %v356_v43 = vsel %vm268_vm0, %v3084_v37, -inf  ;;  %v353_v44 = vsel %vm268_vm0, %v3087_v38, -inf }
  0x54   : > { %315 = vmax.xlane.f32.xlu1 %v314_v49  ;;  %312 = vmax.xlane.f32.xlu0 %v311_v50  ;;  %v362_v49 = vsel %vm268_vm0, %v3096_v47, -inf  ;;  %v359_v50 = vsel %vm268_vm0, %v3099_v48, -inf }
  0x58   : > { %321 = vmax.xlane.f32.xlu1 %v320_v55  ;;  %318 = vmax.xlane.f32.xlu0 %v317_v56  ;;  %v371_v55 = vsel %vm268_vm0, %v2917_v4, 0.0  ;;  %v380_v56 = vsel %vm268_vm0, %v2940_v15, 0.0 }
  0x5c   : > { %327 = vmax.xlane.f32.xlu1 %v326_v61  ;;  %324 = vmax.xlane.f32.xlu0 %v323_v62  ;;  %v383_v61 = vsel %vm268_vm0, %v2955_v22, 0.0  ;;  %v392_v62 = vsel %vm268_vm0, %v2964_v27, 0.0 }
  0x60   : > { %333 = vmax.xlane.f32.xlu1 %v332_v7  ;;  %330 = vmax.xlane.f32.xlu0 %v329_v9  ;;  %v395_v7 = vsel %vm268_vm0, %v2979_v34, 0.0  ;;  %v404_v9 = vsel %vm268_vm0, %v2988_v39, 0.0 }
  0x64   : > { %339 = vmax.xlane.f32.xlu1 %v338_v14  ;;  %336 = vmax.xlane.f32.xlu0 %v335_v17  ;;  %v407_v14 = vsel %vm268_vm0, %v3003_v46, 0.0  ;;  %v416_v17 = vsel %vm268_vm0, %v3012_v51, 0.0 }
  0x68   : > { %345 = vmax.xlane.f32.xlu1 %v344_v25  ;;  %342 = vmax.xlane.f32.xlu0 %v341_v26  ;;  %v428_v25 = vsel %vm268_vm0, %v3036_v63, 0.0  ;;  %v425_v26 = vsel %vm268_vm0, %v3039_v1, 0.0 }
  0x6c   : > { %351 = vmax.xlane.f32.xlu1 %v350_v35  ;;  %348 = vmax.xlane.f32.xlu0 %v347_v36  ;;  %v440_v35 = vsel %vm268_vm0, %v3060_v18, 0.0  ;;  %v437_v36 = vsel %vm268_vm0, %v3063_v19, 0.0 }
  0x70   : > { %357 = vmax.xlane.f32.xlu1 %v356_v43  ;;  %354 = vmax.xlane.f32.xlu0 %v353_v44  ;;  %v452_v43 = vsel %vm268_vm0, %v3084_v37, 0.0  ;;  %v449_v44 = vsel %vm268_vm0, %v3087_v38, 0.0 }
  0x74   : > { %363 = vmax.xlane.f32.xlu1 %v362_v49  ;;  %360 = vmax.xlane.f32.xlu0 %v359_v50  ;;  %v458_v49 = vsel %vm268_vm0, %v3096_v47, 0.0  ;;  %v455_v50 = vsel %vm268_vm0, %v3099_v48, 0.0 }
  0x78   : > { %369 = vadd.xlane.f32.xlu1 %v368_v53  ;;  %366 = vadd.xlane.f32.xlu0 %v365_v54 }
  0x7c   : > { %375 = vadd.xlane.f32.xlu1 %v374_v0  ;;  %372 = vadd.xlane.f32.xlu0 %v371_v55 }
  0x80   : > { %381 = vadd.xlane.f32.xlu1 %v380_v56  ;;  %378 = vadd.xlane.f32.xlu0 %v377_v59  ;;  %v534_v56 = vlaneseq }
  0x84   : > { %387 = vadd.xlane.f32.xlu1 %v386_v60  ;;  %384 = vadd.xlane.f32.xlu0 %v383_v61  ;;  %v535_v61 = vand.u32 127, %v534_v56 }
  0x88   : > { %393 = vadd.xlane.f32.xlu1 %v392_v62  ;;  %390 = vadd.xlane.f32.xlu0 %v389_v2  ;;  %v541_v62 = vadd.s32 4294967285, %v535_v61 }
  0x8c   : > { %399 = vadd.xlane.f32.xlu1 %v398_v3  ;;  %396 = vadd.xlane.f32.xlu0 %v395_v7  ;;  %v536_v7 = vadd.s32 4294967293, %v535_v61 }
  0x90   : > { %405 = vadd.xlane.f32.xlu1 %v404_v9  ;;  %402 = vadd.xlane.f32.xlu0 %v401_v12  ;;  %v3169_v9 = vshrl.u32 %v534_v56, 7 }
  0x92   : > { %v3172_v12 = vsub.s32 %v541_v62, %v3169_v9 }
  0x94   : > { %411 = vadd.xlane.f32.xlu1 %v410_v13  ;;  %408 = vadd.xlane.f32.xlu0 %v407_v14 }
  0x98   : > { %417 = vadd.xlane.f32.xlu1 %v416_v17  ;;  %414 = vadd.xlane.f32.xlu0 %v413_v20  ;;  %v3175_v17 = vsub.s32 %v536_v7, %v3169_v9 }
  0x9c   : > { %423 = vadd.xlane.f32.xlu1 %v422_v23  ;;  %420 = vadd.xlane.f32.xlu0 %v419_v24 }
  0xa0   : > { %429 = vadd.xlane.f32.xlu1 %v428_v25  ;;  %426 = vadd.xlane.f32.xlu0 %v425_v26 }
  0xa4   : > { %435 = vadd.xlane.f32.xlu1 %v434_v31  ;;  %432 = vadd.xlane.f32.xlu0 %v431_v32 }
  0xa8   : > { %441 = vadd.xlane.f32.xlu1 %v440_v35  ;;  %438 = vadd.xlane.f32.xlu0 %v437_v36 }
  0xac   : > { %447 = vadd.xlane.f32.xlu1 %v446_v41  ;;  %444 = vadd.xlane.f32.xlu0 %v443_v42 }
  0xb0   : > { %453 = vadd.xlane.f32.xlu1 %v452_v43  ;;  %450 = vadd.xlane.f32.xlu0 %v449_v44 }
  0xb4   : > { %459 = vadd.xlane.f32.xlu1 %v458_v49  ;;  %456 = vadd.xlane.f32.xlu0 %v455_v50 }
  0xc5   : > { %v277_v53 = vpop.xlane.xlu1 %276  ;;  %v271_v54 = vpop.xlane.xlu0 %270 }
  0xc6   : > { %v551_v32 = vrot.slane %v277_v53, %v3175_v17  ;;  %v540_v35 = vrot.slane %v271_v54, %v3175_v17 }
  0xc9   : > { %v280_v0 = vpop.xlane.xlu1 %279  ;;  %v274_v55 = vpop.xlane.xlu0 %273 }
  0xca   : > { %v555_v20 = vrot.slane %v280_v0, %v3172_v12  ;;  %v545_v23 = vrot.slane %v274_v55, %v3172_v12 }
  0xcc   : > { %v556_v44 = vsel %vm546_vm3, %v555_v20, %v551_v32  ;;  %v547_v49 = vsel %vm546_vm3, %v545_v23, %v540_v35 }
  0xcd   : > { %v286_v59 = vpop.xlane.xlu1 %285  ;;  %v283_v60 = vpop.xlane.xlu0 %282  ;;  %v684_v61 = vsel %vm683_vm4, %v556_v44, %v547_v49  ;;  %v921_v44 = vstv %s3207_s11  ;;  %s3378_s11 = sld [smem:[#allocation4 + $0x37]] }
  0xce   : > { %v564_v24 = vrot.slane %v286_v59, %v3172_v12  ;;  %v560_v25 = vrot.slane %v283_v60, %v3175_v17 }
  0xd0   : > { %v565_v53 = vsel %vm546_vm3, %v564_v24, %v560_v25 }
  0xd1   : > { %v292_v2 = vpop.xlane.xlu1 %291  ;;  %v289_v3 = vpop.xlane.xlu0 %288 }
  0xd2   : > { %v573_v36 = vrot.slane %v292_v2, %v3172_v12  ;;  %v569_v41 = vrot.slane %v289_v3, %v3175_v17  ;;  %v686_v2 = vsel %vm685_vm5, %v565_v53, %v684_v61 }
  0xd4   : > { %v574_v56 = vsel %vm546_vm3, %v573_v36, %v569_v41 }
  0xd5   : > { %v298_v13 = vpop.xlane.xlu1 %297  ;;  %v295_v14 = vpop.xlane.xlu0 %294  ;;  %v688_v7 = vsel %vm687_vm6, %v574_v56, %v686_v2 }
  0xd6   : > { %v582_v42 = vrot.slane %v298_v13, %v3172_v12  ;;  %v578_v43 = vrot.slane %v295_v14, %v3175_v17 }
  0xd8   : > { %v583_v62 = vsel %vm546_vm3, %v582_v42, %v578_v43 }
  0xd9   : > { %v304_v26 = vpop.xlane.xlu1 %303  ;;  %v301_v31 = vpop.xlane.xlu0 %300  ;;  %v690_v23 = vsel %vm689_vm7, %v583_v62, %v688_v7 }
  0xda   : > { %v591_v50 = vrot.slane %v304_v26, %v3172_v12  ;;  %v587_v0 = vrot.slane %v301_v31, %v3175_v17 }
  0xdc   : > { %v592_v3 = vsel %vm546_vm3, %v591_v50, %v587_v0 }
  0xdd   : > { %v310_v54 = vpop.xlane.xlu1 %309  ;;  %v307_v55 = vpop.xlane.xlu0 %306  ;;  %v692_v26 = vsel %vm691_vm8, %v592_v3, %v690_v23 }
  0xde   : > { %v600_v59 = vrot.slane %v310_v54, %v3172_v12  ;;  %v596_v60 = vrot.slane %v307_v55, %v3175_v17  ;;  %v949_v54 = vstv %s3211_s17  ;;  %s3397_s17 = sld [smem:[#allocation4 + $0x8]] }
  0xe0   : > { %v601_v13 = vsel %vm546_vm3, %v600_v59, %v596_v60  ;;  %v977_v60 = vstv %s3214_s19  ;;  %s3413_s19 = sld [smem:[#allocation4 + $0x39]] }
  0xe1   : > { %v316_v14 = vpop.xlane.xlu1 %315  ;;  %v313_v20 = vpop.xlane.xlu0 %312  ;;  %v694_v31 = vsel %vm693_vm9, %v601_v13, %v692_v26  ;;  %v1005_v13 = vstv %s3222_s20  ;;  %s4577_s20 = smov 122  }
  0xe2   : > { %v609_v24 = vrot.slane %v316_v14, %v3172_v12  ;;  %v605_v25 = vrot.slane %v313_v20, %v3175_v17 }
  0xe4   : > { %v610_v32 = vsel %vm546_vm3, %v609_v24, %v605_v25 }
  0xe5   : > { %v696_v35 = vsel %vm695_vm10, %v610_v32, %v694_v31  ;;  %v322_v36 = vpop.xlane.xlu1 %321  ;;  %v319_v41 = vpop.xlane.xlu0 %318 }
  0xe6   : > { %707 = vst.msk [vmem:[#allocation2 + $0x3] sm:$0xff] %vm706_vm11, %v696_v35  ;;  %v618_v25 = vrot.slane %v322_v36, %v3172_v12  ;;  %v614_v26 = vrot.slane %v319_v41, %v3175_v17  ;;  %v1033_v36 = vstv %s3229_s25  ;;  %s3430_s25 = sld [smem:[#allocation4 + $0x9]] }
  0xe9   : > { %v328_v42 = vpop.xlane.xlu1 %327  ;;  %v325_v43 = vpop.xlane.xlu0 %324 }
  0xea   : > { %v627_v3 = vrot.slane %v328_v42, %v3172_v12  ;;  %v623_v7 = vrot.slane %v325_v43, %v3175_v17 }
  0xed   : > { %v3216_v49 = vld [vmem:[#allocation2] sm:$0xff]  ;;  %v334_v50 = vpop.xlane.xlu1 %333  ;;  %v331_v0 = vpop.xlane.xlu0 %330 }
  0xee   : > { %v922_v53 = vmul.f32 %v921_v44, %v3216_v49  ;;  %v950_v59 = vmul.f32 %v949_v54, %v3216_v49  ;;  %v978_v2 = vmul.f32 %v977_v60, %v3216_v49  ;;  %v636_v14 = vrot.slane %v334_v50, %v3172_v12 }
  0xef   : > { %v632_v20 = vrot.slane %v331_v0, %v3175_v17  ;;  %v1006_v43 = vmul.f32 %v1005_v13, %v3216_v49  ;;  %v628_v50 = vsel %vm546_vm3, %v627_v3, %v623_v7 }
  0xf0   : > { %926 = vrot.lane.b32.xlu0 %v922_v53, %s4585_s24 }
  0xf1   : > { %v340_v55 = vpop.xlane.xlu1 %339  ;;  %v337_v56 = vpop.xlane.xlu0 %336  ;;  %v637_v41 = vsel %vm546_vm3, %v636_v14, %v632_v20 }
  0xf2   : > { %v645_v31 = vrot.slane %v340_v55, %v3172_v12  ;;  %v641_v32 = vrot.slane %v337_v56, %v3175_v17 }
  0xf4   : > { %954 = vrot.lane.b32.xlu0 %v950_v59, %s4583_s26  ;;  %v619_v59 = vsel %vm546_vm3, %v618_v25, %v614_v26 }
  0xf5   : > { %v346_v61 = vpop.xlane.xlu1 %345  ;;  %v343_v62 = vpop.xlane.xlu0 %342  ;;  %v697_v3 = vsel %vm683_vm4, %v628_v50, %v619_v59 }
  0xf6   : > { %v654_v35 = vrot.slane %v346_v61, %v3172_v12  ;;  %v650_v42 = vrot.slane %v343_v62, %v3175_v17  ;;  %v646_v61 = vsel %vm546_vm3, %v645_v31, %v641_v32  ;;  %v698_v14 = vsel %vm685_vm5, %v637_v41, %v697_v3 }
  0xf8   : > { %982 = vrot.lane.b32.xlu0 %v978_v2, %s4581_s27  ;;  %v655_v7 = vsel %vm546_vm3, %v654_v35, %v650_v42 }
  0xf9   : > { %v352_v23 = vpop.xlane.xlu1 %351  ;;  %v349_v24 = vpop.xlane.xlu0 %348 }
  0xfa   : > { %v663_v0 = vrot.slane %v352_v23, %v3172_v12  ;;  %v659_v53 = vrot.slane %v349_v24, %v3175_v17  ;;  %v1034_v23 = vmul.f32 %v1033_v36, %v3216_v49  ;;  %v699_v24 = vsel %vm687_vm6, %v646_v61, %v698_v14 }
  0xfb   : > { %v700_v32 = vsel %vm689_vm7, %v655_v7, %v699_v24 }
  0xfc   : > { %1010 = vrot.lane.b32.xlu0 %v1006_v43, %s4579_s28  ;;  %v664_v20 = vsel %vm546_vm3, %v663_v0, %v659_v53 }
  0xfd   : > { %v358_v55 = vpop.xlane.xlu1 %357  ;;  %v355_v56 = vpop.xlane.xlu0 %354  ;;  %v701_v43 = vsel %vm691_vm8, %v664_v20, %v700_v32 }
  0xfe   : > { %v672_v62 = vrot.slane %v358_v55, %v3172_v12  ;;  %v668_v2 = vrot.slane %v355_v56, %v3175_v17 }
 0x100   : > { %v673_v25 = vsel %vm546_vm3, %v672_v62, %v668_v2  ;;  %1038 = vrot.lane.b32.xlu0 %v1034_v23, %s4575_s29 }
 0x101   : > { %v364_v26 = vpop.xlane.xlu1 %363  ;;  %v361_v31 = vpop.xlane.xlu0 %360  ;;  %v702_v50 = vsel %vm693_vm9, %v673_v25, %v701_v43 }
 0x102   : > { %v681_v35 = vrot.slane %v364_v26, %v3172_v12  ;;  %v677_v42 = vrot.slane %v361_v31, %v3175_v17 }
 0x104   : > { %v682_v0 = vsel %vm546_vm3, %v681_v35, %v677_v42 }
 0x105   : > { %v703_v53 = vsel %vm695_vm10, %v682_v0, %v702_v50  ;;  %v370_v41 = vpop.xlane.xlu1 %369  ;;  %v367_v55 = vpop.xlane.xlu0 %366 }
 0x106   : > { %708 = vst.msk [vmem:[#allocation2 + $0xb] sm:$0xff] %vm706_vm11, %v703_v53  ;;  %v463_v42 = vmul.f32 0.03125, %v370_v41  ;;  %v462_v43 = vmul.f32 0.03125, %v367_v55 }
 0x108   : > { %v748_v55 = vrot.slane %v463_v42, %v3172_v12 }
 0x109   : > { %v376_v56 = vpop.xlane.xlu1 %375  ;;  %v373_v59 = vpop.xlane.xlu0 %372 }
 0x10a   : > { %v465_v24 = vmul.f32 0.03125, %v376_v56  ;;  %v464_v25 = vmul.f32 0.03125, %v373_v59 }
 0x10c   : > { %v757_v0 = vrot.slane %v465_v24, %v3172_v12 }
 0x10d   : > { %v3276_v61 = vld [vmem:[#allocation2 + $0x8] sm:$0xff]  ;;  %v382_v62 = vpop.xlane.xlu1 %381  ;;  %v379_v2 = vpop.xlane.xlu0 %378 }
 0x10e   : > { %v923_v3 = vmul.f32 %v921_v44, %v3276_v61  ;;  %v3283_v14 = vmul.f32 %v1033_v36, %v3276_v61  ;;  %v951_v20 = vmul.f32 %v949_v54, %v3276_v61  ;;  %v467_v32 = vmul.f32 0.03125, %v382_v62 }
 0x10f   : > { %v466_v35 = vmul.f32 0.03125, %v379_v2  ;;  %v979_v44 = vmul.f32 %v977_v60, %v3276_v61  ;;  %v753_v54 = vrot.slane %v464_v25, %v3175_v17  ;;  %v1007_v41 = vmul.f32 %v1005_v13, %v3276_v61 }
 0x110   : > { %928 = vrot.lane.b32.xlu1 %v923_v3, %s4585_s24 }
 0x111   : > { %v388_v7 = vpop.xlane.xlu1 %387  ;;  %v385_v23 = vpop.xlane.xlu0 %384  ;;  %v762_v60 = vrot.slane %v466_v35, %v3175_v17  ;;  %v758_v25 = vsel %vm546_vm3, %v757_v0, %v753_v54 }
 0x112   : > { %v469_v50 = vmul.f32 0.03125, %v388_v7  ;;  %v468_v36 = vmul.f32 0.03125, %v385_v23  ;;  %v744_v7 = vrot.slane %v462_v43, %v3175_v17 }
 0x114   : > { %956 = vrot.lane.b32.xlu1 %v951_v20, %s4583_s26  ;;  %v766_v20 = vrot.slane %v467_v32, %v3172_v12  ;;  %v775_v23 = vrot.slane %v469_v50, %v3172_v12  ;;  %v771_v24 = vrot.slane %v468_v36, %v3175_v17  ;;  %v749_v36 = vsel %vm546_vm3, %v748_v55, %v744_v7 }
 0x115   : > { %v394_v26 = vpop.xlane.xlu1 %393  ;;  %v391_v31 = vpop.xlane.xlu0 %390 }
 0x116   : > { %v471_v53 = vmul.f32 0.03125, %v394_v26  ;;  %v470_v56 = vmul.f32 0.03125, %v391_v31  ;;  %v767_v50 = vsel %vm546_vm3, %v766_v20, %v762_v60  ;;  %v776_v0 = vsel %vm546_vm3, %v775_v23, %v771_v24 }
 0x118   : > { %984 = vrot.lane.b32.xlu1 %v979_v44, %s4581_s27  ;;  %v784_v26 = vrot.slane %v471_v53, %v3172_v12  ;;  %v780_v31 = vrot.slane %v470_v56, %v3175_v17  ;;  %v885_v56 = vsel %vm683_vm4, %v758_v25, %v749_v36  ;;  %v4570_v36 = vstv %s3327_s4 }
 0x119   : > { %v400_v59 = vpop.xlane.xlu1 %399  ;;  %v397_v3 = vpop.xlane.xlu0 %396 }
 0x11a   : > { %v473_v62 = vmul.f32 0.03125, %v400_v59  ;;  %v472_v2 = vmul.f32 0.03125, %v397_v3  ;;  %v785_v59 = vsel %vm546_vm3, %v784_v26, %v780_v31 }
 0x11c   : > { %1012 = vrot.lane.b32.xlu1 %v1007_v41, %s4579_s28  ;;  %v793_v13 = vrot.slane %v473_v62, %v3172_v12  ;;  %v789_v44 = vrot.slane %v472_v2, %v3175_v17  ;;  %v886_v2 = vsel %vm685_vm5, %v767_v50, %v885_v56  ;;  %v4571_v50 = vstv %s3324_s30 }
 0x11d   : > { %v406_v32 = vpop.xlane.xlu1 %405  ;;  %v403_v35 = vpop.xlane.xlu0 %402  ;;  %v887_v60 = vsel %vm687_vm6, %v776_v0, %v886_v2  ;;  %v4569_v56 = vstv %s3333_s6 }
 0x11e   : > { %v475_v42 = vmul.f32 0.03125, %v406_v32  ;;  %v474_v43 = vmul.f32 0.03125, %v403_v35  ;;  %v794_v41 = vsel %vm546_vm3, %v793_v13, %v789_v44  ;;  %v888_v7 = vsel %vm689_vm7, %v785_v59, %v887_v60 }
 0x11f   : > { %v889_v25 = vsel %vm691_vm8, %v794_v41, %v888_v7 }
 0x120   : > { %v802_v54 = vrot.slane %v475_v42, %v3172_v12  ;;  %v798_v53 = vrot.slane %v474_v43, %v3175_v17 }
 0x121   : > { %v412_v3 = vpop.xlane.xlu1 %411  ;;  %v409_v62 = vpop.xlane.xlu0 %408 }
 0x122   : > { %v477_v32 = vmul.f32 0.03125, %v412_v3  ;;  %v476_v20 = vmul.f32 0.03125, %v409_v62  ;;  %v803_v55 = vsel %vm546_vm3, %v802_v54, %v798_v53  ;;  %v4568_v53 = vstv %s3331_s5 }
 0x123   : > { %v890_v35 = vsel %vm693_vm9, %v803_v55, %v889_v25  ;;  %v908_v3 = vmul.f32 %v4571_v50, %v3216_v49  ;;  %v4574_v55 = vstv %s3337_s7 }
 0x124   : > { %v811_v23 = vrot.slane %v477_v32, %v3172_v12  ;;  %v807_v24 = vrot.slane %v476_v20, %v3175_v17 }
 0x125   : > { %v418_v26 = vpop.xlane.xlu1 %417  ;;  %v415_v31 = vpop.xlane.xlu0 %414 }
 0x126   : > { %v812_v13 = vsel %vm546_vm3, %v811_v23, %v807_v24 }
 0x127   : > { %v891_v44 = vsel %vm695_vm10, %v812_v13, %v890_v35  ;;  %v4573_v13 = vstv %s3343_s8 }
 0x128   : > { %901 = vst.msk [vmem:[#allocation3 + $0x3] sm:$0xff] %vm706_vm11, %v891_v44  ;;  %v479_v44 = vmul.f32 0.03125, %v418_v26 }
 0x129   : > { %v424_v42 = vpop.xlane.xlu1 %423  ;;  %v421_v43 = vpop.xlane.xlu0 %420 }
 0x12a   : > { %v481_v7 = vmul.f32 0.03125, %v424_v42  ;;  %v480_v23 = vmul.f32 0.03125, %v421_v43 }
 0x12c   : > { %v825_v43 = vrot.slane %v480_v23, %v3175_v17  ;;  %v820_v23 = vrot.slane %v479_v44, %v3172_v12 }
 0x12d   : > { %v430_v0 = vpop.xlane.xlu1 %429  ;;  %v427_v54 = vpop.xlane.xlu0 %426 }
 0x12f   : > { %v3345_v59 = vld [vmem:[#allocation3] sm:$0xff] }
 0x130   : > { %v915_v62 = vmul.f32 %v4570_v36, %v3345_v59  ;;  %v963_v32 = vmul.f32 %v4568_v53, %v3345_v59  ;;  %v935_v20 = vmul.f32 %v4569_v56, %v3345_v59  ;;  %v991_v35 = vmul.f32 %v4574_v55, %v3345_v59 }
 0x131   : > { %v436_v2 = vpop.xlane.xlu1 %435  ;;  %v433_v41 = vpop.xlane.xlu0 %432  ;;  %v1019_v26 = vmul.f32 %v4573_v13, %v3345_v59 }
 0x132   : > { %v3359_v60 = vadd.f32 %v915_v62, %v908_v3  ;;  %967 = vrot.lane.b32.xlu0 %v963_v32, %s4583_s26  ;;  %939 = vrot.lane.b32.xlu1 %v935_v20, %s4585_s24  ;;  %v483_v3 = vmul.f32 0.03125, %v430_v0  ;;  %v482_v62 = vmul.f32 0.03125, %v427_v54  ;;  %v478_v32 = vmul.f32 0.03125, %v415_v31 }
 0x133   : > { %v829_v20 = vrot.slane %v481_v7, %v3172_v12  ;;  %v485_v53 = vmul.f32 0.03125, %v436_v2  ;;  %v484_v42 = vmul.f32 0.03125, %v433_v41  ;;  %v1046_v31 = vstv %s3362_s9  ;;  %s4683_s9 = smov 122  }
 0x134   : > { %v838_v7 = vrot.slane %v483_v3, %v3172_v12  ;;  %v834_v2 = vrot.slane %v482_v62, %v3175_v17  ;;  %v1061_v41 = vstv %s3366_s10  ;;  %v1047_v62 = vmul.f32 %v1046_v31, %v3345_v59  ;;  %s3537_s10 = sld [smem:[#allocation4 + $0xf]] }
 0x135   : > { %v442_v24 = vpop.xlane.xlu1 %441  ;;  %v439_v25 = vpop.xlane.xlu0 %438 }
 0x136   : > { %995 = vrot.lane.b32.xlu0 %v991_v35, %s4581_s27  ;;  %v487_v56 = vmul.f32 0.03125, %v442_v24  ;;  %v486_v36 = vmul.f32 0.03125, %v439_v25  ;;  %v816_v24 = vrot.slane %v478_v32, %v3175_v17  ;;  %v847_v25 = vrot.slane %v485_v53, %v3172_v12 }
 0x137   : > { %v843_v35 = vrot.slane %v484_v42, %v3175_v17 }
 0x138   : > { %v852_v13 = vrot.slane %v486_v36, %v3175_v17  ;;  %v821_v36 = vsel %vm546_vm3, %v820_v23, %v816_v24 }
 0x139   : > { %v448_v50 = vpop.xlane.xlu1 %447  ;;  %v445_v48 = vpop.xlane.xlu0 %444 }
 0x13a   : > { %v489_v0 = vmul.f32 0.03125, %v448_v50  ;;  %v488_v54 = vmul.f32 0.03125, %v445_v48  ;;  %1023 = vrot.lane.b32.xlu0 %v1019_v26, %s4579_s28  ;;  %v830_v50 = vsel %vm546_vm3, %v829_v20, %v825_v43  ;;  %v856_v48 = vrot.slane %v487_v56, %v3172_v12  ;;  %s3465_s28 = sld [smem:[#allocation4 + $0x3b]] }
 0x13b   : > { %v839_v20 = vsel %vm546_vm3, %v838_v7, %v834_v2  ;;  %v848_v56 = vsel %vm546_vm3, %v847_v25, %v843_v35  ;;  %v1062_v7 = vmul.f32 %v1061_v41, %v3216_v49  ;;  %v1074_v2 = vstv %s3378_s11  ;;  %s3550_s11 = sld [smem:[#allocation4 + $0x40]] }
 0x13c   : > { %v865_v44 = vrot.slane %v489_v0, %v3172_v12  ;;  %v861_v32 = vrot.slane %v488_v54, %v3175_v17  ;;  %v892_v0 = vsel %vm683_vm4, %v830_v50, %v821_v36  ;;  %v857_v54 = vsel %vm546_vm3, %v856_v48, %v852_v13 }
 0x13d   : > { %v454_v3 = vpop.xlane.xlu1 %453  ;;  %v451_v55 = vpop.xlane.xlu0 %450  ;;  %v1105_v36 = vstv %s3397_s17  ;;  %s3563_s17 = sld [smem:[#allocation4 + $0x10]] }
 0x13e   : > { %v491_v53 = vmul.f32 0.03125, %v454_v3  ;;  %v490_v26 = vmul.f32 0.03125, %v451_v55  ;;  %1051 = vrot.lane.b32.xlu0 %v1047_v62, %s4575_s29  ;;  %v893_v62 = vsel %vm685_vm5, %v839_v20, %v892_v0  ;;  %v866_v23 = vsel %vm546_vm3, %v865_v44, %v861_v32  ;;  %s3441_s29 = sld [smem:[#allocation4 + $0x3a]] }
 0x13f   : > { %v894_v35 = vsel %vm687_vm6, %v848_v56, %v893_v62  ;;  %v1075_v32 = vmul.f32 %v1074_v2, %v3345_v59  ;;  %v3438_v59 = vld [vmem:[#allocation3 + $0x1] sm:$0xff]  ;;  %v1118_v56 = vstv %s3413_s19  ;;  %v4677_v62 = vstv %s3333_s6  ;;  %s3495_s6 = sld [smem:[#allocation4 + $0xc]]  ;;  %s4684_s19 = smov 126  }
 0x140   : > { %v874_v42 = vrot.slane %v491_v53, %v3172_v12  ;;  %v870_v43 = vrot.slane %v490_v26, %v3175_v17  ;;  %v895_v49 = vsel %vm689_vm7, %v857_v54, %v894_v35  ;;  %v3425_v53 = vld [vmem:[#allocation2 + $0x1] sm:$0xff]  ;;  %v4675_v54 = vstv %s3324_s30  ;;  %s3475_s30 = sld [smem:[#allocation4 + $0xb]] }
 0x141   : > { %v460_v3 = vpop.xlane.xlu1 %459  ;;  %v457_v55 = vpop.xlane.xlu0 %456  ;;  %v896_v44 = vsel %vm691_vm8, %v866_v23, %v895_v49 }
 0x142   : > { %v493_v24 = vmul.f32 0.03125, %v460_v3  ;;  %v492_v25 = vmul.f32 0.03125, %v457_v55  ;;  %v875_v13 = vsel %vm546_vm3, %v874_v42, %v870_v43  ;;  %1066 = vrot.lane.b32.xlu0 %v1062_v7, %s4577_s20  ;;  %v1119_v42 = vmul.f32 %v1118_v56, %v3438_v59 }
 0x143   : > { %v897_v26 = vsel %vm693_vm9, %v875_v13, %v896_v44  ;;  %v1133_v43 = vstv %s3430_s25  ;;  %v909_v3 = vmul.f32 %v4675_v54, %v3276_v61  ;;  %v4676_v55 = vstv %s3327_s4  ;;  %s3485_s4 = sld [smem:[#allocation4 + $0x3c]]  ;;  %s3587_s25 = sld [smem:[#allocation4 + $0x11]] }
 0x144   : > { %v883_v50 = vrot.slane %v493_v24, %v3172_v12  ;;  %v879_v48 = vrot.slane %v492_v25, %v3175_v17  ;;  %v1106_v17 = vmul.f32 %v1105_v36, %v3425_v53  ;;  %v1134_v24 = vmul.f32 %v1133_v43, %v3425_v53 }
 0x145   : > { %v1146_v35 = vstv %s3441_s29  ;;  %v4678_v13 = vstv %s3331_s5  ;;  %v4679_v44 = vstv %s3337_s7  ;;  %s4681_s5 = smov 124   ;;  %s4682_s7 = smov 123  }
 0x146   : > { %v884_v20 = vsel %vm546_vm3, %v883_v50, %v879_v48  ;;  %1079 = vrot.lane.b32.xlu0 %v1075_v32, %s4577_s20  ;;  %s3448_s20 = sld [smem:[#allocation4 + $0xa]]  ;;  %v1147_v50 = vmul.f32 %v1146_v35, %v3438_v59  ;;  %v1189_v54 = vstv %s3475_s30  ;;  %s4686_s29 = smov 125  }
 0x147   : > { %v898_v12 = vsel %vm695_vm10, %v884_v20, %v897_v26  ;;  %v1174_v20 = vstv %s3465_s28  ;;  %s3620_s28 = sld [smem:[#allocation4 + $0x43]] }
 0x148   : > { %902 = vst.msk [vmem:[#allocation3 + $0xb] sm:$0xff] %vm706_vm11, %v898_v12  ;;  %v4680_v12 = vstv %s3343_s8  ;;  %s3504_s8 = sld [smem:[#allocation4 + $0x3d]]  ;;  %s3631_s30 = sld [smem:[#allocation4 + $0x13]] }
 0x14a   : > { %1110 = vrot.lane.b32.xlu0 %v1106_v17, %s4585_s24 }
 0x14c   : > { %v1161_v48 = vstv %s3448_s20  ;;  %s3609_s20 = sld [smem:[#allocation4 + $0x12]] }
 0x14d   : > { %v1162_v26 = vmul.f32 %v1161_v48, %v3425_v53 }
 0x14e   : > { %1123 = vrot.lane.b32.xlu0 %v1119_v42, %s4585_s24  ;;  %v1175_v42 = vmul.f32 %v1174_v20, %v3438_v59 }
 0x14f   : > { %v913_v0 = vld [vmem:[#allocation3 + $0x8] sm:$0xff] }
 0x150   : > { %v916_v7 = vmul.f32 %v4676_v55, %v913_v0  ;;  %v936_v23 = vmul.f32 %v4677_v62, %v913_v0  ;;  %v964_v49 = vmul.f32 %v4678_v13, %v913_v0  ;;  %v992_v32 = vmul.f32 %v4679_v44, %v913_v0  ;;  %v3543_v44 = vld [vmem:[#allocation3 + $0x9] sm:$0xff] }
 0x151   : > { %v1020_v17 = vmul.f32 %v4680_v12, %v913_v0  ;;  %v1202_v55 = vstv %s3485_s4  ;;  %v1076_v13 = vmul.f32 %v1074_v2, %v913_v0  ;;  %v1289_v12 = vstv %s3537_s10  ;;  %s3644_s4 = sld [smem:[#allocation4 + $0x44]]  ;;  %s3712_s10 = sld [smem:[#allocation4 + $0x17]] }
 0x152   : > { %v3461_v25 = vadd.f32 %v916_v7, %v909_v3  ;;  %941 = vrot.lane.b32.xlu1 %v936_v23, %s4585_s24  ;;  %1138 = vrot.lane.b32.xlu0 %v1134_v24, %s4583_s26  ;;  %v1190_v3 = vmul.f32 %v1189_v54, %v3425_v53  ;;  %v1048_v7 = vmul.f32 %v1046_v31, %v913_v0  ;;  %v1217_v23 = vstv %s3495_s6  ;;  %s3657_s6 = sld [smem:[#allocation4 + $0x14]] }
 0x153   : > { %v1203_v62 = vmul.f32 %v1202_v55, %v3438_v59  ;;  %v1218_v24 = vmul.f32 %v1217_v23, %v3425_v53  ;;  %v1230_v31 = vstv %s3504_s8  ;;  %s3668_s8 = sld [smem:[#allocation4 + $0x45]] }
 0x156   : > { %969 = vrot.lane.b32.xlu1 %v964_v49, %s4583_s26  ;;  %1151 = vrot.lane.b32.xlu0 %v1147_v50, %s4583_s26  ;;  %s3525_s26 = sld [smem:[#allocation4 + $0x3e]]  ;;  %v3530_v49 = vld [vmem:[#allocation2 + $0x9] sm:$0xff] }
 0x157   : > { %v1107_v50 = vmul.f32 %v1105_v36, %v3530_v49 }
 0x15a   : > { %997 = vrot.lane.b32.xlu1 %v992_v32, %s4581_s27  ;;  %1166 = vrot.lane.b32.xlu0 %v1162_v26, %s4581_s27  ;;  %v1120_v32 = vmul.f32 %v1118_v56, %v3543_v44  ;;  %v3559_v26 = vld [vmem:[#allocation2 + $0x2] sm:$0xff] }
 0x15b   : > { %v1290_v56 = vmul.f32 %v1289_v12, %v3559_v26 }
 0x15c   : > { %v1258_v0 = vstv %s3525_s26  ;;  %s3698_s26 = sld [smem:[#allocation4 + $0x47]] }
 0x15d   : > { %v1259_v36 = vmul.f32 %v1258_v0, %v3438_v59 }
 0x15e   : > { %1025 = vrot.lane.b32.xlu1 %v1020_v17, %s4681_s5  ;;  %1179 = vrot.lane.b32.xlu0 %v1175_v42, %s4581_s27  ;;  %s3514_s27 = sld [smem:[#allocation4 + $0xd]]  ;;  %v1135_v17 = vmul.f32 %v1133_v43, %v3530_v49  ;;  %v3572_v42 = vld [vmem:[#allocation3 + $0x2] sm:$0xff] }
 0x162   : > { %1040 = vrot.lane.b32.xlu1 %v3283_v14, %s4682_s7  ;;  %1194 = vrot.lane.b32.xlu0 %v1190_v3, %s4681_s5  ;;  %v1063_v14 = vmul.f32 %v1061_v41, %v3276_v61  ;;  %v1231_v61 = vmul.f32 %v1230_v31, %v3438_v59  ;;  %v1302_v3 = vstv %s3550_s11  ;;  %s3725_s11 = sld [smem:[#allocation4 + $0x48]] }
 0x163   : > { %v1303_v43 = vmul.f32 %v1302_v3, %v3572_v42 }
 0x164   : > { %v1245_v41 = vstv %s3514_s27  ;;  %s3683_s27 = sld [smem:[#allocation4 + $0x16]] }
 0x165   : > { %v1246_v2 = vmul.f32 %v1245_v41, %v3425_v53 }
 0x166   : > { %1053 = vrot.lane.b32.xlu1 %v1048_v7, %s4682_s7  ;;  %1207 = vrot.lane.b32.xlu0 %v1203_v62, %s4681_s5  ;;  %v1148_v7 = vmul.f32 %v1146_v35, %v3543_v44  ;;  %v1317_v62 = vstv %s3563_s17  ;;  %s3736_s17 = sld [smem:[#allocation4 + $0x18]] }
 0x16a   : > { %1068 = vrot.lane.b32.xlu1 %v1063_v14, %s4683_s9  ;;  %1222 = vrot.lane.b32.xlu0 %v1218_v24, %s4682_s7  ;;  %v1163_v14 = vmul.f32 %v1161_v48, %v3530_v49  ;;  %v1318_v24 = vmul.f32 %v1317_v62, %v3559_v26  ;;  %v4593_v48 = vstv %s3587_s25 }
 0x16e   : > { %1081 = vrot.lane.b32.xlu1 %v1076_v13, %s4683_s9  ;;  %1235 = vrot.lane.b32.xlu0 %v1231_v61, %s4682_s7  ;;  %v1176_v13 = vmul.f32 %v1174_v20, %v3543_v44  ;;  %v1346_v20 = vmul.f32 %v4593_v48, %v3559_v26  ;;  %v1473_v48 = vstv %s3683_s27  ;;  %s3869_s27 = sld [smem:[#allocation4 + $0x1e]] }
 0x172   : > { %1112 = vrot.lane.b32.xlu1 %v1107_v50, %s4585_s24  ;;  %1250 = vrot.lane.b32.xlu0 %v1246_v2, %s4683_s9  ;;  %v1191_v50 = vmul.f32 %v1189_v54, %v3530_v49  ;;  %v927_v2 = vpop.permute.xlu0 %926 }
 0x176   : > { %1125 = vrot.lane.b32.xlu1 %v1120_v32, %s4585_s24  ;;  %1263 = vrot.lane.b32.xlu0 %v1259_v36, %s4683_s9  ;;  %s3576_s24 = sld [smem:[#allocation4 + $0x41]]  ;;  %v4592_v32 = vstv %s3598_s1  ;;  %v1204_v36 = vmul.f32 %v1202_v55, %v3543_v44  ;;  %v1219_v55 = vmul.f32 %v1217_v23, %v3530_v49 }
 0x177   : > { %v1359_v54 = vmul.f32 %v4592_v32, %v3572_v42 }
 0x17a   : > { %1140 = vrot.lane.b32.xlu1 %v1135_v17, %s4684_s19  ;;  %1294 = vrot.lane.b32.xlu0 %v1290_v56, %s4685_s0  ;;  %v4590_v17 = vstv %s3609_s20  ;;  %v955_v56 = vpop.permute.xlu0 %954 }
 0x17c   : > { %v1330_v35 = vstv %s3576_s24  ;;  %s3744_s24 = sld [smem:[#allocation4 + $0x38]] }
 0x17d   : > { %v1331_v61 = vmul.f32 %v1330_v35, %v3572_v42 }
 0x17e   : > { %1153 = vrot.lane.b32.xlu1 %v1148_v7, %s4684_s19  ;;  %1307 = vrot.lane.b32.xlu0 %v1303_v43, %s4685_s0  ;;  %v1374_v43 = vmul.f32 %v4590_v17, %v3559_v26 }
 0x182   : > { %1168 = vrot.lane.b32.xlu1 %v1163_v14, %s4686_s29  ;;  %1322 = vrot.lane.b32.xlu0 %v1318_v24, %s4684_s19  ;;  %v3633_v7 = vpop.permute.xlu1 %928  ;;  %v4589_v14 = vstv %s3620_s28  ;;  %v1232_v24 = vmul.f32 %v1230_v31, %v3543_v44  ;;  %v1247_v31 = vmul.f32 %v1245_v41, %v3530_v49 }
 0x183   : > { %v1387_v23 = vmul.f32 %v4589_v14, %v3572_v42 }
 0x186   : > { %1181 = vrot.lane.b32.xlu1 %v1176_v13, %s4686_s29  ;;  %1335 = vrot.lane.b32.xlu0 %v1331_v61, %s4684_s19  ;;  %v983_v13 = vpop.permute.xlu0 %982  ;;  %v3650_v61 = vpop.permute.xlu1 %956 }
 0x18a   : > { %1196 = vrot.lane.b32.xlu1 %v1191_v50, %s4681_s5  ;;  %1350 = vrot.lane.b32.xlu0 %v1346_v20, %s4686_s29  ;;  %v4587_v50 = vstv %s3631_s30 }
 0x18b   : > { %v1402_v20 = vmul.f32 %v4587_v50, %v3559_v26 }
 0x18e   : > { %1209 = vrot.lane.b32.xlu1 %v1204_v36, %s4681_s5  ;;  %1363 = vrot.lane.b32.xlu0 %v1359_v54, %s4686_s29  ;;  %v4588_v36 = vstv %s3644_s4  ;;  %v1011_v54 = vpop.permute.xlu0 %1010 }
 0x18f   : > { %v1415_v41 = vmul.f32 %v4588_v36, %v3572_v42 }
 0x192   : > { %1224 = vrot.lane.b32.xlu1 %v1219_v55, %s4682_s7  ;;  %1378 = vrot.lane.b32.xlu0 %v1374_v43, %s4681_s5  ;;  %v3670_v55 = vpop.permute.xlu1 %984  ;;  %v1260_v43 = vmul.f32 %v1258_v0, %v3543_v44  ;;  %v1039_v0 = vpop.permute.xlu0 %1038 }
 0x196   : > { %1237 = vrot.lane.b32.xlu1 %v1232_v24, %s4682_s7  ;;  %1391 = vrot.lane.b32.xlu0 %v1387_v23, %s4681_s5  ;;  %v3676_v24 = vld [vmem:[#allocation2 + $0xa] sm:$0xff]  ;;  %v4591_v23 = vstv %s3657_s6  ;;  %v3691_v50 = vpop.permute.xlu1 %1012 }
 0x197   : > { %v1430_v36 = vmul.f32 %v4591_v23, %v3559_v26 }
 0x19a   : > { %1252 = vrot.lane.b32.xlu1 %v1247_v31, %s4683_s9  ;;  %1406 = vrot.lane.b32.xlu0 %v1402_v20, %s4682_s7  ;;  %v1291_v31 = vmul.f32 %v1289_v12, %v3676_v24  ;;  %v3689_v20 = vld [vmem:[#allocation3 + $0xa] sm:$0xff]  ;;  %v932_v12 = vadd.f32 %v927_v2, %v3359_v60 }
 0x19e   : > { %1265 = vrot.lane.b32.xlu1 %v1260_v43, %s4683_s9  ;;  %1419 = vrot.lane.b32.xlu0 %v1415_v41, %s4682_s7  ;;  %v1442_v43 = vstv %s3668_s8  ;;  %v1304_v41 = vmul.f32 %v1302_v3, %v3689_v20  ;;  %v1319_v3 = vmul.f32 %v1317_v62, %v3676_v24  ;;  %v1332_v62 = vmul.f32 %v1330_v35, %v3689_v20  ;;  %s3855_s8 = sld [smem:[#allocation4 + $0x4e]] }
 0x19f   : > { %v1443_v23 = vmul.f32 %v1442_v43, %v3572_v42  ;;  %v4687_v35 = vstv %s3587_s25  ;;  %s3762_s25 = sld [smem:[#allocation4 + $0x19]] }
 0x1a2   : > { %1296 = vrot.lane.b32.xlu1 %v1291_v31, %s4685_s0  ;;  %1434 = vrot.lane.b32.xlu0 %v1430_v36, %s4683_s9  ;;  %v3709_v31 = vld [vmem:[#allocation2 + $0x3] sm:$0xff] }
 0x1a4   : > { %v940_v14 = vpop.permute.xlu1 %939  ;;  %v968_v17 = vpop.permute.xlu0 %967 }
 0x1a5   : > { %v945_v32 = vadd.f32 %v940_v14, %v932_v12  ;;  %v1474_v14 = vmul.f32 %v1473_v48, %v3709_v31  ;;  %v3722_v12 = vld [vmem:[#allocation3 + $0x3] sm:$0xff] }
 0x1a6   : > { %1309 = vrot.lane.b32.xlu1 %v1304_v41, %s4685_s0  ;;  %1447 = vrot.lane.b32.xlu0 %v1443_v23, %s4683_s9  ;;  %v1486_v41 = vstv %s3698_s26  ;;  %s3882_s26 = sld [smem:[#allocation4 + $0x4f]] }
 0x1a7   : > { %v960_v60 = vadd.f32 %v955_v56, %v945_v32 }
 0x1a8   : > { %v996_v2 = vpop.permute.xlu0 %995 }
 0x1a9   : > { %v973_v36 = vadd.f32 %v968_v17, %v960_v60  ;;  %v1487_v17 = vmul.f32 %v1486_v41, %v3722_v12  ;;  %v4594_v60 = vstv %s3712_s10 }
 0x1aa   : > { %1324 = vrot.lane.b32.xlu1 %v1319_v3, %s4684_s19  ;;  %1478 = vrot.lane.b32.xlu0 %v1474_v14, %s4685_s0  ;;  %v1347_v3 = vmul.f32 %v4687_v35, %v3676_v24  ;;  %v1502_v14 = vmul.f32 %v4594_v60, %v3709_v31  ;;  %v4595_v35 = vstv %s3736_s17 }
 0x1ab   : > { %v988_v32 = vadd.f32 %v983_v13, %v973_v36 }
 0x1ac   : > { %v1024_v56 = vpop.permute.xlu0 %1023 }
 0x1ad   : > { %v1001_v23 = vadd.f32 %v996_v2, %v988_v32  ;;  %v4596_v32 = vstv %s3725_s11 }
 0x1ae   : > { %1337 = vrot.lane.b32.xlu1 %v1332_v62, %s4684_s19  ;;  %1491 = vrot.lane.b32.xlu0 %v1487_v17, %s4685_s0  ;;  %v4688_v62 = vstv %s3598_s1  ;;  %s3778_s1 = sld [smem:[#allocation4 + $0x4a]] }
 0x1af   : > { %v1016_v13 = vadd.f32 %v1011_v54, %v1001_v23  ;;  %v1360_v17 = vmul.f32 %v4688_v62, %v3689_v20  ;;  %v4603_v62 = vstv %s3744_s24 }
 0x1b0   : > { %v1052_v2 = vpop.permute.xlu0 %1051 }
 0x1b1   : > { %v1029_v36 = vadd.f32 %v1024_v56, %v1016_v13  ;;  %v1515_v56 = vmul.f32 %v4596_v32, %v3722_v12 }
 0x1b2   : > { %1352 = vrot.lane.b32.xlu1 %v1347_v3, %s4686_s29  ;;  %1506 = vrot.lane.b32.xlu0 %v1502_v14, %s4684_s19  ;;  %v4605_v3 = vstv %s3738_s2  ;;  %v4689_v14 = vstv %s3609_s20  ;;  %s3792_s20 = sld [smem:[#allocation4 + $0x1a]] }
 0x1b3   : > { %v1044_v54 = vadd.f32 %v1039_v0, %v1029_v36  ;;  %v1375_v36 = vmul.f32 %v4689_v14, %v3676_v24  ;;  %v4690_v14 = vstv %s3620_s28  ;;  %s3803_s28 = sld [smem:[#allocation4 + $0x4b]] }
 0x1b4   : > { %v1067_v23 = vpop.permute.xlu0 %1066 }
 0x1b5   : > { %v1057_v13 = vadd.f32 %v1052_v2, %v1044_v54  ;;  %v1530_v2 = vmul.f32 %v4595_v35, %v3709_v31  ;;  %v1092_v54 = vmul.f32 %v4605_v3, %v3425_v53  ;;  %v1388_v35 = vmul.f32 %v4690_v14, %v3689_v20 }
 0x1b6   : > { %1365 = vrot.lane.b32.xlu1 %v1360_v17, %s4686_s29  ;;  %1519 = vrot.lane.b32.xlu0 %v1515_v56, %s4684_s19  ;;  %v4601_v56 = vstv %s3751_s21  ;;  %v4618_v3 = vstv %s3855_s8 }
 0x1b7   : > { %v1072_v0 = vadd.f32 %v1067_v23, %v1057_v13  ;;  %v1099_v23 = vmul.f32 %v4603_v62, %v3438_v59  ;;  %v1543_v53 = vmul.f32 %v4601_v56, %v3722_v12  ;;  %v4691_v59 = vstv %s3631_s30  ;;  %s3816_s30 = sld [smem:[#allocation4 + $0x1b]] }
 0x1b8   : > { %v1080_v60 = vpop.permute.xlu0 %1079 }
 0x1b9   : > { %v1085_v17 = vadd.f32 %v1080_v60, %v1072_v0  ;;  %v4597_v0 = vstv %s3762_s25 }
 0x1ba   : > { %1380 = vrot.lane.b32.xlu1 %v1375_v36, %s4681_s5  ;;  %1534 = vrot.lane.b32.xlu0 %v1530_v2, %s4686_s29  ;;  %v1403_v36 = vmul.f32 %v4691_v59, %v3676_v24 }
 0x1bb   : > { %v1094_v13 = vadd.f32 %v1092_v54, %v1085_v17  ;;  %v1558_v54 = vmul.f32 %v4597_v0, %v3709_v31  ;;  %v4598_v17 = vstv %s3778_s1  ;;  %v4600_v0 = vstv %s3792_s20 }
 0x1bc   : > { %v1111_v32 = vpop.permute.xlu0 %1110 }
 0x1bd   : > { %v1101_v60 = vadd.f32 %v1099_v23, %v1094_v13  ;;  %v4692_v13 = vstv %s3644_s4  ;;  %s3828_s4 = sld [smem:[#allocation4 + $0x4c]] }
 0x1be   : > { %1393 = vrot.lane.b32.xlu1 %v1388_v35, %s4681_s5  ;;  %1547 = vrot.lane.b32.xlu0 %v1543_v53, %s4686_s29  ;;  %v933_v35 = vadd.f32 %v3633_v7, %v3461_v25  ;;  %v1416_v14 = vmul.f32 %v4692_v13, %v3689_v20 }
 0x1c0   : > { %v1124_v2 = vpop.permute.xlu0 %1123 }
 0x1c2   : > { %1408 = vrot.lane.b32.xlu1 %v1403_v36, %s4682_s7  ;;  %1562 = vrot.lane.b32.xlu0 %v1558_v54, %s4681_s5  ;;  %v1571_v36 = vmul.f32 %v4598_v17, %v3722_v12  ;;  %v4693_v54 = vstv %s3657_s6  ;;  %v1586_v17 = vmul.f32 %v4600_v0, %v3709_v31  ;;  %s3842_s6 = sld [smem:[#allocation4 + $0x1d]]  ;;  %v3851_v0 = vld [vmem:[#allocation3 + $0xb] sm:$0xff] }
 0x1c3   : > { %v4604_v56 = vstv %s3828_s4 }
 0x1c4   : > { %v942_v23 = vpop.permute.xlu1 %941  ;;  %v1139_v59 = vpop.permute.xlu0 %1138 }
 0x1c5   : > { %v946_v53 = vadd.f32 %v942_v23, %v933_v35  ;;  %v1431_v35 = vmul.f32 %v4693_v54, %v3676_v24  ;;  %v3838_v54 = vld [vmem:[#allocation2 + $0xb] sm:$0xff] }
 0x1c6   : > { %1421 = vrot.lane.b32.xlu1 %v1416_v14, %s4682_s7  ;;  %1575 = vrot.lane.b32.xlu0 %v1571_v36, %s4681_s5  ;;  %v4599_v14 = vstv %s3803_s28 }
 0x1c7   : > { %v961_v25 = vadd.f32 %v3650_v61, %v946_v53  ;;  %v1444_v53 = vmul.f32 %v1442_v43, %v3689_v20 }
 0x1c8   : > { %v970_v7 = vpop.permute.xlu1 %969  ;;  %v1152_v13 = vpop.permute.xlu0 %1151 }
 0x1c9   : > { %v974_v23 = vadd.f32 %v970_v7, %v961_v25  ;;  %v1599_v7 = vmul.f32 %v4599_v14, %v3722_v12 }
 0x1ca   : > { %1436 = vrot.lane.b32.xlu1 %v1431_v35, %s4683_s9  ;;  %1590 = vrot.lane.b32.xlu0 %v1586_v17, %s4682_s7  ;;  %v4602_v35 = vstv %s3816_s30 }
 0x1cb   : > { %v989_v36 = vadd.f32 %v3670_v55, %v974_v23  ;;  %v1475_v55 = vmul.f32 %v1473_v48, %v3838_v54  ;;  %v1614_v14 = vmul.f32 %v4602_v35, %v3709_v31  ;;  %v1488_v48 = vmul.f32 %v1486_v41, %v3851_v0 }
 0x1cc   : > { %v998_v61 = vpop.permute.xlu1 %997  ;;  %v1167_v25 = vpop.permute.xlu0 %1166  ;;  %v1627_v35 = vmul.f32 %v4604_v56, %v3722_v12 }
 0x1cd   : > { %v1002_v43 = vadd.f32 %v998_v61, %v989_v36 }
 0x1ce   : > { %1449 = vrot.lane.b32.xlu1 %v1444_v53, %s4683_s9  ;;  %1603 = vrot.lane.b32.xlu0 %v1599_v7, %s4682_s7  ;;  %v1116_v53 = vadd.f32 %v1111_v32, %v1101_v60  ;;  %v3866_v60 = vld [vmem:[#allocation2 + $0x4] sm:$0xff] }
 0x1cf   : > { %v1017_v61 = vadd.f32 %v3691_v50, %v1002_v43  ;;  %v4694_v50 = vstv %s3712_s10  ;;  %s3893_s10 = sld [smem:[#allocation4 + $0x1f]] }
 0x1d0   : > { %v1026_v17 = vpop.permute.xlu1 %1025  ;;  %v1180_v23 = vpop.permute.xlu0 %1179  ;;  %v1129_v32 = vadd.f32 %v1124_v2, %v1116_v53  ;;  %v1503_v43 = vmul.f32 %v4694_v50, %v3838_v54 }
 0x1d1   : > { %v1030_v62 = vadd.f32 %v1026_v17, %v1017_v61  ;;  %v4695_v61 = vstv %s3725_s11  ;;  %s3904_s11 = sld [smem:[#allocation4 + $0x3f]] }
 0x1d2   : > { %1480 = vrot.lane.b32.xlu1 %v1475_v55, %s4685_s0  ;;  %1618 = vrot.lane.b32.xlu0 %v1614_v14, %s4683_s9  ;;  %v4606_v55 = vstv %s3842_s6  ;;  %v1144_v14 = vadd.f32 %v1139_v59, %v1129_v32  ;;  %v1516_v32 = vmul.f32 %v4695_v61, %v3851_v0 }
 0x1d3   : > { %v1658_v2 = vmul.f32 %v4606_v55, %v3866_v60 }
 0x1d4   : > { %v1041_v7 = vpop.permute.xlu1 %1040  ;;  %v1195_v36 = vpop.permute.xlu0 %1194  ;;  %v1157_v53 = vadd.f32 %v1152_v13, %v1144_v14 }
 0x1d5   : > { %v1045_v59 = vadd.f32 %v1041_v7, %v1030_v62  ;;  %v4616_v62 = vstv %s3869_s27 }
 0x1d6   : > { %1493 = vrot.lane.b32.xlu1 %v1488_v48, %s4685_s0  ;;  %1631 = vrot.lane.b32.xlu0 %v1627_v35, %s4683_s9  ;;  %v3879_v48 = vld [vmem:[#allocation3 + $0x4] sm:$0xff]  ;;  %v1172_v35 = vadd.f32 %v1167_v25, %v1157_v53  ;;  %v1686_v61 = vmul.f32 %v4616_v62, %v3866_v60 }
 0x1d7   : > { %v1671_v13 = vmul.f32 %v4618_v3, %v3879_v48  ;;  %v4010_v3 = vld [vmem:[#allocation3 + $0xc] sm:$0xff] }
 0x1d8   : > { %v1054_v41 = vpop.permute.xlu1 %1053  ;;  %v1208_v56 = vpop.permute.xlu0 %1207  ;;  %v1185_v14 = vadd.f32 %v1180_v23, %v1172_v35  ;;  %v4697_v23 = vstv %s3738_s2  ;;  %s3925_s2 = sld [smem:[#allocation4 + $0x20]] }
 0x1d9   : > { %v1058_v50 = vadd.f32 %v1054_v41, %v1045_v59  ;;  %v1093_v53 = vmul.f32 %v4697_v23, %v3530_v49 }
 0x1da   : > { %1508 = vrot.lane.b32.xlu1 %v1503_v43, %s4684_s19  ;;  %1662 = vrot.lane.b32.xlu0 %v1658_v2, %s4685_s0  ;;  %v1200_v7 = vadd.f32 %v1195_v36, %v1185_v14  ;;  %v4696_v43 = vstv %s3736_s17  ;;  %v4614_v36 = vstv %s3882_s26  ;;  %s3911_s17 = sld [smem:[#allocation4 + $0x50]] }
 0x1db   : > { %v1531_v2 = vmul.f32 %v4696_v43, %v3838_v54  ;;  %v1699_v43 = vmul.f32 %v4614_v36, %v3879_v48 }
 0x1dc   : > { %v1069_v17 = vpop.permute.xlu1 %1068  ;;  %v1223_v55 = vpop.permute.xlu0 %1222 }
 0x1dd   : > { %v1073_v25 = vadd.f32 %v1069_v17, %v1058_v50  ;;  %v1213_v17 = vadd.f32 %v1208_v56, %v1200_v7 }
 0x1de   : > { %1521 = vrot.lane.b32.xlu1 %v1516_v32, %s4684_s19  ;;  %1675 = vrot.lane.b32.xlu0 %v1671_v13, %s4685_s0  ;;  %v4698_v32 = vstv %s3744_s24  ;;  %s3955_s24 = sld [smem:[#allocation4 + $0x21]] }
 0x1df   : > { %v1100_v50 = vmul.f32 %v4698_v32, %v3543_v44  ;;  %v1228_v13 = vadd.f32 %v1223_v55, %v1213_v17  ;;  %v4613_v44 = vstv %s3893_s10  ;;  %v4611_v55 = vstv %s3895_s14 }
 0x1e0   : > { %v1082_v41 = vpop.permute.xlu1 %1081  ;;  %v1236_v35 = vpop.permute.xlu0 %1235  ;;  %v4610_v17 = vstv %s3904_s11 }
 0x1e1   : > { %v1086_v59 = vadd.f32 %v1082_v41, %v1073_v25  ;;  %v4699_v25 = vstv %s3751_s21  ;;  %s3941_s21 = sld [smem:[#allocation4 + $0x51]] }
 0x1e2   : > { %1536 = vrot.lane.b32.xlu1 %v1531_v2, %s4686_s29  ;;  %1690 = vrot.lane.b32.xlu0 %v1686_v61, %s4684_s19  ;;  %v1544_v56 = vmul.f32 %v4699_v25, %v3851_v0  ;;  %v1241_v2 = vadd.f32 %v1236_v35, %v1228_v13  ;;  %v1714_v35 = vmul.f32 %v4613_v44, %v3866_v60  ;;  %v4609_v13 = vstv %s3911_s17 }
 0x1e3   : > { %v1095_v49 = vadd.f32 %v1093_v53, %v1086_v59  ;;  %v4700_v59 = vstv %s3762_s25  ;;  %v1283_v25 = vmul.f32 %v4610_v17, %v3572_v42  ;;  %s3966_s25 = sld [smem:[#allocation4 + $0x52]] }
 0x1e4   : > { %v1113_v14 = vpop.permute.xlu1 %1112  ;;  %v1251_v41 = vpop.permute.xlu0 %1250  ;;  %v1559_v61 = vmul.f32 %v4700_v59, %v3838_v54 }
 0x1e5   : > { %v1102_v7 = vadd.f32 %v1100_v50, %v1095_v49  ;;  %v1256_v23 = vadd.f32 %v1251_v41, %v1241_v2  ;;  %v1276_v50 = vmul.f32 %v4611_v55, %v3559_v26 }
 0x1e6   : > { %1549 = vrot.lane.b32.xlu1 %v1544_v56, %s4686_s29  ;;  %1703 = vrot.lane.b32.xlu0 %v1699_v43, %s4684_s19  ;;  %v4701_v43 = vstv %s3778_s1  ;;  %s3977_s1 = sld [smem:[#allocation4 + $0x22]] }
 0x1e7   : > { %v1572_v2 = vmul.f32 %v4701_v43, %v3851_v0  ;;  %v4703_v43 = vstv %s3803_s28  ;;  %v1117_v17 = vadd.f32 %v1113_v14, %v1102_v7  ;;  %v3997_v7 = vld [vmem:[#allocation2 + $0xc] sm:$0xff]  ;;  %s4001_s28 = sld [smem:[#allocation4 + $0x24]] }
 0x1e8   : > { %v1126_v53 = vpop.permute.xlu1 %1125  ;;  %v1264_v32 = vpop.permute.xlu0 %1263 }
 0x1e9   : > { %v1269_v49 = vadd.f32 %v1264_v32, %v1256_v23  ;;  %v1727_v23 = vmul.f32 %v4609_v13, %v3879_v48  ;;  %v4702_v32 = vstv %s3792_s20  ;;  %s3988_s20 = sld [smem:[#allocation4 + $0x53]]  ;;  %v1130_v36 = vadd.f32 %v1126_v53, %v1117_v17 }
 0x1ea   : > { %1564 = vrot.lane.b32.xlu1 %v1559_v61, %s4681_s5  ;;  %1718 = vrot.lane.b32.xlu0 %v1714_v35, %s4686_s29  ;;  %v4608_v61 = vstv %s3925_s2  ;;  %v1587_v35 = vmul.f32 %v4702_v32, %v3838_v54 }
 0x1eb   : > { %v1278_v56 = vadd.f32 %v1276_v50, %v1269_v49  ;;  %v1742_v49 = vmul.f32 %v4608_v61, %v3866_v60  ;;  %v4615_v61 = vstv %s3955_s24 }
 0x1ec   : > { %v1141_v41 = vpop.permute.xlu1 %1140  ;;  %v1295_v26 = vpop.permute.xlu0 %1294  ;;  %v1770_v55 = vmul.f32 %v4615_v61, %v3866_v60 }
 0x1ed   : > { %v1285_v59 = vadd.f32 %v1283_v25, %v1278_v56  ;;  %v4612_v25 = vstv %s3941_s21 }
 0x1ee   : > { %1577 = vrot.lane.b32.xlu1 %v1572_v2, %s4681_s5  ;;  %1731 = vrot.lane.b32.xlu0 %v1727_v23, %s4686_s29  ;;  %v1600_v2 = vmul.f32 %v4703_v43, %v3851_v0  ;;  %v1755_v32 = vmul.f32 %v4612_v25, %v3879_v48  ;;  %v4705_v25 = vstv %s3828_s4  ;;  %s4027_s4 = sld [smem:[#allocation4 + $0x25]] }
 0x1ef   : > { %v1628_v44 = vmul.f32 %v4705_v25, %v3851_v0  ;;  %v4706_v25 = vstv %s3842_s6  ;;  %v4621_v47 = vstv %s3988_s20  ;;  %s4040_s6 = sld [smem:[#allocation4 + $0x56]] }
 0x1f0   : > { %v1154_v42 = vpop.permute.xlu1 %1153  ;;  %v1308_v50 = vpop.permute.xlu0 %1307  ;;  %v1659_v53 = vmul.f32 %v4706_v25, %v3997_v7 }
 0x1f2   : > { %1592 = vrot.lane.b32.xlu1 %v1587_v35, %s4682_s7  ;;  %1746 = vrot.lane.b32.xlu0 %v1742_v49, %s4681_s5  ;;  %v4704_v49 = vstv %s3816_s30  ;;  %s4014_s30 = sld [smem:[#allocation4 + $0x55]] }
 0x1f3   : > { %v1615_v13 = vmul.f32 %v4704_v49, %v3838_v54 }
 0x1f4   : > { %v1169_v56 = vpop.permute.xlu1 %1168  ;;  %v1323_v23 = vpop.permute.xlu0 %1322 }
 0x1f6   : > { %1605 = vrot.lane.b32.xlu1 %v1600_v2, %s4682_s7  ;;  %1759 = vrot.lane.b32.xlu0 %v1755_v32, %s4681_s5  ;;  %v4617_v2 = vstv %s3966_s25 }
 0x1f7   : > { %v1783_v14 = vmul.f32 %v4617_v2, %v3879_v48 }
 0x1f8   : > { %v1182_v35 = vpop.permute.xlu1 %1181  ;;  %v1336_v43 = vpop.permute.xlu0 %1335 }
 0x1fa   : > { %1620 = vrot.lane.b32.xlu1 %v1615_v13, %s4683_s9  ;;  %1774 = vrot.lane.b32.xlu0 %v1770_v55, %s4682_s7  ;;  %v4620_v13 = vstv %s3977_s1  ;;  %v1145_v55 = vadd.f32 %v1141_v41, %v1130_v36 }
 0x1fb   : > { %v1798_v2 = vmul.f32 %v4620_v13, %v3866_v60  ;;  %v1811_v13 = vmul.f32 %v4621_v47, %v3879_v48  ;;  %v4037_v47 = vld [vmem:[#allocation3 + $0x5] sm:$0xff] }
 0x1fc   : > { %v1197_v32 = vpop.permute.xlu1 %1196  ;;  %v1351_v49 = vpop.permute.xlu0 %1350  ;;  %v1158_v17 = vadd.f32 %v1154_v42, %v1145_v55  ;;  %v4707_v42 = vstv %s3855_s8  ;;  %s4051_s8 = sld [smem:[#allocation4 + $0x26]] }
 0x1fe   : > { %1633 = vrot.lane.b32.xlu1 %v1628_v44, %s4683_s9  ;;  %1787 = vrot.lane.b32.xlu0 %v1783_v14, %s4682_s7  ;;  %v1300_v44 = vadd.f32 %v1295_v26, %v1285_v59  ;;  %v1173_v36 = vadd.f32 %v1169_v56, %v1158_v17  ;;  %v1672_v14 = vmul.f32 %v4707_v42, %v4010_v3  ;;  %v4024_v59 = vld [vmem:[#allocation2 + $0x5] sm:$0xff]  ;;  %v1841_v56 = vstv %s4001_s28  ;;  %s4198_s28 = sld [smem:[#allocation4 + $0x5d]] }
 0x200   : > { %v1210_v61 = vpop.permute.xlu1 %1209  ;;  %v1364_v62 = vpop.permute.xlu0 %1363  ;;  %v1186_v55 = vadd.f32 %v1182_v35, %v1173_v36  ;;  %v1313_v26 = vadd.f32 %v1308_v50, %v1300_v44  ;;  %v4708_v35 = vstv %s3869_s27  ;;  %v1842_v44 = vmul.f32 %v1841_v56, %v4024_v59  ;;  %s4054_s27 = sld [smem:[#allocation4 + $0x15]] }
 0x201   : > { %v1687_v36 = vmul.f32 %v4708_v35, %v3997_v7 }
 0x202   : > { %1664 = vrot.lane.b32.xlu1 %v1659_v53, %s4685_s0  ;;  %1802 = vrot.lane.b32.xlu0 %v1798_v2, %s4683_s9  ;;  %v1201_v2 = vadd.f32 %v1197_v32, %v1186_v55  ;;  %v1328_v53 = vadd.f32 %v1323_v23, %v1313_v26  ;;  %v4632_v32 = vstv %s4014_s30  ;;  %v4709_v55 = vstv %s3882_s26  ;;  %s4065_s26 = sld [smem:[#allocation4 + $0x46]] }
 0x203   : > { %v1700_v26 = vmul.f32 %v4709_v55, %v4010_v3 }
 0x204   : > { %v1225_v41 = vpop.permute.xlu1 %1224  ;;  %v1379_v25 = vpop.permute.xlu0 %1378  ;;  %v1214_v42 = vadd.f32 %v1210_v61, %v1201_v2 }
 0x206   : > { %1677 = vrot.lane.b32.xlu1 %v1672_v14, %s4685_s0  ;;  %1815 = vrot.lane.b32.xlu0 %v1811_v13, %s4683_s9  ;;  %v1341_v14 = vadd.f32 %v1336_v43, %v1328_v53  ;;  %v1229_v23 = vadd.f32 %v1225_v41, %v1214_v42  ;;  %v1855_v53 = vmul.f32 %v4632_v32, %v4037_v47  ;;  %v4631_v41 = vstv %s4027_s4 }
 0x207   : > { %v4710_v42 = vstv %s3893_s10  ;;  %v1870_v55 = vmul.f32 %v4631_v41, %v4024_v59  ;;  %s4069_s10 = sld [smem:[#allocation4 + $0x57]]  ;;  %v4168_v41 = vld [vmem:[#allocation3 + $0xd] sm:$0xff] }
 0x208   : > { %v1238_v17 = vpop.permute.xlu1 %1237  ;;  %v1392_v50 = vpop.permute.xlu0 %1391  ;;  %v1356_v13 = vadd.f32 %v1351_v49, %v1341_v14 }
 0x209   : > { %v1242_v2 = vadd.f32 %v1238_v17, %v1229_v23 }
 0x20a   : > { %1692 = vrot.lane.b32.xlu1 %v1687_v36, %s4684_s19  ;;  %1846 = vrot.lane.b32.xlu0 %v1842_v44, %s4685_s0  ;;  %v1369_v35 = vadd.f32 %v1364_v62, %v1356_v13  ;;  %v1715_v44 = vmul.f32 %v4710_v42, %v3997_v7  ;;  %v4711_v62 = vstv %s3895_s14  ;;  %s4083_s14 = sld [smem:[#allocation4 + $0x27]] }
 0x20b   : > { %v1277_v14 = vmul.f32 %v4711_v62, %v3676_v24 }
 0x20c   : > { %v1253_v61 = vpop.permute.xlu1 %1252  ;;  %v1407_v43 = vpop.permute.xlu0 %1406  ;;  %v1384_v36 = vadd.f32 %v1379_v25, %v1369_v35  ;;  %v4628_v25 = vstv %s4040_s6 }
 0x20d   : > { %v1257_v49 = vadd.f32 %v1253_v61, %v1242_v2  ;;  %v1883_v42 = vmul.f32 %v4628_v25, %v4037_v47 }
 0x20e   : > { %1705 = vrot.lane.b32.xlu1 %v1700_v26, %s4684_s19  ;;  %1859 = vrot.lane.b32.xlu0 %v1855_v53, %s4685_s0  ;;  %v1397_v61 = vadd.f32 %v1392_v50, %v1384_v36  ;;  %v4712_v26 = vstv %s3904_s11  ;;  %s4099_s11 = sld [smem:[#allocation4 + $0x58]] }
 0x20f   : > { %v1284_v2 = vmul.f32 %v4712_v26, %v3689_v20  ;;  %v4627_v20 = vstv %s4051_s8 }
 0x210   : > { %v1266_v17 = vpop.permute.xlu1 %1265  ;;  %v1420_v13 = vpop.permute.xlu0 %1419  ;;  %v1412_v53 = vadd.f32 %v1407_v43, %v1397_v61  ;;  %v4625_v43 = vstv %s4054_s27  ;;  %v4624_v61 = vstv %s4065_s26 }
 0x211   : > { %v1270_v23 = vadd.f32 %v1266_v17, %v1257_v49  ;;  %v4713_v49 = vstv %s3911_s17  ;;  %s4113_s17 = sld [smem:[#allocation4 + $0x28]] }
 0x212   : > { %1720 = vrot.lane.b32.xlu1 %v1715_v44, %s4686_s29  ;;  %1874 = vrot.lane.b32.xlu0 %v1870_v55, %s4684_s19  ;;  %v1728_v50 = vmul.f32 %v4713_v49, %v4010_v3  ;;  %v1425_v44 = vadd.f32 %v1420_v13, %v1412_v53  ;;  %v1898_v13 = vmul.f32 %v4627_v20, %v4024_v59  ;;  %v4623_v53 = vstv %s4069_s10 }
 0x213   : > { %v1279_v24 = vadd.f32 %v1277_v14, %v1270_v23  ;;  %v4714_v23 = vstv %s3925_s2  ;;  %v1467_v49 = vmul.f32 %v4624_v61, %v3722_v12  ;;  %s4124_s2 = sld [smem:[#allocation4 + $0x59]] }
 0x214   : > { %v1297_v35 = vpop.permute.xlu1 %1296  ;;  %v1435_v17 = vpop.permute.xlu0 %1434  ;;  %v1743_v55 = vmul.f32 %v4714_v23, %v3997_v7 }
 0x215   : > { %v1286_v36 = vadd.f32 %v1284_v2, %v1279_v24  ;;  %v1440_v62 = vadd.f32 %v1435_v17, %v1425_v44  ;;  %v1460_v2 = vmul.f32 %v4625_v43, %v3709_v31 }
 0x216   : > { %1733 = vrot.lane.b32.xlu1 %v1728_v50, %s4686_s29  ;;  %1887 = vrot.lane.b32.xlu0 %v1883_v42, %s4684_s19  ;;  %v4715_v42 = vstv %s3941_s21  ;;  %s4135_s21 = sld [smem:[#allocation4 + $0x29]] }
 0x217   : > { %v1756_v44 = vmul.f32 %v4715_v42, %v4010_v3  ;;  %v4717_v42 = vstv %s3966_s25  ;;  %v1301_v61 = vadd.f32 %v1297_v35, %v1286_v36  ;;  %v4155_v36 = vld [vmem:[#allocation2 + $0xd] sm:$0xff]  ;;  %s4159_s25 = sld [smem:[#allocation4 + $0x2b]] }
 0x218   : > { %v1310_v14 = vpop.permute.xlu1 %1309  ;;  %v1448_v26 = vpop.permute.xlu0 %1447 }
 0x219   : > { %v1453_v24 = vadd.f32 %v1448_v26, %v1440_v62  ;;  %v1911_v62 = vmul.f32 %v4623_v53, %v4037_v47  ;;  %v4716_v26 = vstv %s3955_s24  ;;  %s4146_s24 = sld [smem:[#allocation4 + $0x5a]]  ;;  %v1314_v25 = vadd.f32 %v1310_v14, %v1301_v61 }
 0x21a   : > { %1748 = vrot.lane.b32.xlu1 %v1743_v55, %s4681_s5  ;;  %1902 = vrot.lane.b32.xlu0 %v1898_v13, %s4686_s29  ;;  %v4622_v55 = vstv %s4083_s14  ;;  %v1771_v13 = vmul.f32 %v4716_v26, %v3997_v7  ;;  %v1843_v14 = vmul.f32 %v1841_v56, %v4155_v36  ;;  %v4720_v56 = vstv %s4014_s30  ;;  %s4209_s30 = sld [smem:[#allocation4 + $0x2d]] }
 0x21b   : > { %v1462_v50 = vadd.f32 %v1460_v2, %v1453_v24  ;;  %v1926_v24 = vmul.f32 %v4622_v55, %v4024_v59  ;;  %v4629_v55 = vstv %s4113_s17 }
 0x21c   : > { %v1325_v17 = vpop.permute.xlu1 %1324  ;;  %v1479_v31 = vpop.permute.xlu0 %1478  ;;  %v1954_v43 = vmul.f32 %v4629_v55, %v4024_v59 }
 0x21d   : > { %v1469_v23 = vadd.f32 %v1467_v49, %v1462_v50  ;;  %v4626_v49 = vstv %s4099_s11 }
 0x21e   : > { %1761 = vrot.lane.b32.xlu1 %v1756_v44, %s4681_s5  ;;  %1915 = vrot.lane.b32.xlu0 %v1911_v62, %s4686_s29  ;;  %v1784_v44 = vmul.f32 %v4717_v42, %v4010_v3  ;;  %v1939_v26 = vmul.f32 %v4626_v49, %v4037_v47  ;;  %v4719_v49 = vstv %s3988_s20  ;;  %s4185_s20 = sld [smem:[#allocation4 + $0x2c]] }
 0x21f   : > { %v1812_v20 = vmul.f32 %v4719_v49, %v4010_v3  ;;  %v4634_v32 = vstv %s4146_s24 }
 0x220   : > { %v1338_v12 = vpop.permute.xlu1 %1337  ;;  %v1492_v2 = vpop.permute.xlu0 %1491 }
 0x222   : > { %1776 = vrot.lane.b32.xlu1 %v1771_v13, %s4682_s7  ;;  %1930 = vrot.lane.b32.xlu0 %v1926_v24, %s4681_s5  ;;  %v4718_v24 = vstv %s3977_s1  ;;  %s4172_s1 = sld [smem:[#allocation4 + $0x5c]] }
 0x223   : > { %v1799_v53 = vmul.f32 %v4718_v24, %v3997_v7 }
 0x224   : > { %v1353_v50 = vpop.permute.xlu1 %1352  ;;  %v1507_v62 = vpop.permute.xlu0 %1506 }
 0x226   : > { %1789 = vrot.lane.b32.xlu1 %v1784_v44, %s4682_s7  ;;  %1943 = vrot.lane.b32.xlu0 %v1939_v26, %s4681_s5  ;;  %v4630_v44 = vstv %s4124_s2 }
 0x227   : > { %v1967_v35 = vmul.f32 %v4630_v44, %v4037_v47 }
 0x228   : > { %v1366_v13 = vpop.permute.xlu1 %1365  ;;  %v1520_v42 = vpop.permute.xlu0 %1519 }
 0x22a   : > { %1804 = vrot.lane.b32.xlu1 %v1799_v53, %s4683_s9  ;;  %1958 = vrot.lane.b32.xlu0 %v1954_v43, %s4682_s7  ;;  %v4633_v53 = vstv %s4135_s21  ;;  %v1329_v43 = vadd.f32 %v1325_v17, %v1314_v25 }
 0x22b   : > { %v1982_v44 = vmul.f32 %v4633_v53, %v4024_v59  ;;  %v1995_v53 = vmul.f32 %v4634_v32, %v4037_v47  ;;  %v4195_v32 = vld [vmem:[#allocation3 + $0x6] sm:$0xff] }
 0x22c   : > { %v1381_v26 = vpop.permute.xlu1 %1380  ;;  %v1535_v24 = vpop.permute.xlu0 %1534  ;;  %v1342_v61 = vadd.f32 %v1338_v12, %v1329_v43  ;;  %v1856_v12 = vmul.f32 %v4720_v56, %v4168_v41 }
 0x22e   : > { %1817 = vrot.lane.b32.xlu1 %v1812_v20, %s4683_s9  ;;  %1971 = vrot.lane.b32.xlu0 %v1967_v35, %s4682_s7  ;;  %v1484_v20 = vadd.f32 %v1479_v31, %v1469_v23  ;;  %v1357_v25 = vadd.f32 %v1353_v50, %v1342_v61  ;;  %v4182_v23 = vld [vmem:[#allocation2 + $0x6] sm:$0xff]  ;;  %v2025_v50 = vstv %s4159_s25 }
 0x230   : > { %v1394_v55 = vpop.permute.xlu1 %1393  ;;  %v1548_v49 = vpop.permute.xlu0 %1547  ;;  %v1370_v35 = vadd.f32 %v1366_v13, %v1357_v25  ;;  %v1497_v31 = vadd.f32 %v1492_v2, %v1484_v20  ;;  %v4721_v13 = vstv %s4027_s4  ;;  %v2026_v20 = vmul.f32 %v2025_v50, %v4182_v23  ;;  %s4212_s4 = sld [smem:[#allocation4 + $0x1c]] }
 0x231   : > { %v1871_v25 = vmul.f32 %v4721_v13, %v4155_v36 }
 0x232   : > { %1848 = vrot.lane.b32.xlu1 %v1843_v14, %s4685_s0  ;;  %1986 = vrot.lane.b32.xlu0 %v1982_v44, %s4683_s9  ;;  %v1385_v44 = vadd.f32 %v1381_v26, %v1370_v35  ;;  %v1512_v14 = vadd.f32 %v1507_v62, %v1497_v31  ;;  %v4645_v26 = vstv %s4172_s1  ;;  %v4722_v35 = vstv %s4040_s6  ;;  %s4223_s6 = sld [smem:[#allocation4 + $0x4d]] }
 0x233   : > { %v1884_v31 = vmul.f32 %v4722_v35, %v4168_v41 }
 0x234   : > { %v1409_v17 = vpop.permute.xlu1 %1408  ;;  %v1563_v43 = vpop.permute.xlu0 %1562  ;;  %v1398_v56 = vadd.f32 %v1394_v55, %v1385_v44 }
 0x236   : > { %1861 = vrot.lane.b32.xlu1 %v1856_v12, %s4685_s0  ;;  %1999 = vrot.lane.b32.xlu0 %v1995_v53, %s4683_s9  ;;  %v1525_v12 = vadd.f32 %v1520_v42, %v1512_v14  ;;  %v1413_v62 = vadd.f32 %v1409_v17, %v1398_v56  ;;  %v2039_v14 = vmul.f32 %v4645_v26, %v4195_v32  ;;  %v4643_v17 = vstv %s4185_s20 }
 0x237   : > { %v4723_v56 = vstv %s4051_s8  ;;  %v2054_v35 = vmul.f32 %v4643_v17, %v4182_v23  ;;  %s4227_s8 = sld [smem:[#allocation4 + $0x5e]] }
 0x238   : > { %v1422_v61 = vpop.permute.xlu1 %1421  ;;  %v1576_v2 = vpop.permute.xlu0 %1575  ;;  %v1540_v53 = vadd.f32 %v1535_v24, %v1525_v12 }
 0x239   : > { %v1426_v44 = vadd.f32 %v1422_v61, %v1413_v62 }
 0x23a   : > { %1876 = vrot.lane.b32.xlu1 %v1871_v25, %s4684_s19  ;;  %2030 = vrot.lane.b32.xlu0 %v2026_v20, %s4685_s0  ;;  %v1553_v13 = vadd.f32 %v1548_v49, %v1540_v53  ;;  %v1899_v20 = vmul.f32 %v4723_v56, %v4155_v36  ;;  %v4724_v49 = vstv %s4054_s27  ;;  %s4241_s27 = sld [smem:[#allocation4 + $0x2e]] }
 0x23b   : > { %v1461_v12 = vmul.f32 %v4724_v49, %v3838_v54 }
 0x23c   : > { %v1437_v55 = vpop.permute.xlu1 %1436  ;;  %v1591_v42 = vpop.permute.xlu0 %1590  ;;  %v1568_v25 = vadd.f32 %v1563_v43, %v1553_v13  ;;  %v4641_v43 = vstv %s4198_s28 }
 0x23d   : > { %v1441_v24 = vadd.f32 %v1437_v55, %v1426_v44  ;;  %v2067_v56 = vmul.f32 %v4641_v43, %v4195_v32 }
 0x23e   : > { %1889 = vrot.lane.b32.xlu1 %v1884_v31, %s4684_s19  ;;  %2043 = vrot.lane.b32.xlu0 %v2039_v14, %s4685_s0  ;;  %v1581_v55 = vadd.f32 %v1576_v2, %v1568_v25  ;;  %v4725_v31 = vstv %s4065_s26  ;;  %s4257_s26 = sld [smem:[#allocation4 + $0x5f]] }
 0x23f   : > { %v1468_v44 = vmul.f32 %v4725_v31, %v3851_v0  ;;  %v4640_v0 = vstv %s4209_s30 }
 0x240   : > { %v1450_v61 = vpop.permute.xlu1 %1449  ;;  %v1604_v53 = vpop.permute.xlu0 %1603  ;;  %v1596_v14 = vadd.f32 %v1591_v42, %v1581_v55  ;;  %v4638_v42 = vstv %s4212_s4  ;;  %v4637_v55 = vstv %s4223_s6 }
 0x241   : > { %v1454_v62 = vadd.f32 %v1450_v61, %v1441_v24  ;;  %v4726_v24 = vstv %s4069_s10  ;;  %s4271_s10 = sld [smem:[#allocation4 + $0x2f]] }
 0x242   : > { %1904 = vrot.lane.b32.xlu1 %v1899_v20, %s4686_s29  ;;  %2058 = vrot.lane.b32.xlu0 %v2054_v35, %s4684_s19  ;;  %v1912_v2 = vmul.f32 %v4726_v24, %v4168_v41  ;;  %v1609_v20 = vadd.f32 %v1604_v53, %v1596_v14  ;;  %v2082_v53 = vmul.f32 %v4640_v0, %v4182_v23  ;;  %v4636_v14 = vstv %s4227_s8 }
 0x243   : > { %v1463_v54 = vadd.f32 %v1461_v12, %v1454_v62  ;;  %v4727_v62 = vstv %s4083_s14  ;;  %v1651_v24 = vmul.f32 %v4637_v55, %v3879_v48  ;;  %s4282_s14 = sld [smem:[#allocation4 + $0x60]] }
 0x244   : > { %v1481_v13 = vpop.permute.xlu1 %1480  ;;  %v1619_v61 = vpop.permute.xlu0 %1618  ;;  %v1927_v35 = vmul.f32 %v4727_v62, %v4155_v36 }
 0x245   : > { %v1470_v25 = vadd.f32 %v1468_v44, %v1463_v54  ;;  %v1624_v49 = vadd.f32 %v1619_v61, %v1609_v20  ;;  %v1644_v44 = vmul.f32 %v4638_v42, %v3866_v60 }
 0x246   : > { %1917 = vrot.lane.b32.xlu1 %v1912_v2, %s4686_s29  ;;  %2071 = vrot.lane.b32.xlu0 %v2067_v56, %s4684_s19  ;;  %v4728_v56 = vstv %s4099_s11  ;;  %s4293_s11 = sld [smem:[#allocation4 + $0x30]] }
 0x247   : > { %v1940_v20 = vmul.f32 %v4728_v56, %v4168_v41  ;;  %v4730_v56 = vstv %s4124_s2  ;;  %v1485_v55 = vadd.f32 %v1481_v13, %v1470_v25  ;;  %s4353_s2 = sld [smem:[#allocation4 + $0x54]] }
 0x248   : > { %v1494_v12 = vpop.permute.xlu1 %1493  ;;  %v1632_v31 = vpop.permute.xlu0 %1631 }
 0x249   : > { %v1637_v54 = vadd.f32 %v1632_v31, %v1624_v49  ;;  %v2095_v49 = vmul.f32 %v4636_v14, %v4195_v32  ;;  %v4729_v31 = vstv %s4113_s17  ;;  %s4304_s17 = sld [smem:[#allocation4 + $0x61]]  ;;  %v1498_v43 = vadd.f32 %v1494_v12, %v1485_v55 }
 0x24a   : > { %1932 = vrot.lane.b32.xlu1 %v1927_v35, %s4681_s5  ;;  %2086 = vrot.lane.b32.xlu0 %v2082_v53, %s4686_s29  ;;  %v4635_v35 = vstv %s4241_s27  ;;  %v1955_v53 = vmul.f32 %v4729_v31, %v4155_v36 }
 0x24b   : > { %v1646_v2 = vadd.f32 %v1644_v44, %v1637_v54  ;;  %v2110_v54 = vmul.f32 %v4635_v35, %v4182_v23  ;;  %v4642_v35 = vstv %s4271_s10 }
 0x24c   : > { %v1509_v61 = vpop.permute.xlu1 %1508  ;;  %v1663_v60 = vpop.permute.xlu0 %1662  ;;  %v2138_v42 = vmul.f32 %v4642_v35, %v4182_v23 }
 0x24d   : > { %v1653_v62 = vadd.f32 %v1651_v24, %v1646_v2  ;;  %v4639_v24 = vstv %s4257_s26  ;;  %v1513_v35 = vadd.f32 %v1509_v61, %v1498_v43 }
 0x24e   : > { %1945 = vrot.lane.b32.xlu1 %v1940_v20, %s4681_s5  ;;  %2099 = vrot.lane.b32.xlu0 %v2095_v49, %s4686_s29  ;;  %v1968_v20 = vmul.f32 %v4730_v56, %v4168_v41  ;;  %v2123_v31 = vmul.f32 %v4639_v24, %v4195_v32  ;;  %v4732_v24 = vstv %s4146_s24 }
 0x24f   : > { %v1996_v0 = vmul.f32 %v4732_v24, %v4168_v41  ;;  %v1668_v26 = vadd.f32 %v1663_v60, %v1653_v62 }
 0x250   : > { %v1522_v48 = vpop.permute.xlu1 %1521  ;;  %v1676_v44 = vpop.permute.xlu0 %1675 }
 0x251   : > { %v1526_v12 = vadd.f32 %v1522_v48, %v1513_v35 }
 0x252   : > { %1960 = vrot.lane.b32.xlu1 %v1955_v53, %s4682_s7  ;;  %2114 = vrot.lane.b32.xlu0 %v2110_v54, %s4681_s5  ;;  %v4731_v54 = vstv %s4135_s21  ;;  %s2653_s21 = sshll.u32 %s2856_s16, 12 }
 0x253   : > { %v1983_v14 = vmul.f32 %v4731_v54, %v4155_v36  ;;  %v4313_v54 = vld [vmem:[#allocation2 + $0xe] sm:$0xff] }
 0x254   : > { %v1537_v2 = vpop.permute.xlu1 %1536  ;;  %v1691_v49 = vpop.permute.xlu0 %1690  ;;  %v2027_v24 = vmul.f32 %v2025_v50, %v4313_v54 }
 0x255   : > { %v1541_v43 = vadd.f32 %v1537_v2, %v1526_v12 }
 0x256   : > { %1973 = vrot.lane.b32.xlu1 %v1968_v20, %s4682_s7  ;;  %2127 = vrot.lane.b32.xlu0 %v2123_v31, %s4681_s5  ;;  %v4644_v20 = vstv %s4282_s14 }
 0x257   : > { %v2151_v25 = vmul.f32 %v4644_v20, %v4195_v32  ;;  %v4324_v20 = vld [vmem:[#allocation3 + $0xe] sm:$0xff] }
 0x258   : > { %v1550_v53 = vpop.permute.xlu1 %1549  ;;  %v1704_v56 = vpop.permute.xlu0 %1703 }
 0x259   : > { %v1554_v50 = vadd.f32 %v1550_v53, %v1541_v43 }
 0x25a   : > { %1988 = vrot.lane.b32.xlu1 %v1983_v14, %s4683_s9  ;;  %2142 = vrot.lane.b32.xlu0 %v2138_v42, %s4682_s7  ;;  %v4647_v14 = vstv %s4293_s11 }
 0x25b   : > { %v2166_v17 = vmul.f32 %v4647_v14, %v4182_v23  ;;  %v1681_v14 = vadd.f32 %v1676_v44, %v1668_v26 }
 0x25c   : > { %v1565_v31 = vpop.permute.xlu1 %1564  ;;  %v1719_v13 = vpop.permute.xlu0 %1718 }
 0x25d   : > { %v1569_v60 = vadd.f32 %v1565_v31, %v1554_v50  ;;  %v1696_v62 = vadd.f32 %v1691_v49, %v1681_v14 }
 0x25e   : > { %2001 = vrot.lane.b32.xlu1 %v1996_v0, %s4683_s9  ;;  %2155 = vrot.lane.b32.xlu0 %v2151_v25, %s4682_s7  ;;  %v4648_v0 = vstv %s4304_s17  ;;  %v4733_v25 = vstv %s4172_s1 }
 0x25f   : > { %v2040_v38 = vmul.f32 %v4733_v25, %v4324_v20  ;;  %v2179_v48 = vmul.f32 %v4648_v0, %v4195_v32  ;;  %v1709_v53 = vadd.f32 %v1704_v56, %v1696_v62 }
 0x260   : > { %v1578_v42 = vpop.permute.xlu1 %1577  ;;  %v1732_v55 = vpop.permute.xlu0 %1731 }
 0x261   : > { %v1582_v12 = vadd.f32 %v1578_v42, %v1569_v60  ;;  %v1724_v0 = vadd.f32 %v1719_v13, %v1709_v53  ;;  %v4737_v13 = vstv %s4212_s4  ;;  %v4739_v53 = vstv %s4227_s8 }
 0x262   : > { %2032 = vrot.lane.b32.xlu1 %v2027_v24, %s4685_s0  ;;  %2170 = vrot.lane.b32.xlu0 %v2166_v17, %s4683_s9  ;;  %v4734_v17 = vstv %s4185_s20  ;;  %v1645_v60 = vmul.f32 %v4737_v13, %v3997_v7  ;;  %s4511_s20 = scalar_lea.hbm %s4567_s3, %s2653_s21 }
 0x263   : > { %v2055_v24 = vmul.f32 %v4734_v17, %v4313_v54  ;;  %v1737_v14 = vadd.f32 %v1732_v55, %v1724_v0  ;;  %v4738_v0 = vstv %s4223_s6 }
 0x264   : > { %v1593_v61 = vpop.permute.xlu1 %1592  ;;  %v1747_v35 = vpop.permute.xlu0 %1746 }
 0x265   : > { %v1597_v43 = vadd.f32 %v1593_v61, %v1582_v12  ;;  %v1752_v50 = vadd.f32 %v1747_v35, %v1737_v14  ;;  %v1652_v35 = vmul.f32 %v4738_v0, %v4010_v3  ;;  %v4740_v14 = vstv %s4241_s27 }
 0x266   : > { %2045 = vrot.lane.b32.xlu1 %v2040_v38, %s4685_s0  ;;  %2183 = vrot.lane.b32.xlu0 %v2179_v48, %s4683_s9  ;;  %v4735_v38 = vstv %s4198_s28  ;;  %s4345_s0 = sld [smem:[#allocation4 + $0x23]]  ;;  %v4736_v48 = vstv %s4209_s30  ;;  %s2812_s30 = smov [#allocation7]  }
 0x267   : > { %v2068_v44 = vmul.f32 %v4735_v38, %v4324_v20  ;;  %v2083_v61 = vmul.f32 %v4736_v48, %v4313_v54  ;;  %s2740_s4 = sshll.u32 %s2812_s30, 4  ;;  %s2741_s4 = int_to_ptr.vmem [resolvable:$false] %s2740_s4 }
 0x268   : > { %v1606_v2 = vpop.permute.xlu1 %1605  ;;  %v1760_v25 = vpop.permute.xlu0 %1759  ;;  %s2742_s6 = scalar_lea.vmem %s2741_s4, 8192 }
 0x269   : > { %v1610_v31 = vadd.f32 %v1606_v2, %v1597_v43  ;;  %v1765_v55 = vadd.f32 %v1760_v25, %v1752_v50  ;;  %v2096_v43 = vmul.f32 %v4739_v53, %v4324_v20  ;;  %v1834_v50 = vstv %s4353_s2 }
 0x26a   : > { %2060 = vrot.lane.b32.xlu1 %v2055_v24, %s4684_s19  ;;  %v1835_v13 = vmul.f32 %v1834_v50, %v4037_v47  ;;  %v4743_v53 = vstv %s4282_s14 }
 0x26c   : > { %v1621_v26 = vpop.permute.xlu1 %1620  ;;  %v1775_v49 = vpop.permute.xlu0 %1774 }
 0x26d   : > { %v1625_v42 = vadd.f32 %v1621_v26, %v1610_v31  ;;  %v1780_v24 = vadd.f32 %v1775_v49, %v1765_v55 }
 0x26e   : > { %2073 = vrot.lane.b32.xlu1 %v2068_v44, %s4684_s19  ;;  %v1827_v44 = vstv %s4345_s0 }
 0x26f   : > { %v1828_v49 = vmul.f32 %v1827_v44, %v4024_v59 }
 0x270   : > { %v1634_v56 = vpop.permute.xlu1 %1633  ;;  %v1788_v17 = vpop.permute.xlu0 %1787 }
 0x271   : > { %v1638_v62 = vadd.f32 %v1634_v56, %v1625_v42  ;;  %v1793_v38 = vadd.f32 %v1788_v17, %v1780_v24  ;;  %v2111_v42 = vmul.f32 %v4740_v14, %v4313_v54 }
 0x272   : > { %2088 = vrot.lane.b32.xlu1 %v2083_v61, %s4686_s29 }
 0x273   : > { %v1647_v2 = vadd.f32 %v1645_v60, %v1638_v62  ;;  %v4741_v60 = vstv %s4257_s26 }
 0x274   : > { %v1665_v12 = vpop.permute.xlu1 %1664  ;;  %v1803_v7 = vpop.permute.xlu0 %1802  ;;  %v2124_v62 = vmul.f32 %v4741_v60, %v4324_v20 }
 0x275   : > { %v1654_v26 = vadd.f32 %v1652_v35, %v1647_v2  ;;  %v1808_v25 = vadd.f32 %v1803_v7, %v1793_v38  ;;  %v4742_v35 = vstv %s4271_s10  ;;  %v4744_v38 = vstv %s4293_s11 }
 0x276   : > { %2101 = vrot.lane.b32.xlu1 %v2096_v43, %s4686_s29  ;;  %v2139_v59 = vmul.f32 %v4742_v35, %v4313_v54  ;;  %v2152_v43 = vmul.f32 %v4743_v53, %v4324_v20 }
 0x277   : > { %v1669_v14 = vadd.f32 %v1665_v12, %v1654_v26 }
 0x278   : > { %v1678_v31 = vpop.permute.xlu1 %1677  ;;  %v1816_v3 = vpop.permute.xlu0 %1815 }
 0x279   : > { %v1821_v56 = vadd.f32 %v1816_v3, %v1808_v25  ;;  %v2167_v25 = vmul.f32 %v4744_v38, %v4313_v54 }
 0x27a   : > { %2116 = vrot.lane.b32.xlu1 %v2111_v42, %s4681_s5 }
 0x27b   : > { %v1830_v48 = vadd.f32 %v1828_v49, %v1821_v56  ;;  %v4745_v49 = vstv %s4304_s17 }
 0x27c   : > { %v1693_v61 = vpop.permute.xlu1 %1692  ;;  %v1847_v17 = vpop.permute.xlu0 %1846  ;;  %v2180_v56 = vmul.f32 %v4745_v49, %v4324_v20 }
 0x27d   : > { %v1837_v55 = vadd.f32 %v1835_v13, %v1830_v48  ;;  %v1682_v48 = vadd.f32 %v1678_v31, %v1669_v14 }
 0x27e   : > { %2129 = vrot.lane.b32.xlu1 %v2124_v62, %s4681_s5  ;;  %s4391_s5 = sld [smem:[#allocation4 + $0x2a]] }
 0x27f   : > { %v1697_v60 = vadd.f32 %v1693_v61, %v1682_v48  ;;  %v1852_v53 = vadd.f32 %v1847_v17, %v1837_v55 }
 0x280   : > { %v1706_v0 = vpop.permute.xlu1 %1705  ;;  %v1860_v2 = vpop.permute.xlu0 %1859 }
 0x281   : > { %v1710_v35 = vadd.f32 %v1706_v0, %v1697_v60  ;;  %v1865_v26 = vadd.f32 %v1860_v2, %v1852_v53  ;;  %v1829_v2 = vmul.f32 %v1827_v44, %v4155_v36 }
 0x282   : > { %2144 = vrot.lane.b32.xlu1 %v2139_v59, %s4682_s7 }
 0x284   : > { %v1721_v24 = vpop.permute.xlu1 %1720  ;;  %v1875_v47 = vpop.permute.xlu0 %1874 }
 0x286   : > { %2157 = vrot.lane.b32.xlu1 %v2152_v43, %s4682_s7  ;;  %v1725_v43 = vadd.f32 %v1721_v24, %v1710_v35  ;;  %s4394_s7 = sld [smem:[#allocation4 + $0x5b]] }
 0x288   : > { %v1734_v7 = vpop.permute.xlu1 %1733  ;;  %v1888_v42 = vpop.permute.xlu0 %1887 }
 0x289   : > { %v1738_v38 = vadd.f32 %v1734_v7, %v1725_v43 }
 0x28a   : > { %2172 = vrot.lane.b32.xlu1 %v2167_v25, %s4683_s9  ;;  %v1880_v25 = vadd.f32 %v1875_v47, %v1865_v26 }
 0x28c   : > { %v1749_v3 = vpop.permute.xlu1 %1748  ;;  %v1903_v13 = vpop.permute.xlu0 %1902  ;;  %v1893_v49 = vadd.f32 %v1888_v42, %v1880_v25 }
 0x28d   : > { %v1753_v30 = vadd.f32 %v1749_v3, %v1738_v38 }
 0x28e   : > { %2185 = vrot.lane.b32.xlu1 %v2180_v56, %s4683_s9  ;;  %v1908_v14 = vadd.f32 %v1903_v13, %v1893_v49  ;;  %v2011_v13 = vstv %s4391_s5  ;;  %s186_s9 = sand.u32 1, %s2794_s13  }
 0x28f   : > { %v2012_v36 = vmul.f32 %v2011_v13, %v4182_v23  ;;  %s2546_s19 = sshll.u32 %s186_s9, 8  ;;  %s4523_s16 = scalar_lea.sflag [#allocation5], %s186_s9 }
 0x290   : > { %v1762_v62 = vpop.permute.xlu1 %1761  ;;  %v1916_v59 = vpop.permute.xlu0 %1915  ;;  %s4416_s29 = scalar_lea.vmem [#allocation7], %s2546_s19 }
 0x291   : > { %v1766_v19 = vadd.f32 %v1762_v62, %v1753_v30  ;;  %v1921_v48 = vadd.f32 %v1916_v59, %v1908_v14  ;;  %v2018_v59 = vstv %s4394_s7  ;;  %s2457_s24 = sshll.u32 %s4416_s29, 4  ;;  %s4513_s24 = int_to_ptr.vmem [resolvable:$true] %s2457_s24 }
 0x292   : > { %s2736_s28 = scalar_lea.vmem %s4513_s24, 4096  ;;  %p2743_p13 = scmp.lt.s32.totalorder %s4513_s24, %s2741_s4 }
 0x293   : > { %p2737_p9 = scmp.ne.s32.totalorder %s4513_s24, %s2736_s28  ;;  %p2744_p0 = scmp.lt.s32.totalorder %s2742_s6, %s2736_s28 }
 0x294   : > { %v1777_v37 = vpop.permute.xlu1 %1776  ;;  %v1931_v12 = vpop.permute.xlu0 %1930 }
 0x295   : > { %v1781_v31 = vadd.f32 %v1777_v37, %v1766_v19  ;;  %v1936_v17 = vadd.f32 %v1931_v12, %v1921_v48  ;;  %v1836_v37 = vmul.f32 %v1834_v50, %v4168_v41  ;;  %p2738_p10 = pnand %p2737_p9, %p2873_p5  ;;  %p2745_p1 = por %p2744_p0, %p2743_p13 }
 0x297   : > { %p2739_p12 = pneg %p2738_p10 }
 0x298   : > { %v1790_v29 = vpop.permute.xlu1 %1789  ;;  %v1944_v18 = vpop.permute.xlu0 %1943 }
 0x299   : > { %v1794_v56 = vadd.f32 %v1790_v29, %v1781_v31  ;;  %v1949_v30 = vadd.f32 %v1944_v18, %v1936_v17  ;;  %v2019_v18 = vmul.f32 %v2018_v59, %v4195_v32  ;;  %p2746_p2 = pnand %p2745_p1, %p2739_p12 }
 0x29c   : > { %v1805_v11 = vpop.permute.xlu1 %1804  ;;  %v1959_v61 = vpop.permute.xlu0 %1958 }
 0x29d   : > { %v1809_v0 = vadd.f32 %v1805_v11, %v1794_v56  ;;  %v1964_v29 = vadd.f32 %v1959_v61, %v1949_v30 }
 0x2a0   : > { %v1818_v55 = vpop.permute.xlu1 %1817  ;;  %v1972_v47 = vpop.permute.xlu0 %1971 }
 0x2a1   : > { %v1822_v24 = vadd.f32 %v1818_v55, %v1809_v0  ;;  %v1977_v3 = vadd.f32 %v1972_v47, %v1964_v29 }
 0x2a3   : > { %v1831_v19 = vadd.f32 %v1829_v2, %v1822_v24 }
 0x2a4   : > { %v1849_v7 = vpop.permute.xlu1 %1848  ;;  %v1987_v11 = vpop.permute.xlu0 %1986 }
 0x2a5   : > { %v1838_v42 = vadd.f32 %v1836_v37, %v1831_v19  ;;  %v1992_v60 = vadd.f32 %v1987_v11, %v1977_v3 }
 0x2a7   : > { %v1853_v31 = vadd.f32 %v1849_v7, %v1838_v42 }
 0x2a8   : > { %v1862_v62 = vpop.permute.xlu1 %1861  ;;  %v2000_v35 = vpop.permute.xlu0 %1999 }
 0x2a9   : > { %v2005_v44 = vadd.f32 %v2000_v35, %v1992_v60  ;;  %v1866_v61 = vadd.f32 %v1862_v62, %v1853_v31 }
 0x2ab   : > { %v2014_v53 = vadd.f32 %v2012_v36, %v2005_v44 }
 0x2ac   : > { %v1877_v43 = vpop.permute.xlu1 %1876  ;;  %v2031_v38 = vpop.permute.xlu0 %2030 }
 0x2ad   : > { %v2021_v12 = vadd.f32 %v2019_v18, %v2014_v53  ;;  %v1881_v0 = vadd.f32 %v1877_v43, %v1866_v61 }
 0x2af   : > { %v2036_v2 = vadd.f32 %v2031_v38, %v2021_v12  ;;  %v2013_v12 = vmul.f32 %v2011_v13, %v4313_v54 }
 0x2b0   : > { %v1890_v41 = vpop.permute.xlu1 %1889  ;;  %v2044_v50 = vpop.permute.xlu0 %2043 }
 0x2b1   : > { %v1894_v23 = vadd.f32 %v1890_v41, %v1881_v0  ;;  %v2049_v19 = vadd.f32 %v2044_v50, %v2036_v2 }
 0x2b4   : > { %v1905_v26 = vpop.permute.xlu1 %1904  ;;  %v2059_v25 = vpop.permute.xlu0 %2058 }
 0x2b5   : > { %v1909_v24 = vadd.f32 %v1905_v26, %v1894_v23  ;;  %v2064_v29 = vadd.f32 %v2059_v25, %v2049_v19  ;;  %v2020_v25 = vmul.f32 %v2018_v59, %v4324_v20 }
 0x2b8   : > { %v1918_v49 = vpop.permute.xlu1 %1917  ;;  %v2072_v14 = vpop.permute.xlu0 %2071 }
 0x2b9   : > { %v1922_v32 = vadd.f32 %v1918_v49, %v1909_v24  ;;  %v2077_v7 = vadd.f32 %v2072_v14, %v2064_v29 }
 0x2bc   : > { %v1933_v56 = vpop.permute.xlu1 %1932  ;;  %v2087_v48 = vpop.permute.xlu0 %2086 }
 0x2bd   : > { %v1937_v37 = vadd.f32 %v1933_v56, %v1922_v32  ;;  %v2092_v35 = vadd.f32 %v2087_v48, %v2077_v7 }
 0x2c0   : > { %v1946_v17 = vpop.permute.xlu1 %1945  ;;  %v2100_v55 = vpop.permute.xlu0 %2099 }
 0x2c1   : > { %v1950_v3 = vadd.f32 %v1946_v17, %v1937_v37  ;;  %v2105_v53 = vadd.f32 %v2100_v55, %v2092_v35 }
 0x2c4   : > { %v1961_v47 = vpop.permute.xlu1 %1960  ;;  %v2115_v30 = vpop.permute.xlu0 %2114 }
 0x2c5   : > { %v1965_v42 = vadd.f32 %v1961_v47, %v1950_v3  ;;  %v2120_v18 = vadd.f32 %v2115_v30, %v2105_v53 }
 0x2c8   : > { %v1974_v11 = vpop.permute.xlu1 %1973  ;;  %v2128_v60 = vpop.permute.xlu0 %2127 }
 0x2c9   : > { %v1978_v36 = vadd.f32 %v1974_v11, %v1965_v42  ;;  %v2133_v50 = vadd.f32 %v2128_v60, %v2120_v18  ;;  %v2205_v42 = vsub.s32 0, %v3169_v9 }
 0x2cc   : > { %v1989_v62 = vpop.permute.xlu1 %1988  ;;  %v2143_v44 = vpop.permute.xlu0 %2142 }
 0x2cd   : > { %v1993_v43 = vadd.f32 %v1989_v62, %v1978_v36  ;;  %v2148_v31 = vadd.f32 %v2143_v44, %v2133_v50 }
 0x2d0   : > { %v2002_v38 = vpop.permute.xlu1 %2001  ;;  %v2156_v26 = vpop.permute.xlu0 %2155 }
 0x2d1   : > { %v2006_v41 = vadd.f32 %v2002_v38, %v1993_v43  ;;  %v2161_v48 = vadd.f32 %v2156_v26, %v2148_v31  ;;  %v2216_v43 = vsub.s32 1, %v3169_v9  ;;  %v2227_v26 = vsub.s32 2, %v3169_v9 }
 0x2d3   : > { %v2015_v49 = vadd.f32 %v2013_v12, %v2006_v41 }
 0x2d4   : > { %v2033_v56 = vpop.permute.xlu1 %2032  ;;  %v2171_v61 = vpop.permute.xlu0 %2170 }
 0x2d5   : > { %v2022_v14 = vadd.f32 %v2020_v25, %v2015_v49  ;;  %v2176_v0 = vadd.f32 %v2171_v61, %v2161_v48 }
 0x2d7   : > { %v2037_v30 = vadd.f32 %v2033_v56, %v2022_v14  ;;  %v2238_v56 = vsub.s32 3, %v3169_v9 }
 0x2d8   : > { %v2046_v17 = vpop.permute.xlu1 %2045  ;;  %v2184_v23 = vpop.permute.xlu0 %2183 }
 0x2d9   : > { %v2189_v55 = vadd.f32 %v2184_v23, %v2176_v0  ;;  %v2050_v59 = vadd.f32 %v2046_v17, %v2037_v30  ;;  %v2249_v0 = vsub.s32 4, %v3169_v9 }
 0x2db   : > { %v2191_v2 = vsub.f32 0.0, %v2189_v55  ;;  %v2260_v55 = vsub.s32 5, %v3169_v9 }
 0x2dc   : > { %v2061_v24 = vpop.permute.xlu1 %2060 }
 0x2dd   : > { %v2193_v47 = vmul.f32 1.442695, %v2191_v2  ;;  %v2065_v29 = vadd.f32 %v2061_v24, %v2050_v59  ;;  %v2271_v24 = vsub.s32 6, %v3169_v9 }
 0x2df   : > { %2713 = vpow2.f32 %v2193_v47 }
 0x2e0   : > { %v2074_v54 = vpop.permute.xlu1 %2073 }
 0x2e1   : > { %v2078_v3 = vadd.f32 %v2074_v54, %v2065_v29  ;;  %v2282_v54 = vsub.s32 7, %v3169_v9 }
 0x2e4   : > { %v2089_v13 = vpop.permute.xlu1 %2088 }
 0x2e5   : > { %v2093_v60 = vadd.f32 %v2089_v13, %v2078_v3 }
 0x2e8   : > { %v2102_v32 = vpop.permute.xlu1 %2101 }
 0x2e9   : > { %v2714_v19 = vpop.eup %2713  ;;  %v2106_v35 = vadd.f32 %v2102_v32, %v2093_v60 }
 0x2ea   : > { %v2197_v37 = vadd.f32 1.0, %v2714_v19 }
 0x2ec   : > { %v2117_v20 = vpop.permute.xlu1 %2116  ;;  %2715 = vrcp.f32 %v2197_v37 }
 0x2ed   : > { %v2121_v36 = vadd.f32 %v2117_v20, %v2106_v35 }
 0x2f0   : > { %v2130_v11 = vpop.permute.xlu1 %2129 }
 0x2f1   : > { %v2134_v18 = vadd.f32 %v2130_v11, %v2121_v36 }
 0x2f4   : > { %v2145_v7 = vpop.permute.xlu1 %2144 }
 0x2f5   : > { %v2149_v38 = vadd.f32 %v2145_v7, %v2134_v18 }
 0x2f6   : > { %v2716_v62 = vpop.eup %2715 }
 0x2f7   : > { %v2206_v53 = vrot.slane %v2716_v62, %v2205_v42  ;;  %v2217_v41 = vrot.slane %v2716_v62, %v2216_v43  ;;  %v2228_v31 = vrot.slane %v2716_v62, %v2227_v26  ;;  %v2239_v48 = vrot.slane %v2716_v62, %v2238_v56 }
 0x2f8   : > { %v2158_v44 = vpop.permute.xlu1 %2157  ;;  %v2250_v23 = vrot.slane %v2716_v62, %v2249_v0  ;;  %v2261_v2 = vrot.slane %v2716_v62, %v2260_v55  ;;  %v2272_v47 = vrot.slane %v2716_v62, %v2271_v24  ;;  %v2283_v30 = vrot.slane %v2716_v62, %v2282_v54 }
 0x2f9   : > { %2212 = vbcast.lane.b32.xlu1 %v2206_v53, 264  ;;  %2208 = vbcast.lane.b32.xlu0 %v2206_v53, 256  ;;  %v2162_v50 = vadd.f32 %v2158_v44, %v2149_v38 }
 0x2fc   : > { %v2173_v12 = vpop.permute.xlu1 %2172 }
 0x2fd   : > { %2223 = vbcast.lane.b32.xlu1 %v2217_v41, 264  ;;  %2219 = vbcast.lane.b32.xlu0 %v2217_v41, 256  ;;  %v2177_v49 = vadd.f32 %v2173_v12, %v2162_v50 }
 0x300   : > { %v2186_v25 = vpop.permute.xlu1 %2185 }
 0x301   : > { %v2190_v14 = vadd.f32 %v2186_v25, %v2177_v49  ;;  %2234 = vbcast.lane.b32.xlu1 %v2228_v31, 264  ;;  %2230 = vbcast.lane.b32.xlu0 %v2228_v31, 256 }
 0x303   : > { %v2192_v61 = vsub.f32 0.0, %v2190_v14 }
 0x305   : > { %v2195_v17 = vmul.f32 1.442695, %v2192_v61  ;;  %2245 = vbcast.lane.b32.xlu1 %v2239_v48, 264  ;;  %2241 = vbcast.lane.b32.xlu0 %v2239_v48, 256 }
 0x307   : > { %2717 = vpow2.f32 %v2195_v17 }
 0x309   : > { %2256 = vbcast.lane.b32.xlu1 %v2250_v23, 264  ;;  %2252 = vbcast.lane.b32.xlu0 %v2250_v23, 256 }
 0x30d   : > { %2267 = vbcast.lane.b32.xlu1 %v2261_v2, 264  ;;  %2263 = vbcast.lane.b32.xlu0 %v2261_v2, 256 }
 0x311   : > { %v2718_v13 = vpop.eup %2717  ;;  %2278 = vbcast.lane.b32.xlu1 %v2272_v47, 264  ;;  %2274 = vbcast.lane.b32.xlu0 %v2272_v47, 256  ;;  %v4746_v47 = vld [vmem:[#allocation12_spill] sm:$0xff] }
 0x312   : > { %v2198_v32 = vadd.f32 1.0, %v2718_v13 }
 0x314   : > { %2719 = vrcp.f32 %v2198_v32 }
 0x315   : > { %2289 = vbcast.lane.b32.xlu1 %v2283_v30, 264  ;;  %2285 = vbcast.lane.b32.xlu0 %v2283_v30, 256  ;;  %v4748_v30 = vld [vmem:[#allocation14_spill] sm:$0xff] }
 0x31e   : > { %v2720_v19 = vpop.eup %2719 }
 0x31f   : > { %v2294_v37 = vrot.slane %v2720_v19, %v2205_v42  ;;  %v2305_v20 = vrot.slane %v2720_v19, %v2216_v43  ;;  %v2316_v59 = vrot.slane %v2720_v19, %v2227_v26  ;;  %v2327_v9 = vrot.slane %v2720_v19, %v2238_v56 }
 0x320   : > { %v2338_v29 = vrot.slane %v2720_v19, %v2249_v0  ;;  %v2349_v11 = vrot.slane %v2720_v19, %v2260_v55  ;;  %v2360_v3 = vrot.slane %v2720_v19, %v2271_v24  ;;  %v2371_v60 = vrot.slane %v2720_v19, %v2282_v54 }
 0x321   : > { %2300 = vbcast.lane.b32.xlu1 %v2294_v37, 264  ;;  %2296 = vbcast.lane.b32.xlu0 %v2294_v37, 256 }
 0x325   : > { %2311 = vbcast.lane.b32.xlu1 %v2305_v20, 264  ;;  %2307 = vbcast.lane.b32.xlu0 %v2305_v20, 256  ;;  %v4749_v20 = vld [vmem:[#allocation15_spill] sm:$0xff] }
 0x329   : > { %2322 = vbcast.lane.b32.xlu1 %v2316_v59, 264  ;;  %2318 = vbcast.lane.b32.xlu0 %v2316_v59, 256 }
 0x32d   : > { %2333 = vbcast.lane.b32.xlu1 %v2327_v9, 264  ;;  %2329 = vbcast.lane.b32.xlu0 %v2327_v9, 256  ;;  %v4750_v9 = vld [vmem:[#allocation16_spill] sm:$0xff] }
 0x331   : > { %2344 = vbcast.lane.b32.xlu1 %v2338_v29, 264  ;;  %2340 = vbcast.lane.b32.xlu0 %v2338_v29, 256 }
 0x335   : > { %2355 = vbcast.lane.b32.xlu1 %v2349_v11, 264  ;;  %2351 = vbcast.lane.b32.xlu0 %v2349_v11, 256 }
 0x339   : > { %2366 = vbcast.lane.b32.xlu1 %v2360_v3, 264  ;;  %2362 = vbcast.lane.b32.xlu0 %v2360_v3, 256 }
 0x33d   : > { %2377 = vbcast.lane.b32.xlu1 %v2371_v60, 264  ;;  %2373 = vbcast.lane.b32.xlu0 %v2371_v60, 256  ;;  %v4751_v60 = vld [vmem:[#allocation17_spill] sm:$0xff] }
 0x36b   : > { %v2213_v7 = vpop.permute.xlu1 %2212  ;;  %v2209_v42 = vpop.permute.xlu0 %2208 }
 0x36c   : > { %v2380_v35 = vmul.f32 %v2213_v7, %v2927_v8  ;;  %v2379_v62 = vmul.f32 %v2209_v42, %v2920_v5  ;;  %v4752_v42 = vld [vmem:[#allocation18_spill] sm:$0xff] }
 0x36e   : > { %2412 = vst.msk [vmem:[%s4416_s29 + $0x8] sm:$0xff] %vm268_vm0, %v2380_v35  ;;  %2411 = vst.msk [vmem:[%s4416_s29] sm:$0xff] %vm268_vm0, %v2379_v62 }
 0x36f   : > { %v2224_v36 = vpop.permute.xlu1 %2223  ;;  %v2220_v44 = vpop.permute.xlu0 %2219 }
 0x370   : > { %v2382_v8 = vmul.f32 %v2224_v36, %v2923_v6  ;;  %v2381_v5 = vmul.f32 %v2220_v44, %v2917_v4  ;;  %v4753_v44 = vld [vmem:[#allocation19_spill] sm:$0xff] }
 0x372   : > { %2414 = vst.msk [vmem:[%s4416_s29 + $0x18] sm:$0xff] %vm268_vm0, %v2382_v8  ;;  %2413 = vst.msk [vmem:[%s4416_s29 + $0x10] sm:$0xff] %vm268_vm0, %v2381_v5  ;;  %v4754_v5 = vld [vmem:[#allocation20_spill] sm:$0xff] }
 0x373   : > { %v2235_v53 = vpop.permute.xlu1 %2234  ;;  %v2231_v43 = vpop.permute.xlu0 %2230 }
 0x374   : > { %v2384_v18 = vmul.f32 %v2235_v53, %v2940_v15  ;;  %v2383_v38 = vmul.f32 %v2231_v43, %v2943_v16 }
 0x376   : > { %2416 = vst.msk [vmem:[%s4416_s29 + $0x28] sm:$0xff] %vm268_vm0, %v2384_v18  ;;  %2415 = vst.msk [vmem:[%s4416_s29 + $0x20] sm:$0xff] %vm268_vm0, %v2383_v38 }
 0x377   : > { %v2246_v12 = vpop.permute.xlu1 %2245  ;;  %v2242_v6 = vpop.permute.xlu0 %2241 }
 0x378   : > { %v2386_v4 = vmul.f32 %v2246_v12, %v2952_v21  ;;  %v2385_v41 = vmul.f32 %v2242_v6, %v2955_v22 }
 0x37a   : > { %2418 = vst.msk [vmem:[%s4416_s29 + $0x38] sm:$0xff] %vm268_vm0, %v2386_v4  ;;  %2417 = vst.msk [vmem:[%s4416_s29 + $0x30] sm:$0xff] %vm268_vm0, %v2385_v41 }
 0x37b   : > { %v2257_v26 = vpop.permute.xlu1 %2256  ;;  %v2253_v15 = vpop.permute.xlu0 %2252 }
 0x37c   : > { %v2388_v16 = vmul.f32 %v2257_v26, %v2964_v27  ;;  %v2387_v50 = vmul.f32 %v2253_v15, %v2967_v28 }
 0x37e   : > { %2420 = vst.msk [vmem:[%s4416_s29 + $0x48] sm:$0xff] %vm268_vm0, %v2388_v16  ;;  %2419 = vst.msk [vmem:[%s4416_s29 + $0x40] sm:$0xff] %vm268_vm0, %v2387_v50 }
 0x37f   : > { %v2268_v49 = vpop.permute.xlu1 %2267  ;;  %v2264_v21 = vpop.permute.xlu0 %2263 }
 0x380   : > { %v2390_v22 = vmul.f32 %v2268_v49, %v2976_v33  ;;  %v2389_v25 = vmul.f32 %v2264_v21, %v2979_v34 }
 0x382   : > { %2422 = vst.msk [vmem:[%s4416_s29 + $0x58] sm:$0xff] %vm268_vm0, %v2390_v22  ;;  %2421 = vst.msk [vmem:[%s4416_s29 + $0x50] sm:$0xff] %vm268_vm0, %v2389_v25 }
 0x383   : > { %v2279_v31 = vpop.permute.xlu1 %2278  ;;  %v2275_v27 = vpop.permute.xlu0 %2274 }
 0x384   : > { %v2392_v28 = vmul.f32 %v2279_v31, %v2988_v39  ;;  %v2391_v56 = vmul.f32 %v2275_v27, %v2991_v40 }
 0x386   : > { %2424 = vst.msk [vmem:[%s4416_s29 + $0x68] sm:$0xff] %vm268_vm0, %v2392_v28  ;;  %2423 = vst.msk [vmem:[%s4416_s29 + $0x60] sm:$0xff] %vm268_vm0, %v2391_v56 }
 0x387   : > { %v2290_v14 = vpop.permute.xlu1 %2289  ;;  %v2286_v33 = vpop.permute.xlu0 %2285 }
 0x388   : > { %v2394_v34 = vmul.f32 %v2290_v14, %v3000_v45  ;;  %v2393_v61 = vmul.f32 %v2286_v33, %v3003_v46 }
 0x38a   : > { %2426 = vst.msk [vmem:[%s4416_s29 + $0x78] sm:$0xff] %vm268_vm0, %v2394_v34  ;;  %2425 = vst.msk [vmem:[%s4416_s29 + $0x70] sm:$0xff] %vm268_vm0, %v2393_v61 }
 0x393   : > { %v2301_v48 = vpop.permute.xlu1 %2300  ;;  %v2297_v39 = vpop.permute.xlu0 %2296 }
 0x394   : > { %v2396_v40 = vmul.f32 %v2301_v48, %v3012_v51  ;;  %v2395_v0 = vmul.f32 %v2297_v39, %v3015_v52 }
 0x396   : > { %2428 = vst.msk [vmem:[%s4416_s29 + $0x88] sm:$0xff] %vm268_vm0, %v2396_v40  ;;  %2427 = vst.msk [vmem:[%s4416_s29 + $0x80] sm:$0xff] %vm268_vm0, %v2395_v0 }
 0x397   : > { %v2312_v17 = vpop.permute.xlu1 %2311  ;;  %v2308_v45 = vpop.permute.xlu0 %2307 }
 0x398   : > { %v2398_v46 = vmul.f32 %v2312_v17, %v3024_v57  ;;  %v2397_v23 = vmul.f32 %v2308_v45, %v3027_v58 }
 0x39a   : > { %2430 = vst.msk [vmem:[%s4416_s29 + $0x98] sm:$0xff] %vm268_vm0, %v2398_v46  ;;  %2429 = vst.msk [vmem:[%s4416_s29 + $0x90] sm:$0xff] %vm268_vm0, %v2397_v23 }
 0x39b   : > { %v2323_v55 = vpop.permute.xlu1 %2322  ;;  %v2319_v51 = vpop.permute.xlu0 %2318 }
 0x39c   : > { %v2400_v52 = vmul.f32 %v2323_v55, %v3036_v63  ;;  %v2399_v2 = vmul.f32 %v2319_v51, %v3039_v1  ;;  %v4747_v1 = vld [vmem:[#allocation13_spill] sm:$0xff] }
 0x39e   : > { %2432 = vst.msk [vmem:[%s4416_s29 + $0xa8] sm:$0xff] %vm268_vm0, %v2400_v52  ;;  %2431 = vst.msk [vmem:[%s4416_s29 + $0xa0] sm:$0xff] %vm268_vm0, %v2399_v2 }
 0x39f   : > { %v2334_v24 = vpop.permute.xlu1 %2333  ;;  %v2330_v57 = vpop.permute.xlu0 %2329 }
 0x3a0   : > { %v2402_v58 = vmul.f32 %v2334_v24, %v3048_v10  ;;  %v2401_v54 = vmul.f32 %v2330_v57, %v4746_v47 }
 0x3a2   : > { %2434 = vst.msk [vmem:[%s4416_s29 + $0xb8] sm:$0xff] %vm268_vm0, %v2402_v58  ;;  %2433 = vst.msk [vmem:[%s4416_s29 + $0xb0] sm:$0xff] %vm268_vm0, %v2401_v54 }
 0x3a3   : > { %v2345_v13 = vpop.permute.xlu1 %2344  ;;  %v2341_v63 = vpop.permute.xlu0 %2340 }
 0x3a4   : > { %v2404_v32 = vmul.f32 %v2345_v13, %v4747_v1  ;;  %v2403_v19 = vmul.f32 %v2341_v63, %v4748_v30 }
 0x3a6   : > { %2436 = vst.msk [vmem:[%s4416_s29 + $0xc8] sm:$0xff] %vm268_vm0, %v2404_v32  ;;  %2435 = vst.msk [vmem:[%s4416_s29 + $0xc0] sm:$0xff] %vm268_vm0, %v2403_v19 }
 0x3a7   : > { %v2356_v10 = vpop.permute.xlu1 %2355  ;;  %v2352_v37 = vpop.permute.xlu0 %2351 }
 0x3a8   : > { %v2406_v59 = vmul.f32 %v2356_v10, %v4749_v20  ;;  %v2405_v29 = vmul.f32 %v2352_v37, %v4750_v9 }
 0x3aa   : > { %2438 = vst.msk [vmem:[%s4416_s29 + $0xd8] sm:$0xff] %vm268_vm0, %v2406_v59  ;;  %2437 = vst.msk [vmem:[%s4416_s29 + $0xd0] sm:$0xff] %vm268_vm0, %v2405_v29 }
 0x3ab   : > { %v2367_v11 = vpop.permute.xlu1 %2366  ;;  %v2363_v3 = vpop.permute.xlu0 %2362 }
 0x3ac   : > { %v2408_v7 = vmul.f32 %v2367_v11, %v4751_v60  ;;  %v2407_v35 = vmul.f32 %v2363_v3, %v4752_v42 }
 0x3ae   : > { %2440 = vst.msk [vmem:[%s4416_s29 + $0xe8] sm:$0xff] %vm268_vm0, %v2408_v7  ;;  %2439 = vst.msk [vmem:[%s4416_s29 + $0xe0] sm:$0xff] %vm268_vm0, %v2407_v35 }
 0x3af   : > { %v2378_v62 = vpop.permute.xlu1 %2377  ;;  %v2374_v36 = vpop.permute.xlu0 %2373 }
 0x3b0   : > { %v2410_v8 = vmul.f32 %v2378_v62, %v4753_v44  ;;  %v2409_v53 = vmul.f32 %v2374_v36, %v4754_v5 }
 0x3b2   : > { %2442 = vst.msk [vmem:[%s4416_s29 + $0xf8] sm:$0xff] %vm268_vm0, %v2410_v8  ;;  %2441 = vst.msk [vmem:[%s4416_s29 + $0xf0] sm:$0xff] %vm268_vm0, %v2409_v53 }
 0x3b3   : > { %2749 = shalt.err (!%p2746_p2)
}
 0x3b4   : > { %s2750_s8 = scalar_lea.hbm %s4511_s20, 4096  ;;  %s2754_s10 = scalar_lea.hbm %s4567_s3, 8192 }
 0x3b5   : > { %p2751_p3 = scmp.ne.s32.totalorder %s4511_s20, %s2750_s8  ;;  %p2755_p8 = scmp.lt.u32.totalorder %s4511_s20, %s4567_s3 }
 0x3b6   : > { %p2756_p11 = scmp.lt.u32.totalorder %s2754_s10, %s2750_s8  ;;  %p2758_p10 = scmp.lt.u32.totalorder %s2750_s8, %s4511_s20 }
 0x3b7   : > { %p2752_p4 = pnand %p2751_p3, %p2873_p5 }
 0x3b8   : > { %p2757_p9 = por %p2756_p11, %p2755_p8 }
 0x3b9   : > { %p2753_p7 = pneg %p2752_p4 }
 0x3ba   : > { %p2759_p12 = por %p2758_p10, %p2757_p9 }
 0x3bc   : > { %p2760_p13 = pnand %p2759_p12, %p2753_p7 }
 0x3be   : > { %2763 = shalt.err (!%p2760_p13)
}
 0x3bf   : > { %s2813_s17 = smov 128   ;;  %s2814_s0 = smov 8  }
 0x3c0   : > { %2658 = dma.vmem_to_hbm [thread:$0]  (%p2873_p5), %s4513_s24, 4096, %s4511_s20, %s4523_s16, %s2813_s17, %s2813_s17, %s2814_s0  }
 0x3c1 PF: > { %p2670_p0 = scmp.ge.s32.totalorder %s2802_s15, 2  ;;  %s2472_s2 = sand.u32 1, %s2790_s12  }
 0x3c2   : > { %s2473_s5 = scalar_lea.sflag [#allocation5], %s2472_s2 }
 0x3c3   : > { %p2665_p1 = pnand %p2670_p0, %p2877_p6 }
 0x3c5   : > { %2785 = dma.done.wait (!%p2665_p1), %s2473_s5, 4096  }
 0x3c6   : > { %2787 = vsyncadd (!%p2665_p1), %s2473_s5, 4294963200  ;;  %s4755_s7 = sld [smem:[#allocation10_spill]]  ;;  %s4756_s14 = sld [smem:[#allocation11_spill]] }
 0x3c7   : > { %p14_p2 = scmp.ge.s32.totalorder %s2860_s18, 4   ;;  %s4757_s12 = smov %s2794_s13 }
 0x3c8   : > { %s4759_s15 = smov %s2860_s18 }
 0x3c9   :  { %16 = sbr.rel (!%p14_p2) target bundleno = 8 (0x8), region = 75 }
 0x3cc   : > { %s4758_s13 = smov %s4755_s7 }
 0x3d0   :  { %2478 = vsyncpa [#allocation5], 1 }
 0x3d1   :  { %2480 = vsyncpa [#allocation5 + $0x1], 1 }
 0x3d2   :  { %2481 = vsyncpa [#allocation6], 1 }
 0x3d3   :  { %2483 = vsyncpa [#allocation6 + $0x1], 1 }

</bundles_post_ra>
